<compile_context>
chip_gen: v7x
topology: tpu7x:2x2x1
jax: 0.10.0
libtpu: 0.0.40
codegen_flags: <defaults>
</compile_context>

<pallas_src>
import functools

import jax
import jax.numpy as jnp
import numpy as np
from jax.experimental import pallas as pl
from jax.experimental.pallas import tpu as pltpu

NEG_SLOPE = 0.01  # LeakyReLU negative_slope from __init__ default


def _heco_gat_kernel(occ_ref, el_ref, er_ref, adj_ref, feat_src_ref,
                     out_ref, m_sc, l_sc, acc_sc, *, negative_slope):
    i = pl.program_id(0)
    j = pl.program_id(1)

    @pl.when(j == 0)
    def _init():
        m_sc[...] = jnp.full_like(m_sc, -jnp.inf)
        l_sc[...] = jnp.zeros_like(l_sc)
        acc_sc[...] = jnp.zeros_like(acc_sc)

    # Skip (dst-tile, src-tile) blocks with no edges (sparse graphs / padding).
    @pl.when(occ_ref[i, j] > 0)
    def _compute():
        # u_add_v + LeakyReLU on this block.  Score path in bf16 (VALU/EUP
        # bound on v6e/v7x); m/l/acc stay f32.
        # TODO(synk): on v5e (no bf16 VPU/EUP) an f32 score path is preferable.
        el = el_ref[...].astype(jnp.bfloat16)                  # (1, TS)
        er = er_ref[...].astype(jnp.bfloat16)                  # (TD, 1)
        e = er + el                                            # (TD, TS) bf16
        e = jnp.where(e > 0, e, negative_slope * e)

        # Edge mask: only real edges participate in the softmax.
        mask = adj_ref[...] != 0                               # (TD, TS) bool
        e = jnp.where(mask, e, -1e30)                          # finite sentinel

        # Online softmax update (flash-attention style) over src tiles.
        m_prev = m_sc[...]                                     # (TD, 1) f32
        row_max = jnp.max(e, axis=-1, keepdims=True).astype(jnp.float32)
        m_new = jnp.maximum(m_prev, row_max)
        alpha = jnp.exp(m_prev - m_new)                        # (TD, 1) f32
        p = jnp.exp(e - m_new.astype(jnp.bfloat16))            # (TD, TS) bf16
        # Second mask is required: fully-masked rows have e - m_new == 0.
        p = jnp.where(mask, p, 0.0)
        l_sc[...] = alpha * l_sc[...] + jnp.sum(
            p.astype(jnp.float32), axis=-1, keepdims=True)
        # update_all(u_mul_e('ft','a'), sum) == p @ feat_src (bf16 MXU, f32 acc).
        acc_sc[...] = alpha * acc_sc[...] + jnp.dot(
            p, feat_src_ref[...], preferred_element_type=jnp.float32)
        m_sc[...] = m_new

    @pl.when(j == pl.num_programs(1) - 1)
    def _finalize():
        # Isolated dst nodes (no incoming edges, l == 0) output a zero row,
        # matching DGL's sum over an empty message set.  Guard l == 0 so the
        # approximate reciprocal can never produce inf/NaN.
        l = l_sc[...]
        has_edges = l > 0
        inv = pl.reciprocal(jnp.where(has_edges, l, 1.0), approx=True)
        out_ref[...] = jnp.where(has_edges, acc_sc[...] * inv,
                                 0.0).astype(out_ref.dtype)
        # TODO(synk): self.activation defaults to None; apply it here if set.


def heco_gat_conv(feat_src, feat_dst, adj, attn_l, attn_r, *,
                  tile_dst=256, tile_src=512, negative_slope=NEG_SLOPE):
    n_src, d = feat_src.shape
    n_dst, d2 = feat_dst.shape
    assert d == d2
    assert adj.shape == (n_dst, n_src)

    # TODO(synk): attn_drop (nn.Dropout on attn_l/attn_r) defaults to 0.0 and is
    # a no-op at inference, so it is not implemented in the kernel.

    # el / er hoisted out of the kernel: computed once in f32,
    # el lane-major (1, N_src), er sublane-major (N_dst, 1).
    attn_l32 = attn_l.astype(jnp.float32)
    attn_r32 = attn_r.astype(jnp.float32)
    el = jnp.sum(feat_src.astype(jnp.float32) * attn_l32, axis=-1)[None, :]
    er = jnp.sum(feat_dst.astype(jnp.float32) * attn_r32, axis=-1)[:, None]

    # adj as int8 mask (4x less HBM/VMEM than f32; it dominates the bytes).
    if adj.dtype != jnp.int8:
        adj = (adj != 0).astype(jnp.int8)

    # feat_src in bf16 for the MXU aggregation (f32 accumulation in-kernel).
    feat_src_bf16 = feat_src.astype(jnp.bfloat16)

    # Clamp tiles for small inputs (keep int8/bf16 tiling alignment).
    tile_dst = min(tile_dst, 32 * pl.cdiv(n_dst, 32))
    tile_src = min(tile_src, 128 * pl.cdiv(n_src, 128))

    # Pad to tile multiples. Padded src columns have adj == 0 (masked out);
    # padded dst rows produce zeros and are sliced off below.
    n_src_p = tile_src * pl.cdiv(n_src, tile_src)
    n_dst_p = tile_dst * pl.cdiv(n_dst, tile_dst)
    if n_src_p != n_src:
        pad_s = n_src_p - n_src
        feat_src_bf16 = jnp.pad(feat_src_bf16, ((0, pad_s), (0, 0)))
        el = jnp.pad(el, ((0, 0), (0, pad_s)))
        adj = jnp.pad(adj, ((0, 0), (0, pad_s)))
    if n_dst_p != n_dst:
        pad_d = n_dst_p - n_dst
        er = jnp.pad(er, ((0, pad_d), (0, 0)))
        adj = jnp.pad(adj, ((0, pad_d), (0, 0)))

    n_dst_tiles = n_dst_p // tile_dst
    n_src_tiles = n_src_p // tile_src

    # Per-(dst-tile, src-tile) occupancy, scalar-prefetched to SMEM: empty
    # blocks skip all per-element work (big win on realistically sparse graphs).
    occ = jnp.any(
        (adj != 0).reshape(n_dst_tiles, tile_dst, n_src_tiles, tile_src),
        axis=(1, 3)).astype(jnp.int32)

    grid = (n_dst_tiles, n_src_tiles)
    kernel = functools.partial(_heco_gat_kernel, negative_slope=negative_slope)

    out = pl.pallas_call(
        kernel,
        out_shape=jax.ShapeDtypeStruct((n_dst_p, d), feat_dst.dtype),
        grid_spec=pltpu.PrefetchScalarGridSpec(
            num_scalar_prefetch=1,
            grid=grid,
            in_specs=[
                pl.BlockSpec((1, tile_src), lambda i, j, occ: (0, j)),         # el
                pl.BlockSpec((tile_dst, 1), lambda i, j, occ: (i, 0)),         # er
                pl.BlockSpec((tile_dst, tile_src),
                             lambda i, j, occ: (i, j)),                        # adj (int8)
                pl.BlockSpec((tile_src, d), lambda i, j, occ: (j, 0)),         # feat_src (bf16)
            ],
            out_specs=pl.BlockSpec((tile_dst, d), lambda i, j, occ: (i, 0)),
            scratch_shapes=[
                pltpu.VMEM((tile_dst, 1), jnp.float32),   # running max m
                pltpu.VMEM((tile_dst, 1), jnp.float32),   # running sum l
                pltpu.VMEM((tile_dst, d), jnp.float32),   # output accumulator
            ]),
        compiler_params=pltpu.CompilerParams(
            dimension_semantics=("parallel", "arbitrary")),
    )(occ, el, er, adj, feat_src_bf16)

    return out[:n_dst]


def _reference(feat_src, feat_dst, adj, attn_l, attn_r,
               negative_slope=NEG_SLOPE):
    el = jnp.sum(feat_src * attn_l, axis=-1, keepdims=True)     # (Ns, 1)
    er = jnp.sum(feat_dst * attn_r, axis=-1, keepdims=True)     # (Nd, 1)
    e = er + el.T
    e = jnp.where(e > 0, e, negative_slope * e)
    mask = adj != 0
    e = jnp.where(mask, e, -1e30)
    m = jnp.max(e, axis=-1, keepdims=True)
    p = jnp.where(mask, jnp.exp(e - m), 0.0)
    s = jnp.sum(p, axis=-1, keepdims=True)
    a = jnp.where(s > 0, p / jnp.maximum(s, 1e-30), 0.0)
    return a @ feat_src


if __name__ == "__main__":
    hidden_dim = 32
    n_src, n_dst = 600, 300   # not tile multiples: exercises padding + multi-tile grid

    key = jax.random.PRNGKey(0)
    k_fs, k_fd, k_adj, k_al, k_ar = jax.random.split(key, 5)

    feat_src = jax.random.normal(k_fs, (n_src, hidden_dim), dtype=jnp.float32)
    feat_dst = jax.random.normal(k_fd, (n_dst, hidden_dim), dtype=jnp.float32)

    # Random bipartite adjacency (dense 0/1 mask), ~25% density, int8.
    adj = (jax.random.uniform(k_adj, (n_dst, n_src)) < 0.25).astype(jnp.int8)
    # A few isolated dst nodes to exercise the empty-row (l == 0) path.
    adj = adj.at[:3].set(0)

    # xavier_normal_ with gain = calculate_gain('relu') = sqrt(2) on a (1, D)
    # parameter: std = gain * sqrt(2 / (fan_in + fan_out)).
    gain = np.sqrt(2.0)
    std = gain * np.sqrt(2.0 / (hidden_dim + 1.0))
    attn_l = std * jax.random.normal(k_al, (1, hidden_dim), dtype=jnp.float32)
    attn_r = std * jax.random.normal(k_ar, (1, hidden_dim), dtype=jnp.float32)

    out = heco_gat_conv(feat_src, feat_dst, adj, attn_l, attn_r)
    out = jax.block_until_ready(out)

    ref = _reference(feat_src, feat_dst, adj, attn_l, attn_r)
    # bf16 score path + bf16 MXU inputs (f32 accumulation) -> relaxed tolerance.
    np.testing.assert_allclose(np.asarray(out), np.asarray(ref),
                               rtol=3e-2, atol=3e-2)
    print("KERNEL_OK")
</pallas_src>

<mosaic_0001>
module attributes {stable_mosaic.version = 11 : i64} {
  func.func @_heco_gat_kernel(%arg0: i32, %arg1: i32, %arg2: memref<2x2xi32, #tpu.memory_space<smem>>, %arg3: memref<1x512xf32, #tpu.memory_space<vmem>>, %arg4: memref<256x1xf32, #tpu.memory_space<vmem>>, %arg5: memref<256x512xi8, #tpu.memory_space<vmem>>, %arg6: memref<512x32xbf16, #tpu.memory_space<vmem>>, %arg7: memref<256x32xf32, #tpu.memory_space<vmem>>, %arg8: memref<256x1xf32, #tpu.memory_space<vmem>>, %arg9: memref<256x1xf32, #tpu.memory_space<vmem>>, %arg10: memref<256x32xf32, #tpu.memory_space<vmem>>) attributes {dimension_semantics = [#tpu.dimension_semantics<parallel>, #tpu.dimension_semantics<arbitrary>], iteration_bounds = array<i64: 2, 2>, scalar_prefetch = 1 : i64, scratch_operands = 3 : i64, tpu.core_type = #tpu.core_type<tc>, window_params = [{transform_indices = @transform_0, window_bounds = array<i64: 1, 512>}, {transform_indices = @transform_1, window_bounds = array<i64: 256, 1>}, {transform_indices = @transform_2, window_bounds = array<i64: 256, 512>}, {transform_indices = @transform_3, window_bounds = array<i64: 512, 32>}, {transform_indices = @transform_4, window_bounds = array<i64: 256, 32>}]} {
    %c0_i32 = arith.constant 0 : i32
    %0 = arith.cmpi eq, %arg1, %c0_i32 : i32
    %1 = arith.extui %0 : i1 to i32
    %c0_i32_0 = arith.constant 0 : i32
    %2 = arith.cmpi ne, %1, %c0_i32_0 : i32
    scf.if %2 {
      %cst = arith.constant 0xFF800000 : f32
      %12 = vector.broadcast %cst : f32 to vector<256x1xf32>
      %c0 = arith.constant 0 : index
      %c0_4 = arith.constant 0 : index
      %13 = vector.load %arg8[%c0, %c0_4] : memref<256x1xf32, #tpu.memory_space<vmem>>, vector<256x1xf32>
      tpu.vector_store %arg8[%c0, %c0_4], %12 {strides = array<i32>} : memref<256x1xf32, #tpu.memory_space<vmem>>, vector<256x1xf32>,
      %cst_5 = arith.constant 0.000000e+00 : f32
      %14 = vector.broadcast %cst_5 : f32 to vector<256x1xf32>
      %c0_6 = arith.constant 0 : index
      %c0_7 = arith.constant 0 : index
      %15 = vector.load %arg9[%c0_6, %c0_7] : memref<256x1xf32, #tpu.memory_space<vmem>>, vector<256x1xf32>
      tpu.vector_store %arg9[%c0_6, %c0_7], %14 {strides = array<i32>} : memref<256x1xf32, #tpu.memory_space<vmem>>, vector<256x1xf32>,
      %cst_8 = arith.constant 0.000000e+00 : f32
      %16 = vector.broadcast %cst_8 : f32 to vector<256x32xf32>
      %c0_9 = arith.constant 0 : index
      %c0_10 = arith.constant 0 : index
      %17 = vector.load %arg10[%c0_9, %c0_10] : memref<256x32xf32, #tpu.memory_space<vmem>>, vector<256x32xf32>
      tpu.vector_store %arg10[%c0_9, %c0_10], %16 {strides = array<i32>} : memref<256x32xf32, #tpu.memory_space<vmem>>, vector<256x32xf32>,
    } else {
    }
    %3 = arith.index_cast %arg0 : i32 to index
    %4 = arith.index_cast %arg1 : i32 to index
    %5 = memref.load %arg2[%3, %4] : memref<2x2xi32, #tpu.memory_space<smem>>
    %c0_i32_1 = arith.constant 0 : i32
    %6 = arith.cmpi sgt, %5, %c0_i32_1 : i32
    %7 = arith.extui %6 : i1 to i32
    %c0_i32_2 = arith.constant 0 : i32
    %8 = arith.cmpi ne, %7, %c0_i32_2 : i32
    scf.if %8 {
      %c0 = arith.constant 0 : index
      %c0_4 = arith.constant 0 : index
      %12 = vector.load %arg3[%c0, %c0_4] : memref<1x512xf32, #tpu.memory_space<vmem>>, vector<1x512xf32>
      %13 = arith.truncf %12 : vector<1x512xf32> to vector<1x512xbf16>
      %c0_5 = arith.constant 0 : index
      %c0_6 = arith.constant 0 : index
      %14 = vector.load %arg4[%c0_5, %c0_6] : memref<256x1xf32, #tpu.memory_space<vmem>>, vector<256x1xf32>
      %15 = arith.truncf %14 : vector<256x1xf32> to vector<256x1xbf16>
      %16 = vector.broadcast %15 : vector<256x1xbf16> to vector<256x512xbf16>
      %17 = vector.broadcast %13 : vector<1x512xbf16> to vector<256x512xbf16>
      %18 = arith.addf %16, %17 : vector<256x512xbf16>
      %cst = arith.constant 0.000000e+00 : bf16
      %19 = vector.broadcast %cst : bf16 to vector<256x512xbf16>
      %20 = arith.cmpf ogt, %18, %19 : vector<256x512xbf16>
      %cst_7 = arith.constant 1.000980e-02 : bf16
      %21 = vector.broadcast %cst_7 : bf16 to vector<256x512xbf16>
      %22 = arith.mulf %21, %18 : vector<256x512xbf16>
      %23 = arith.select %20, %18, %22 : vector<256x512xi1>, vector<256x512xbf16>
      %c0_8 = arith.constant 0 : index
      %c0_9 = arith.constant 0 : index
      %24 = vector.load %arg5[%c0_8, %c0_9] : memref<256x512xi8, #tpu.memory_space<vmem>>, vector<256x512xi8>
      %c0_i8 = arith.constant 0 : i8
      %25 = vector.broadcast %c0_i8 : i8 to vector<256x512xi8>
      %26 = arith.cmpi ne, %24, %25 : vector<256x512xi8>
      %cst_10 = arith.constant -1.000000e+30 : f32
      %27 = arith.truncf %cst_10 : f32 to bf16
      %28 = vector.broadcast %27 : bf16 to vector<256x512xbf16>
      %29 = arith.select %26, %23, %28 : vector<256x512xi1>, vector<256x512xbf16>
      %c0_11 = arith.constant 0 : index
      %c0_12 = arith.constant 0 : index
      %30 = vector.load %arg8[%c0_11, %c0_12] : memref<256x1xf32, #tpu.memory_space<vmem>>, vector<256x1xf32>
      %cst_13 = arith.constant dense<0xFF80> : vector<256xbf16>
      %31 = vector.multi_reduction <maximumf>, %29, %cst_13 [1] : vector<256x512xbf16> to vector<256xbf16>
      %32 = vector.shape_cast %31 : vector<256xbf16> to vector<256x1xbf16>
      %33 = arith.extf %32 : vector<256x1xbf16> to vector<256x1xf32>
      %34 = arith.maximumf %30, %33 : vector<256x1xf32>
      %35 = arith.subf %30, %34 : vector<256x1xf32>
      %36 = math.exp %35 : vector<256x1xf32>
      %37 = arith.truncf %34 : vector<256x1xf32> to vector<256x1xbf16>
      %38 = vector.broadcast %37 : vector<256x1xbf16> to vector<256x512xbf16>
      %39 = arith.subf %29, %38 : vector<256x512xbf16>
      %40 = math.exp %39 : vector<256x512xbf16>
      %cst_14 = arith.constant 0.000000e+00 : f32
      %41 = arith.truncf %cst_14 : f32 to bf16
      %42 = vector.broadcast %41 : bf16 to vector<256x512xbf16>
      %43 = arith.select %26, %40, %42 : vector<256x512xi1>, vector<256x512xbf16>
      %c0_15 = arith.constant 0 : index
      %c0_16 = arith.constant 0 : index
      %44 = vector.load %arg9[%c0_15, %c0_16] : memref<256x1xf32, #tpu.memory_space<vmem>>, vector<256x1xf32>
      %45 = arith.mulf %36, %44 : vector<256x1xf32>
      %46 = arith.extf %43 : vector<256x512xbf16> to vector<256x512xf32>
      %cst_17 = arith.constant dense<0.000000e+00> : vector<256xf32>
      %47 = vector.multi_reduction <add>, %46, %cst_17 [1] : vector<256x512xf32> to vector<256xf32>
      %48 = vector.shape_cast %47 : vector<256xf32> to vector<256x1xf32>
      %49 = arith.addf %45, %48 : vector<256x1xf32>
      %c0_18 = arith.constant 0 : index
      %c0_19 = arith.constant 0 : index
      %50 = vector.load %arg9[%c0_18, %c0_19] : memref<256x1xf32, #tpu.memory_space<vmem>>, vector<256x1xf32>
      tpu.vector_store %arg9[%c0_18, %c0_19], %49 {strides = array<i32>} : memref<256x1xf32, #tpu.memory_space<vmem>>, vector<256x1xf32>,
      %c0_20 = arith.constant 0 : index
      %c0_21 = arith.constant 0 : index
      %51 = vector.load %arg10[%c0_20, %c0_21] : memref<256x32xf32, #tpu.memory_space<vmem>>, vector<256x32xf32>
      %52 = vector.broadcast %36 : vector<256x1xf32> to vector<256x32xf32>
      %53 = arith.mulf %52, %51 : vector<256x32xf32>
      %c0_22 = arith.constant 0 : index
      %c0_23 = arith.constant 0 : index
      %54 = vector.load %arg6[%c0_22, %c0_23] : memref<512x32xbf16, #tpu.memory_space<vmem>>, vector<512x32xbf16>
      %cst_24 = arith.constant dense<0.000000e+00> : vector<256x32xf32>
      %55 = tpu.matmul %43, %54, %cst_24 {dimension_numbers = #tpu.dot_dimension_numbers<[1], [0], [0], [1], [0, 0, 1, 1], [], []>} : vector<256x512xbf16>, vector<512x32xbf16>, vector<256x32xf32> -> vector<256x32xf32>
      %56 = arith.addf %53, %55 : vector<256x32xf32>
      %c0_25 = arith.constant 0 : index
      %c0_26 = arith.constant 0 : index
      %57 = vector.load %arg10[%c0_25, %c0_26] : memref<256x32xf32, #tpu.memory_space<vmem>>, vector<256x32xf32>
      tpu.vector_store %arg10[%c0_25, %c0_26], %56 {strides = array<i32>} : memref<256x32xf32, #tpu.memory_space<vmem>>, vector<256x32xf32>,
      %c0_27 = arith.constant 0 : index
      %c0_28 = arith.constant 0 : index
      %58 = vector.load %arg8[%c0_27, %c0_28] : memref<256x1xf32, #tpu.memory_space<vmem>>, vector<256x1xf32>
      tpu.vector_store %arg8[%c0_27, %c0_28], %34 {strides = array<i32>} : memref<256x1xf32, #tpu.memory_space<vmem>>, vector<256x1xf32>,
    } else {
    }
    %c1_i32 = arith.constant 1 : i32
    %9 = arith.cmpi eq, %arg1, %c1_i32 : i32
    %10 = arith.extui %9 : i1 to i32
    %c0_i32_3 = arith.constant 0 : i32
    %11 = arith.cmpi ne, %10, %c0_i32_3 : i32
    scf.if %11 {
      %c0 = arith.constant 0 : index
      %c0_4 = arith.constant 0 : index
      %12 = vector.load %arg9[%c0, %c0_4] : memref<256x1xf32, #tpu.memory_space<vmem>>, vector<256x1xf32>
      %cst = arith.constant 0.000000e+00 : f32
      %13 = vector.broadcast %cst : f32 to vector<256x1xf32>
      %14 = arith.cmpf ogt, %12, %13 : vector<256x1xf32>
      %cst_5 = arith.constant 1.000000e+00 : f32
      %15 = vector.broadcast %cst_5 : f32 to vector<256x1xf32>
      %16 = arith.select %14, %12, %15 : vector<256x1xi1>, vector<256x1xf32>
      %17 = tpu.reciprocal %16 {approx = true} : vector<256x1xf32> -> vector<256x1xf32>
      %c0_6 = arith.constant 0 : index
      %c0_7 = arith.constant 0 : index
      %18 = vector.load %arg10[%c0_6, %c0_7] : memref<256x32xf32, #tpu.memory_space<vmem>>, vector<256x32xf32>
      %19 = vector.broadcast %17 : vector<256x1xf32> to vector<256x32xf32>
      %20 = arith.mulf %18, %19 : vector<256x32xf32>
      %cst_8 = arith.constant 0.000000e+00 : f32
      %21 = vector.shape_cast %14 : vector<256x1xi1> to vector<256x1xi1>
      %22 = vector.broadcast %21 : vector<256x1xi1> to vector<256x32xi1>
      %23 = vector.broadcast %cst_8 : f32 to vector<256x32xf32>
      %24 = arith.select %22, %20, %23 : vector<256x32xi1>, vector<256x32xf32>
      %c0_9 = arith.constant 0 : index
      %c0_10 = arith.constant 0 : index
      %25 = vector.load %arg7[%c0_9, %c0_10] : memref<256x32xf32, #tpu.memory_space<vmem>>, vector<256x32xf32>
      tpu.vector_store %arg7[%c0_9, %c0_10], %24 {strides = array<i32>} : memref<256x32xf32, #tpu.memory_space<vmem>>, vector<256x32xf32>,
    } else {
    }
    return
  }
  func.func @transform_0(%arg0: i32, %arg1: i32, %arg2: memref<2x2xi32, #tpu.memory_space<smem>>) -> (i32, i32) {
    %c0_i32 = arith.constant 0 : i32
    %c0_i32_0 = arith.constant 0 : i32
    return %c0_i32, %arg1 : i32, i32
  }
  func.func @transform_1(%arg0: i32, %arg1: i32, %arg2: memref<2x2xi32, #tpu.memory_space<smem>>) -> (i32, i32) {
    %c0_i32 = arith.constant 0 : i32
    %c0_i32_0 = arith.constant 0 : i32
    return %arg0, %c0_i32 : i32, i32
  }
  func.func @transform_2(%arg0: i32, %arg1: i32, %arg2: memref<2x2xi32, #tpu.memory_space<smem>>) -> (i32, i32) {
    %c0_i32 = arith.constant 0 : i32
    return %arg0, %arg1 : i32, i32
  }
  func.func @transform_3(%arg0: i32, %arg1: i32, %arg2: memref<2x2xi32, #tpu.memory_space<smem>>) -> (i32, i32) {
    %c0_i32 = arith.constant 0 : i32
    %c0_i32_0 = arith.constant 0 : i32
    return %arg1, %c0_i32 : i32, i32
  }
  func.func @transform_4(%arg0: i32, %arg1: i32, %arg2: memref<2x2xi32, #tpu.memory_space<smem>>) -> (i32, i32) {
    %c0_i32 = arith.constant 0 : i32
    %c0_i32_0 = arith.constant 0 : i32
    return %arg0, %c0_i32 : i32, i32
  }
}

</mosaic_0001>

<bundles_post_ra>
// kernel: tpu_custom_call.1
= control target key start
LH: loop header
LB: loop body
LE: loop exit
PB: predicated region body
PF: predicated region fallthrough
CT: control target
= control target key end

     0   :  { %s8208_s0 = inlined_call_operand.vmem [shape: s32[2,2], index: 0, kind: input, shape index: {}]   ;;  %s8209_s1 = inlined_call_operand.vmem [shape: f32[1,1024], index: 1, kind: input, shape index: {}]   ;;  %s8210_s2 = inlined_call_operand.vmem [shape: f32[512,1], index: 2, kind: input, shape index: {}]   ;;  %s8211_s3 = inlined_call_operand.vmem [shape: s8[512,1024], index: 3, kind: input, shape index: {}]   ;;  %s8212_s4 = inlined_call_operand.vmem [shape: bf16[1024,32], index: 4, kind: input, shape index: {}]   ;;  %s8213_s5 = inlined_call_operand.vmem [shape: f32[512,32], index: 5, kind: output, shape index: {}]  }
   0x1   :  { %s10_s20 = sshll.u32 %s8208_s0, 4  ;;  %s11_s20 = int_to_ptr.vmem [resolvable:$true] %s10_s20 }
   0x2   :  { %s4846_s21 = scalar_lea.vmem %s11_s20, 32  ;;  %p4851_p1 = scmp.lt.s32.totalorder %s11_s20, %s11_s20 }
   0x3   :  { %p4847_p0 = scmp.ne.s32.totalorder %s11_s20, %s4846_s21  ;;  %p4852_p2 = scmp.lt.s32.totalorder %s4846_s21, %s4846_s21 }
   0x5   :  { %p4853_p3 = por %p4852_p2, %p4851_p1 }
   0x7   :  { %p4854_p4 = pnand %p4853_p3, %p4847_p0 }
   0x9   :  { %4857 = shalt.err (!%p4854_p4)  }
   0xa   :  { %s4916_s22 = smov [#allocation6]  }
   0xb   :  { %13 = dma.vmem_to_smem %s11_s20, 32, %s4916_s22, [#allocation5] }
   0xc   :  { %4886 = dma.done.wait [#allocation5], 32 }
   0xd   :  { %4887 = vsyncadd [#allocation5], 4294967264 }
   0xe   :  { %15 = sfence }
   0xf   :  { %s4954_s23 = smov 0   ;;  %s4956_s24 = smov 0  }
  0x10   :  { %s4958_s25 = smov 0   ;;  %s4960_s0 = smov 0  }
  0x11   :  { %s4962_s26 = smov 0   ;;  %s4964_s27 = smov 0  }
  0x12   :  { %s4966_s28 = smov 0  }
  0x13 LB: > { %s30_s29 = sadd.s32 1, %s4906_s26  ;;  %s33_s30 = sadd.s32 1, %s4910_s27  ;;  %s4914_s28 = sphi %s4966_s28, %s21_s28   ;;  %s4910_s27 = sphi %s4964_s27, %s9098_s27   ;;  %s4906_s26 = sphi %s4962_s26, %s9097_s26   ;;  %s4902_s0 = sphi %s4960_s0, %s9096_s0   ;;  %s4898_s25 = sphi %s4958_s25, %s9095_s25   ;;  %s4894_s24 = sphi %s4956_s24, %s9094_s24   ;;  %s4890_s23 = sphi %s4954_s23, %s9093_s23  }
  0x14   : > { %p31_p5 = scmp.ge.s32.totalorder %s30_s29, 2  ;;  %p101_p6 = scmp.ne.s32.totalorder %s4894_s24, %s4890_s23 }
  0x15   : > { %p102_p7 = scmp.eq.s32.totalorder %s4914_s28, 0  ;;  %s94_s9 = sadd.s32 1, %s4894_s24 }
  0x16   : > { %s9100_s29 = smov (%p31_p5, %s30_s29), 0  ;;  %s9102_s30 = smov (!%p31_p5, %s33_s30), %s4910_s27 }
  0x17   : > { %p103_p8 = por %p102_p7, %p101_p6  ;;  %p35_p9 = scmp.ge.s32.totalorder %s9102_s30, 2 }
  0x18   : > { %s90_s6 = ssub.s32 %s4906_s26, %s9100_s29  ;;  %p4151_p11 = scmp.ge.s32.totalorder %s4914_s28, 4 }
  0x19   : > { %s9104_s30 = smov (%p35_p9, %s9102_s30), 0 }
  0x1a   : > { %s89_s7 = ssub.s32 %s4910_s27, %s9104_s30  ;;  %179 = sbr.rel (%p4151_p11) target bundleno = 56 (0x38), region = 16 }
  0x1b   : > { %s91_s8 = sor.u32 %s90_s6, %s89_s7 }
  0x1c   : > { %p92_p10 = scmp.eq.s32.totalorder %s91_s8, 0 }
  0x1e   : > { %s5005_s10 = scalar_select %p92_p10, %s4894_s24, %s94_s9  }
  0x21   : > { %199 = sbr.rel (!%p103_p8) target bundleno = 56 (0x38), region = 28  ;;  %s201_s11 = sand.u32 (%p103_p8), 1, %s4894_s24  }
  0x22   : > { %s4154_s12 = sshll.u32 (%p103_p8), %s4906_s26, 2  ;;  %s4152_s13 = sshll.u32 (%p103_p8), %s201_s11, 8 }
  0x23   : > { %s4268_s14 = sshll.u32 (%p103_p8), %s4910_s27, 6  ;;  %s5019_s20 = scalar_lea.vmem (%p103_p8), [#allocation7], %s4152_s13 }
  0x24   : > { %s207_s15 = sadd.s32 (%p103_p8), %s4268_s14, %s4154_s12 }
  0x25   : > { %s4156_s16 = sshll.u32 (%p103_p8), %s207_s15, 3 }
  0x26   : > { %s5014_s19 = scalar_lea.vmem (%p103_p8), %s8211_s3, %s4156_s16 }
  0x27   : > { %v222_v0 = vld [vmem:[%s5014_s19] sm:$0xff] (%p103_p8)  ;;  %v224_v1 = vld [vmem:[%s5014_s19 + $0x8] sm:$0xff] (%p103_p8)  ;;  %v226_v2 = vld [vmem:[%s5014_s19 + $0x10] sm:$0xff] (%p103_p8) }
  0x28   : > { %223 = vst [vmem:[%s5019_s20] sm:$0xff] %v222_v0  ;;  %225 = vst [vmem:[%s5019_s20 + $0x8] sm:$0xff] %v224_v1  ;;  %v228_v3 = vld [vmem:[%s5014_s19 + $0x18] sm:$0xff]  ;;  %v230_v4 = vld [vmem:[%s5014_s19 + $0x40] sm:$0xff] }
  0x29   : > { %227 = vst [vmem:[%s5019_s20 + $0x10] sm:$0xff] %v226_v2  ;;  %v232_v5 = vld [vmem:[%s5014_s19 + $0x48] sm:$0xff]  ;;  %229 = vst [vmem:[%s5019_s20 + $0x18] sm:$0xff] %v228_v3  ;;  %v234_v6 = vld [vmem:[%s5014_s19 + $0x50] sm:$0xff] }
  0x2a   : > { %231 = vst [vmem:[%s5019_s20 + $0x20] sm:$0xff] %v230_v4  ;;  %233 = vst [vmem:[%s5019_s20 + $0x28] sm:$0xff] %v232_v5  ;;  %v236_v7 = vld [vmem:[%s5014_s19 + $0x58] sm:$0xff]  ;;  %v238_v8 = vld [vmem:[%s5014_s19 + $0x80] sm:$0xff] }
  0x2b   : > { %235 = vst [vmem:[%s5019_s20 + $0x30] sm:$0xff] %v234_v6  ;;  %237 = vst [vmem:[%s5019_s20 + $0x38] sm:$0xff] %v236_v7  ;;  %v240_v9 = vld [vmem:[%s5014_s19 + $0x88] sm:$0xff]  ;;  %v242_v10 = vld [vmem:[%s5014_s19 + $0x90] sm:$0xff] }
  0x2c   : > { %239 = vst [vmem:[%s5019_s20 + $0x40] sm:$0xff] %v238_v8  ;;  %v244_v11 = vld [vmem:[%s5014_s19 + $0x98] sm:$0xff]  ;;  %241 = vst [vmem:[%s5019_s20 + $0x48] sm:$0xff] %v240_v9  ;;  %v246_v12 = vld [vmem:[%s5014_s19 + $0xc0] sm:$0xff] }
  0x2d   : > { %243 = vst [vmem:[%s5019_s20 + $0x50] sm:$0xff] %v242_v10  ;;  %245 = vst [vmem:[%s5019_s20 + $0x58] sm:$0xff] %v244_v11  ;;  %v248_v13 = vld [vmem:[%s5014_s19 + $0xc8] sm:$0xff]  ;;  %v250_v14 = vld [vmem:[%s5014_s19 + $0xd0] sm:$0xff] }
  0x2e   : > { %247 = vst [vmem:[%s5019_s20 + $0x60] sm:$0xff] %v246_v12  ;;  %249 = vst [vmem:[%s5019_s20 + $0x68] sm:$0xff] %v248_v13  ;;  %v252_v15 = vld [vmem:[%s5014_s19 + $0xd8] sm:$0xff]  ;;  %v254_v16 = vld [vmem:[%s5014_s19 + $0x100] sm:$0xff] }
  0x2f   : > { %251 = vst [vmem:[%s5019_s20 + $0x70] sm:$0xff] %v250_v14  ;;  %v256_v17 = vld [vmem:[%s5014_s19 + $0x108] sm:$0xff]  ;;  %253 = vst [vmem:[%s5019_s20 + $0x78] sm:$0xff] %v252_v15  ;;  %v258_v18 = vld [vmem:[%s5014_s19 + $0x110] sm:$0xff] }
  0x30   : > { %255 = vst [vmem:[%s5019_s20 + $0x80] sm:$0xff] %v254_v16  ;;  %257 = vst [vmem:[%s5019_s20 + $0x88] sm:$0xff] %v256_v17  ;;  %v260_v19 = vld [vmem:[%s5014_s19 + $0x118] sm:$0xff]  ;;  %v262_v20 = vld [vmem:[%s5014_s19 + $0x140] sm:$0xff] }
  0x31   : > { %259 = vst [vmem:[%s5019_s20 + $0x90] sm:$0xff] %v258_v18  ;;  %261 = vst [vmem:[%s5019_s20 + $0x98] sm:$0xff] %v260_v19  ;;  %v264_v21 = vld [vmem:[%s5014_s19 + $0x148] sm:$0xff]  ;;  %v266_v22 = vld [vmem:[%s5014_s19 + $0x150] sm:$0xff] }
  0x32   : > { %263 = vst [vmem:[%s5019_s20 + $0xa0] sm:$0xff] %v262_v20  ;;  %v268_v23 = vld [vmem:[%s5014_s19 + $0x158] sm:$0xff]  ;;  %265 = vst [vmem:[%s5019_s20 + $0xa8] sm:$0xff] %v264_v21  ;;  %v270_v24 = vld [vmem:[%s5014_s19 + $0x180] sm:$0xff] }
  0x33   : > { %267 = vst [vmem:[%s5019_s20 + $0xb0] sm:$0xff] %v266_v22  ;;  %269 = vst [vmem:[%s5019_s20 + $0xb8] sm:$0xff] %v268_v23  ;;  %v272_v25 = vld [vmem:[%s5014_s19 + $0x188] sm:$0xff]  ;;  %v274_v26 = vld [vmem:[%s5014_s19 + $0x190] sm:$0xff] }
  0x34   : > { %271 = vst [vmem:[%s5019_s20 + $0xc0] sm:$0xff] %v270_v24  ;;  %273 = vst [vmem:[%s5019_s20 + $0xc8] sm:$0xff] %v272_v25  ;;  %v276_v27 = vld [vmem:[%s5014_s19 + $0x198] sm:$0xff]  ;;  %v278_v28 = vld [vmem:[%s5014_s19 + $0x1c0] sm:$0xff] }
  0x35   : > { %275 = vst [vmem:[%s5019_s20 + $0xd0] sm:$0xff] %v274_v26  ;;  %v280_v29 = vld [vmem:[%s5014_s19 + $0x1c8] sm:$0xff]  ;;  %277 = vst [vmem:[%s5019_s20 + $0xd8] sm:$0xff] %v276_v27  ;;  %v282_v30 = vld [vmem:[%s5014_s19 + $0x1d0] sm:$0xff] }
  0x36   : > { %279 = vst [vmem:[%s5019_s20 + $0xe0] sm:$0xff] %v278_v28  ;;  %281 = vst [vmem:[%s5019_s20 + $0xe8] sm:$0xff] %v280_v29  ;;  %v284_v31 = vld [vmem:[%s5014_s19 + $0x1d8] sm:$0xff] }
  0x37   : > { %283 = vst [vmem:[%s5019_s20 + $0xf0] sm:$0xff] %v282_v30  ;;  %285 = vst [vmem:[%s5019_s20 + $0xf8] sm:$0xff] %v284_v31 }
  0x38 PF: > { %p4157_p12 = scmp.ge.s32.totalorder %s4914_s28, 1  ;;  %p299_p13 = scmp.lt.s32.totalorder %s4914_s28, 5 }
  0x3a   : > { %p300_p0 = pnand %p4157_p12, %p299_p13 }
  0x3b   : > { %s306_s21 = sand.u32 (!%p300_p0), 1, %s4890_s23   ;;  %s4159_s22 = sshll.u32 (!%p300_p0), %s4898_s25, 2 }
  0x3c   : > { %303 = sbr.rel (%p300_p0) target bundleno = 1334 (0x536), region = 55  ;;  %s4158_s6 = sshll.u32 (!%p300_p0), %s306_s21, 8 }
  0x3d   : > { %p346_p1 = scmp.lt.s32.totalorder (!%p300_p0), %s4159_s22, 7  ;;  %s4160_s7 = sshll.u32 (!%p300_p0), %s4902_s0, 5 }
  0x3e   : > { %p351_p2 = scmp.lt.s32.totalorder (!%p300_p0), %s4160_s7, 63  ;;  %s4162_s8 = sshll.u32 (!%p300_p0), %s4898_s25, 6 }
  0x3f   : > { %p359_p3 = scmp.lt.s32.totalorder (!%p300_p0), %s4162_s8, 127  ;;  %s5109_s11 = scalar_lea.vmem (!%p300_p0), [#allocation7], %s4158_s6 }
  0x40   : > { %p4166_p4 = scmp.ne.s32.totalorder (!%p300_p0), %s4898_s25, 0 }
  0x43   : > { %s9106_s22 = smov (!%p346_p1, %s4159_s22), 7  ;;  %s9108_s7 = smov (!%p351_p2, %s4160_s7), 63 }
  0x44   : > { %s348_s12 = scalar_lea.vmem %s8209_s1, %s9106_s22  ;;  %s9110_s8 = smov (!%p359_p3, %s4162_s8), 127  ;;  %vm379_vm0 = vcmask (!%p4166_p4), 7168   ;;  %vm444_vm1 = vcmask (!%p4166_p4), 261120   ;;  %v4917_v32 = vmov (!%p4166_p4), -inf   ;;  %v4918_v33 = vmov (!%p4166_p4), 0.0  }
  0x45   : > { %s4161_s13 = sshll.u32 %s9108_s7, 3  ;;  %s4163_s16 = sshll.u32 %s9110_s8, 2  ;;  %380 = vst.msk [vmem:[#allocation2] sm:$0xff] (!%p4166_p4), %vm379_vm0, %v4917_v32  ;;  %381 = vst.msk [vmem:[#allocation2 + $0x8] sm:$0xff] (!%p4166_p4), %vm379_vm0, %v4917_v32 }
  0x46   : > { %s5097_s23 = scalar_lea.vmem %s8210_s2, %s4161_s13  ;;  %s5102_s19 = scalar_lea.vmem %s8212_s4, %s4163_s16  ;;  %382 = vst.msk [vmem:[#allocation2 + $0x10] sm:$0xff] (!%p4166_p4), %vm379_vm0, %v4917_v32  ;;  %383 = vst.msk [vmem:[#allocation2 + $0x18] sm:$0xff] (!%p4166_p4), %vm379_vm0, %v4917_v32 }
  0x47   : > { %s5107_s9 = scalar_lea.vmem %s8213_s5, %s4161_s13  ;;  %378 = sbr.rel (%p4166_p4) target bundleno = 117 (0x75), region = 63  ;;  %384 = vst.msk [vmem:[#allocation2 + $0x20] sm:$0xff] (!%p4166_p4), %vm379_vm0, %v4917_v32  ;;  %385 = vst.msk [vmem:[#allocation2 + $0x28] sm:$0xff] (!%p4166_p4), %vm379_vm0, %v4917_v32 }
  0x48   : > { %386 = vst.msk [vmem:[#allocation2 + $0x30] sm:$0xff] (!%p4166_p4), %vm379_vm0, %v4917_v32  ;;  %387 = vst.msk [vmem:[#allocation2 + $0x38] sm:$0xff] (!%p4166_p4), %vm379_vm0, %v4917_v32 }
  0x49   : > { %388 = vst.msk [vmem:[#allocation2 + $0x40] sm:$0xff] (!%p4166_p4), %vm379_vm0, %v4917_v32  ;;  %389 = vst.msk [vmem:[#allocation2 + $0x48] sm:$0xff] (!%p4166_p4), %vm379_vm0, %v4917_v32 }
  0x4a   : > { %390 = vst.msk [vmem:[#allocation2 + $0x50] sm:$0xff] (!%p4166_p4), %vm379_vm0, %v4917_v32  ;;  %391 = vst.msk [vmem:[#allocation2 + $0x58] sm:$0xff] (!%p4166_p4), %vm379_vm0, %v4917_v32 }
  0x4b   : > { %392 = vst.msk [vmem:[#allocation2 + $0x60] sm:$0xff] (!%p4166_p4), %vm379_vm0, %v4917_v32  ;;  %393 = vst.msk [vmem:[#allocation2 + $0x68] sm:$0xff] (!%p4166_p4), %vm379_vm0, %v4917_v32 }
  0x4c   : > { %394 = vst.msk [vmem:[#allocation2 + $0x70] sm:$0xff] (!%p4166_p4), %vm379_vm0, %v4917_v32  ;;  %395 = vst.msk [vmem:[#allocation2 + $0x78] sm:$0xff] (!%p4166_p4), %vm379_vm0, %v4917_v32 }
  0x4d   : > { %396 = vst.msk [vmem:[#allocation2 + $0x80] sm:$0xff] (!%p4166_p4), %vm379_vm0, %v4917_v32  ;;  %397 = vst.msk [vmem:[#allocation2 + $0x88] sm:$0xff] (!%p4166_p4), %vm379_vm0, %v4917_v32 }
  0x4e   : > { %398 = vst.msk [vmem:[#allocation2 + $0x90] sm:$0xff] %vm379_vm0, %v4917_v32  ;;  %399 = vst.msk [vmem:[#allocation2 + $0x98] sm:$0xff] %vm379_vm0, %v4917_v32 }
  0x4f   : > { %400 = vst.msk [vmem:[#allocation2 + $0xa0] sm:$0xff] %vm379_vm0, %v4917_v32  ;;  %401 = vst.msk [vmem:[#allocation2 + $0xa8] sm:$0xff] %vm379_vm0, %v4917_v32 }
  0x50   : > { %402 = vst.msk [vmem:[#allocation2 + $0xb0] sm:$0xff] %vm379_vm0, %v4917_v32  ;;  %403 = vst.msk [vmem:[#allocation2 + $0xb8] sm:$0xff] %vm379_vm0, %v4917_v32 }
  0x51   : > { %404 = vst.msk [vmem:[#allocation2 + $0xc0] sm:$0xff] %vm379_vm0, %v4917_v32  ;;  %405 = vst.msk [vmem:[#allocation2 + $0xc8] sm:$0xff] %vm379_vm0, %v4917_v32 }
  0x52   : > { %406 = vst.msk [vmem:[#allocation2 + $0xd0] sm:$0xff] %vm379_vm0, %v4917_v32  ;;  %407 = vst.msk [vmem:[#allocation2 + $0xd8] sm:$0xff] %vm379_vm0, %v4917_v32 }
  0x53   : > { %408 = vst.msk [vmem:[#allocation2 + $0xe0] sm:$0xff] %vm379_vm0, %v4917_v32  ;;  %409 = vst.msk [vmem:[#allocation2 + $0xe8] sm:$0xff] %vm379_vm0, %v4917_v32 }
  0x54   : > { %410 = vst.msk [vmem:[#allocation2 + $0xf0] sm:$0xff] %vm379_vm0, %v4917_v32  ;;  %411 = vst.msk [vmem:[#allocation2 + $0xf8] sm:$0xff] %vm379_vm0, %v4917_v32 }
  0x55   : > { %412 = vst.msk [vmem:[#allocation3] sm:$0xff] %vm379_vm0, %v4918_v33  ;;  %413 = vst.msk [vmem:[#allocation3 + $0x8] sm:$0xff] %vm379_vm0, %v4918_v33 }
  0x56   : > { %414 = vst.msk [vmem:[#allocation3 + $0x10] sm:$0xff] %vm379_vm0, %v4918_v33  ;;  %415 = vst.msk [vmem:[#allocation3 + $0x18] sm:$0xff] %vm379_vm0, %v4918_v33 }
  0x57   : > { %416 = vst.msk [vmem:[#allocation3 + $0x20] sm:$0xff] %vm379_vm0, %v4918_v33  ;;  %417 = vst.msk [vmem:[#allocation3 + $0x28] sm:$0xff] %vm379_vm0, %v4918_v33 }
  0x58   : > { %418 = vst.msk [vmem:[#allocation3 + $0x30] sm:$0xff] %vm379_vm0, %v4918_v33  ;;  %419 = vst.msk [vmem:[#allocation3 + $0x38] sm:$0xff] %vm379_vm0, %v4918_v33 }
  0x59   : > { %420 = vst.msk [vmem:[#allocation3 + $0x40] sm:$0xff] %vm379_vm0, %v4918_v33  ;;  %421 = vst.msk [vmem:[#allocation3 + $0x48] sm:$0xff] %vm379_vm0, %v4918_v33 }
  0x5a   : > { %422 = vst.msk [vmem:[#allocation3 + $0x50] sm:$0xff] %vm379_vm0, %v4918_v33  ;;  %423 = vst.msk [vmem:[#allocation3 + $0x58] sm:$0xff] %vm379_vm0, %v4918_v33 }
  0x5b   : > { %424 = vst.msk [vmem:[#allocation3 + $0x60] sm:$0xff] %vm379_vm0, %v4918_v33  ;;  %425 = vst.msk [vmem:[#allocation3 + $0x68] sm:$0xff] %vm379_vm0, %v4918_v33 }
  0x5c   : > { %426 = vst.msk [vmem:[#allocation3 + $0x70] sm:$0xff] %vm379_vm0, %v4918_v33  ;;  %427 = vst.msk [vmem:[#allocation3 + $0x78] sm:$0xff] %vm379_vm0, %v4918_v33 }
  0x5d   : > { %428 = vst.msk [vmem:[#allocation3 + $0x80] sm:$0xff] %vm379_vm0, %v4918_v33  ;;  %429 = vst.msk [vmem:[#allocation3 + $0x88] sm:$0xff] %vm379_vm0, %v4918_v33 }
  0x5e   : > { %430 = vst.msk [vmem:[#allocation3 + $0x90] sm:$0xff] %vm379_vm0, %v4918_v33  ;;  %431 = vst.msk [vmem:[#allocation3 + $0x98] sm:$0xff] %vm379_vm0, %v4918_v33 }
  0x5f   : > { %432 = vst.msk [vmem:[#allocation3 + $0xa0] sm:$0xff] %vm379_vm0, %v4918_v33  ;;  %433 = vst.msk [vmem:[#allocation3 + $0xa8] sm:$0xff] %vm379_vm0, %v4918_v33 }
  0x60   : > { %434 = vst.msk [vmem:[#allocation3 + $0xb0] sm:$0xff] %vm379_vm0, %v4918_v33  ;;  %435 = vst.msk [vmem:[#allocation3 + $0xb8] sm:$0xff] %vm379_vm0, %v4918_v33 }
  0x61   : > { %436 = vst.msk [vmem:[#allocation3 + $0xc0] sm:$0xff] %vm379_vm0, %v4918_v33  ;;  %437 = vst.msk [vmem:[#allocation3 + $0xc8] sm:$0xff] %vm379_vm0, %v4918_v33 }
  0x62   : > { %438 = vst.msk [vmem:[#allocation3 + $0xd0] sm:$0xff] %vm379_vm0, %v4918_v33  ;;  %439 = vst.msk [vmem:[#allocation3 + $0xd8] sm:$0xff] %vm379_vm0, %v4918_v33 }
  0x63   : > { %440 = vst.msk [vmem:[#allocation3 + $0xe0] sm:$0xff] %vm379_vm0, %v4918_v33  ;;  %441 = vst.msk [vmem:[#allocation3 + $0xe8] sm:$0xff] %vm379_vm0, %v4918_v33 }
  0x64   : > { %442 = vst.msk [vmem:[#allocation3 + $0xf0] sm:$0xff] %vm379_vm0, %v4918_v33  ;;  %443 = vst.msk [vmem:[#allocation3 + $0xf8] sm:$0xff] %vm379_vm0, %v4918_v33 }
  0x65   : > { %445 = vst.msk [vmem:[#allocation4] sm:$0xff] %vm444_vm1, %v4918_v33  ;;  %446 = vst.msk [vmem:[#allocation4 + $0x8] sm:$0xff] %vm444_vm1, %v4918_v33 }
  0x66   : > { %447 = vst.msk [vmem:[#allocation4 + $0x10] sm:$0xff] %vm444_vm1, %v4918_v33  ;;  %448 = vst.msk [vmem:[#allocation4 + $0x18] sm:$0xff] %vm444_vm1, %v4918_v33 }
  0x67   : > { %449 = vst.msk [vmem:[#allocation4 + $0x20] sm:$0xff] %vm444_vm1, %v4918_v33  ;;  %450 = vst.msk [vmem:[#allocation4 + $0x28] sm:$0xff] %vm444_vm1, %v4918_v33 }
  0x68   : > { %451 = vst.msk [vmem:[#allocation4 + $0x30] sm:$0xff] %vm444_vm1, %v4918_v33  ;;  %452 = vst.msk [vmem:[#allocation4 + $0x38] sm:$0xff] %vm444_vm1, %v4918_v33 }
  0x69   : > { %453 = vst.msk [vmem:[#allocation4 + $0x40] sm:$0xff] %vm444_vm1, %v4918_v33  ;;  %454 = vst.msk [vmem:[#allocation4 + $0x48] sm:$0xff] %vm444_vm1, %v4918_v33 }
  0x6a   : > { %455 = vst.msk [vmem:[#allocation4 + $0x50] sm:$0xff] %vm444_vm1, %v4918_v33  ;;  %456 = vst.msk [vmem:[#allocation4 + $0x58] sm:$0xff] %vm444_vm1, %v4918_v33 }
  0x6b   : > { %457 = vst.msk [vmem:[#allocation4 + $0x60] sm:$0xff] %vm444_vm1, %v4918_v33  ;;  %458 = vst.msk [vmem:[#allocation4 + $0x68] sm:$0xff] %vm444_vm1, %v4918_v33 }
  0x6c   : > { %459 = vst.msk [vmem:[#allocation4 + $0x70] sm:$0xff] %vm444_vm1, %v4918_v33  ;;  %460 = vst.msk [vmem:[#allocation4 + $0x78] sm:$0xff] %vm444_vm1, %v4918_v33 }
  0x6d   : > { %461 = vst.msk [vmem:[#allocation4 + $0x80] sm:$0xff] %vm444_vm1, %v4918_v33  ;;  %462 = vst.msk [vmem:[#allocation4 + $0x88] sm:$0xff] %vm444_vm1, %v4918_v33 }
  0x6e   : > { %463 = vst.msk [vmem:[#allocation4 + $0x90] sm:$0xff] %vm444_vm1, %v4918_v33  ;;  %464 = vst.msk [vmem:[#allocation4 + $0x98] sm:$0xff] %vm444_vm1, %v4918_v33 }
  0x6f   : > { %465 = vst.msk [vmem:[#allocation4 + $0xa0] sm:$0xff] %vm444_vm1, %v4918_v33  ;;  %466 = vst.msk [vmem:[#allocation4 + $0xa8] sm:$0xff] %vm444_vm1, %v4918_v33 }
  0x70   : > { %467 = vst.msk [vmem:[#allocation4 + $0xb0] sm:$0xff] %vm444_vm1, %v4918_v33  ;;  %468 = vst.msk [vmem:[#allocation4 + $0xb8] sm:$0xff] %vm444_vm1, %v4918_v33 }
  0x71   : > { %469 = vst.msk [vmem:[#allocation4 + $0xc0] sm:$0xff] %vm444_vm1, %v4918_v33  ;;  %470 = vst.msk [vmem:[#allocation4 + $0xc8] sm:$0xff] %vm444_vm1, %v4918_v33 }
  0x72   : > { %471 = vst.msk [vmem:[#allocation4 + $0xd0] sm:$0xff] %vm444_vm1, %v4918_v33  ;;  %472 = vst.msk [vmem:[#allocation4 + $0xd8] sm:$0xff] %vm444_vm1, %v4918_v33 }
  0x73   : > { %473 = vst.msk [vmem:[#allocation4 + $0xe0] sm:$0xff] %vm444_vm1, %v4918_v33  ;;  %474 = vst.msk [vmem:[#allocation4 + $0xe8] sm:$0xff] %vm444_vm1, %v4918_v33 }
  0x74   : > { %475 = vst.msk [vmem:[#allocation4 + $0xf0] sm:$0xff] %vm444_vm1, %v4918_v33  ;;  %476 = vst.msk [vmem:[#allocation4 + $0xf8] sm:$0xff] %vm444_vm1, %v4918_v33 }
  0x75 PF: > { %s477_s6 = sshra.s32 %s4898_s25, 7  ;;  %s482_s7 = sand.u32 127, %s4898_s25 }
  0x76   : > { %s479_s8 = sadd.s32 %s4902_s0, %s477_s6 }
  0x77   : > { %s4167_s13 = sshll.u32 %s479_s8, 7 }
  0x78   : > { %s483_s14 = sadd.s32 %s4167_s13, %s482_s7 }
  0x79   : > { %s484_s15 = sld [smem:[#allocation6 + %s483_s14]] }
  0x7f   : > { %p4168_p5 = scmp.le.s32.totalorder %s484_s15, 0 }
  0x81   : > { %488 = sbr.rel (%p4168_p5) target bundleno = 1063 (0x427), region = 67 }
  0x88   : > { %v515_v34 = vld [vmem:[%s5097_s23] sm:$0xff]  ;;  %v516_v35 = vld [vmem:[%s5097_s23 + $0x8] sm:$0xff]  ;;  %v8221_v37 = vmov 0   ;;  %v517_v40 = vld [vmem:[%s5097_s23 + $0x10] sm:$0xff]  ;;  %v491_v13 = vlaneseq }
  0x89   : > { %v519_v36 = vld [vmem:[%s5097_s23 + $0x20] sm:$0xff]  ;;  %4554 = vset.pattern.permute.xlu0 %v8221_v37  ;;  %v547_v38 = vpack.c.bf16 %v516_v35, %v515_v34  ;;  %4555 = vset.pattern.permute.xlu1 %v8221_v37  ;;  %v520_v39 = vld [vmem:[%s5097_s23 + $0x28] sm:$0xff]  ;;  %v518_v41 = vld [vmem:[%s5097_s23 + $0x18] sm:$0xff] }
  0x8a   : > { %v549_v42 = vpack.c.bf16 %v520_v39, %v519_v36  ;;  %v521_v43 = vld [vmem:[%s5097_s23 + $0x30] sm:$0xff]  ;;  %v522_v44 = vld [vmem:[%s5097_s23 + $0x38] sm:$0xff]  ;;  %v548_v45 = vpack.c.bf16 %v518_v41, %v517_v40  ;;  %v523_v47 = vld [vmem:[%s5097_s23 + $0x40] sm:$0xff]  ;;  %v492_v14 = vshrl.u32 %v491_v13, 7 }
  0x8b   : > { %565 = vperm.xlu0 %4554, %v547_v38   ;;  %v550_v46 = vpack.c.bf16 %v522_v44, %v521_v43  ;;  %v524_v48 = vld [vmem:[%s5097_s23 + $0x48] sm:$0xff]  ;;  %v525_v49 = vld [vmem:[%s5097_s23 + $0x50] sm:$0xff]  ;;  %v526_v50 = vld [vmem:[%s5097_s23 + $0x58] sm:$0xff] }
  0x8c   : > { %575 = vperm.xlu1 %4555, %v549_v42   ;;  %v551_v51 = vpack.c.bf16 %v524_v48, %v523_v47  ;;  %v552_v52 = vpack.c.bf16 %v526_v50, %v525_v49  ;;  %v527_v53 = vld [vmem:[%s5097_s23 + $0x60] sm:$0xff]  ;;  %v528_v54 = vld [vmem:[%s5097_s23 + $0x68] sm:$0xff]  ;;  %v529_v55 = vld [vmem:[%s5097_s23 + $0x70] sm:$0xff]  ;;  %v493_v19 = vsub.s32 0, %v492_v14  ;;  %v497_v20 = vsub.s32 1, %v492_v14 }
  0x8d   : > { %v530_v56 = vld [vmem:[%s5097_s23 + $0x78] sm:$0xff]  ;;  %v531_v57 = vld [vmem:[%s5097_s23 + $0x80] sm:$0xff]  ;;  %v532_v58 = vld [vmem:[%s5097_s23 + $0x88] sm:$0xff]  ;;  %v553_v59 = vpack.c.bf16 %v528_v54, %v527_v53  ;;  %v501_v22 = vsub.s32 2, %v492_v14  ;;  %v505_v23 = vsub.s32 3, %v492_v14 }
  0x8e   : > { %v554_v60 = vpack.c.bf16 %v530_v56, %v529_v55  ;;  %v533_v61 = vld [vmem:[%s5097_s23 + $0x90] sm:$0xff]  ;;  %v534_v62 = vld [vmem:[%s5097_s23 + $0x98] sm:$0xff]  ;;  %v555_v63 = vpack.c.bf16 %v532_v58, %v531_v57  ;;  %v535_v3 = vld [vmem:[%s5097_s23 + $0xa0] sm:$0xff] }
  0x8f   : > { %570 = vperm.xlu0 %4554, %v548_v45   ;;  %v537_v0 = vld [vmem:[%s5097_s23 + $0xb0] sm:$0xff]  ;;  %v538_v1 = vld [vmem:[%s5097_s23 + $0xb8] sm:$0xff]  ;;  %v556_v2 = vpack.c.bf16 %v534_v62, %v533_v61  ;;  %v536_v4 = vld [vmem:[%s5097_s23 + $0xa8] sm:$0xff] }
  0x90   : > { %580 = vperm.xlu1 %4555, %v550_v46   ;;  %v558_v5 = vpack.c.bf16 %v538_v1, %v537_v0  ;;  %v539_v6 = vld [vmem:[%s5097_s23 + $0xc0] sm:$0xff]  ;;  %v557_v7 = vpack.c.bf16 %v536_v4, %v535_v3  ;;  %v540_v8 = vld [vmem:[%s5097_s23 + $0xc8] sm:$0xff]  ;;  %v541_v9 = vld [vmem:[%s5097_s23 + $0xd0] sm:$0xff] }
  0x91   : > { %v559_v10 = vpack.c.bf16 %v540_v8, %v539_v6  ;;  %v542_v11 = vld [vmem:[%s5097_s23 + $0xd8] sm:$0xff]  ;;  %v927_v15 = vld [vmem:[%s5109_s11] sm:$0xff]  ;;  %v928_v16 = vld [vmem:[%s5109_s11 + $0x8] sm:$0xff] }
  0x92   : > { %v560_v12 = vpack.c.bf16 %v542_v11, %v541_v9  ;;  %v929_v17 = vld [vmem:[%s5109_s11 + $0x10] sm:$0xff]  ;;  %v930_v18 = vld [vmem:[%s5109_s11 + $0x18] sm:$0xff]  ;;  %vm959_vm2 = vnez %v927_v15  ;;  %vm960_vm3 = vnez %v928_v16  ;;  %v489_v21 = vld [vmem:[%s348_s12] sm:$0xf] }
  0x93   : > { %585 = vperm.xlu0 %4554, %v551_v51   ;;  %vm961_vm4 = vnez %v929_v17  ;;  %vm962_vm5 = vnez %v930_v18  ;;  %v1005_v24 = vsel %vm959_vm2, 16843009, %v8221_v37  ;;  %v1006_v25 = vsel %vm960_vm3, 16843009, %v8221_v37  ;;  %v931_v39 = vld [vmem:[%s5109_s11 + $0x20] sm:$0xff]  ;;  %v932_v40 = vld [vmem:[%s5109_s11 + $0x28] sm:$0xff] }
  0x94   : > { %590 = vperm.xlu1 %4555, %v552_v52   ;;  %v494_v26 = vrot.slane %v489_v21, %v493_v19  ;;  %v1007_v27 = vsel %vm961_vm4, 16843009, %v8221_v37  ;;  %v1008_v28 = vsel %vm962_vm5, 16843009, %v8221_v37  ;;  %v498_v29 = vrot.slane %v489_v21, %v497_v20  ;;  %v933_v44 = vld [vmem:[%s5109_s11 + $0x30] sm:$0xff]  ;;  %v934_v45 = vld [vmem:[%s5109_s11 + $0x38] sm:$0xff] }
  0x95   : > { %v502_v30 = vrot.slane %v489_v21, %v501_v22  ;;  %v506_v31 = vrot.slane %v489_v21, %v505_v23  ;;  %v1037_v32 = vcombine.low %v1005_v24, %v1006_v25  ;;  %v1039_v33 = vcombine.low %v1007_v27, %v1008_v28  ;;  %v940_v15 = vld [vmem:[%s5109_s11 + $0x68] sm:$0xff]  ;;  %v942_v23 = vld [vmem:[%s5109_s11 + $0x78] sm:$0xff] }
  0x96   : > { %v511_v34 = vpack.c.bf16 %v494_v26, %v494_v26  ;;  %v512_v35 = vpack.c.bf16 %v498_v29, %v498_v29  ;;  %v1038_v41 = vcombine.high %v1005_v24, %v1006_v25  ;;  %v1040_v42 = vcombine.high %v1007_v27, %v1008_v28  ;;  %v938_v51 = vld [vmem:[%s5109_s11 + $0x58] sm:$0xff] }
  0x97   : > { %595 = vperm.xlu0 %4554, %v553_v59   ;;  %v513_v36 = vpack.c.bf16 %v502_v30, %v502_v30  ;;  %v514_v38 = vpack.c.bf16 %v506_v31, %v506_v31  ;;  %vm1069_vm6 = vnez %v1037_v32  ;;  %vm1070_vm7 = vnez %v1039_v33  ;;  %v951_v31 = vld [vmem:[%s5109_s11 + $0xc0] sm:$0xff]  ;;  %v952_v32 = vld [vmem:[%s5109_s11 + $0xc8] sm:$0xff]  ;;  %v953_v33 = vld [vmem:[%s5109_s11 + $0xd0] sm:$0xff] }
  0x98   : > { %600 = vperm.xlu1 %4555, %v554_v60   ;;  %v644_v43 = vpack.i.b16 %v511_v34, %v511_v34  ;;  %vm963_vm8 = vnez %v931_v39  ;;  %vm964_vm9 = vnez %v932_v40  ;;  %v651_v46 = vpack.i.b16 %v512_v35, %v512_v35  ;;  %v954_v39 = vld [vmem:[%s5109_s11 + $0xd8] sm:$0xff] }
  0x99   : > { %v658_v47 = vpack.i.b16 %v513_v36, %v513_v36  ;;  %v665_v48 = vpack.i.b16 %v514_v38, %v514_v38  ;;  %v1101_v49 = vsel %vm1069_vm6, 16843009, %v8221_v37  ;;  %v1102_v50 = vsel %vm1070_vm7, 16843009, %v8221_v37 }
  0x9a   : > { %vm1071_vm10 = vnez %v1038_v41  ;;  %vm5324_vm11 = vnez %v1040_v42  ;;  %vm965_vm12 = vnez %v933_v44  ;;  %vm966_vm13 = vnez %v934_v45  ;;  %v935_v44 = vld [vmem:[%s5109_s11 + $0x40] sm:$0xff]  ;;  %v936_v45 = vld [vmem:[%s5109_s11 + $0x48] sm:$0xff] }
  0x9b   : > { %605 = vperm.xlu0 %4554, %v555_v63   ;;  %v1009_v52 = vsel %vm963_vm8, 16843009, %v8221_v37  ;;  %v1010_v53 = vsel %vm964_vm9, 16843009, %v8221_v37  ;;  %v1133_v54 = vunpack.c.1.s8 %v1101_v49  ;;  %v1134_v55 = vunpack.c.0.s8 %v1101_v49 }
  0x9c   : > { %610 = vperm.xlu1 %4555, %v556_v2   ;;  %v1136_v56 = vunpack.c.3.s8 %v1101_v49  ;;  %v1137_v57 = vunpack.c.2.s8 %v1101_v49  ;;  %v5330_v58 = vrot.slane %v644_v43, %v493_v19  ;;  %v5332_v59 = vrot.slane %v651_v46, %v493_v19 }
  0x9d   : > { %v5334_v60 = vrot.slane %v658_v47, %v493_v19  ;;  %v5336_v61 = vrot.slane %v665_v48, %v493_v19  ;;  %v1103_v62 = vsel %vm1071_vm10, 16843009, %v8221_v37  ;;  %v1011_v63 = vsel %vm965_vm12, 16843009, %v8221_v37  ;;  %v941_v19 = vld [vmem:[%s5109_s11 + $0x70] sm:$0xff] }
  0x9e   : > { %v1012_v0 = vsel %vm966_vm13, 16843009, %v8221_v37  ;;  %v1042_v1 = vcombine.high %v1009_v52, %v1010_v53  ;;  %v1139_v2 = vunpack.c.1.s8 %v1102_v50  ;;  %v1140_v3 = vunpack.c.0.s8 %v1102_v50 }
  0x9f   : > { %620 = vperm.xlu0 %4554, %v558_v5   ;;  %v1142_v4 = vunpack.c.3.s8 %v1102_v50  ;;  %v1104_v5 = vsel %vm5324_vm11, 16843009, %v8221_v37  ;;  %v5344_v6 = vpack.c.b16 %v1133_v54, %v1134_v55  ;;  %v1143_v8 = vunpack.c.2.s8 %v1102_v50  ;;  %v937_v50 = vld [vmem:[%s5109_s11 + $0x50] sm:$0xff]  ;;  %v944_v55 = vld [vmem:[%s5109_s11 + $0x88] sm:$0xff] }
  0xa0   : > { %615 = vperm.xlu1 %4555, %v557_v7   ;;  %v5346_v7 = vpack.c.b16 %v1136_v56, %v1137_v57  ;;  %v1041_v9 = vcombine.low %v1009_v52, %v1010_v53  ;;  %v1145_v11 = vunpack.c.1.s8 %v1103_v62  ;;  %v1148_v13 = vunpack.c.3.s8 %v1103_v62 }
  0xa1   : > { %8523 = vst [vmem:[#allocation9_spill] sm:$0xff] %v5344_v6  ;;  %v1044_v14 = vcombine.high %v1011_v63, %v1012_v0  ;;  %v1149_v16 = vunpack.c.2.s8 %v1103_v62  ;;  %v1151_v17 = vunpack.c.1.s8 %v1104_v5  ;;  %v1152_v18 = vunpack.c.0.s8 %v1104_v5 }
  0xa2   : > { %8524 = vst [vmem:[#allocation10_spill] sm:$0xff] %v5346_v7  ;;  %vm1075_vm14 = vnez %v1042_v1  ;;  %v1154_v20 = vunpack.c.3.s8 %v1104_v5  ;;  %v1155_v21 = vunpack.c.2.s8 %v1104_v5  ;;  %v1043_v22 = vcombine.low %v1011_v63, %v1012_v0  ;;  %v948_v63 = vld [vmem:[%s5109_s11 + $0xa8] sm:$0xff] }
  0xa3   : > { %v5352_v24 = vpack.c.b16 %v1139_v2, %v1140_v3  ;;  %v5354_v25 = vpack.c.b16 %v1142_v4, %v1143_v8  ;;  %vm1073_vm0 = vnez %v1041_v9  ;;  %vm972_vm1 = vnez %v940_v15 }
  0xa4   : > { %625 = vperm.xlu1 %4555, %v559_v10   ;;  %v939_v10 = vld [vmem:[%s5109_s11 + $0x60] sm:$0xff]  ;;  %vm1076_vm2 = vnez %v1044_v14  ;;  %v5359_v27 = vsel %vm1075_vm14, 16843009, %v8221_v37  ;;  %vm973_vm3 = vnez %v941_v19  ;;  %v5361_v28 = vpack.c.b16 %v1148_v13, %v1149_v16 }
  0xa5   : > { %vm971_vm15 = vnez %v939_v10  ;;  %8525 = vst [vmem:[#allocation11_spill] sm:$0xff] %v5352_v24  ;;  %8526 = vst [vmem:[#allocation12_spill] sm:$0xff] %v5354_v25  ;;  %v5363_v29 = vpack.c.b16 %v1151_v17, %v1152_v18  ;;  %vm974_vm4 = vnez %v942_v23  ;;  %v5371_v34 = vpack.c.b16 %v1154_v20, %v1155_v21 }
  0xa6   : > { %8528 = vst [vmem:[#allocation14_spill] sm:$0xff] %v5361_v28  ;;  %v5366_v30 = vsel %vm971_vm15, 16843009, %v8221_v37  ;;  %vm5373_vm5 = vnez %v1043_v22  ;;  %v5378_v36 = vsel %vm1073_vm0, 16843009, %v8221_v37  ;;  %v1169_v41 = vunpack.c.1.s8 %v5359_v27 }
  0xa7   : > { %8529 = vst [vmem:[#allocation15_spill] sm:$0xff] %v5363_v29  ;;  %8530 = vst [vmem:[#allocation16_spill] sm:$0xff] %v5371_v34  ;;  %v5381_v38 = vsel %vm972_vm1, 16843009, %v8221_v37  ;;  %v5385_v40 = vsel %vm1076_vm2, 16843009, %v8221_v37  ;;  %vm983_vm6 = vnez %v951_v31  ;;  %vm984_vm7 = vnez %v952_v32 }
  0xa8   : > { %630 = vperm.xlu1 %4555, %v560_v12   ;;  %v1146_v12 = vunpack.c.0.s8 %v1103_v62  ;;  %v5389_v42 = vsel %vm973_vm3, 16843009, %v8221_v37  ;;  %v1050_v43 = vcombine.high %v5366_v30, %v5381_v38  ;;  %v5397_v46 = vsel %vm974_vm4, 16843009, %v8221_v37  ;;  %v949_v62 = vld [vmem:[%s5109_s11 + $0xb0] sm:$0xff] }
  0xa9   : > { %vm985_vm8 = vnez %v953_v33  ;;  %v1170_v47 = vunpack.c.0.s8 %v5359_v27  ;;  %v1172_v48 = vunpack.c.3.s8 %v5359_v27  ;;  %v1052_v49 = vcombine.high %v5389_v42, %v5397_v46 }
  0xaa   : > { %v5356_v26 = vpack.c.b16 %v1145_v11, %v1146_v12  ;;  %vm986_vm9 = vnez %v954_v39  ;;  %vm967_vm10 = vnez %v935_v44  ;;  %vm968_vm11 = vnez %v936_v45 }
  0xab   : > { %v5406_v52 = vsel %vm983_vm6, 16843009, %v8221_v37  ;;  %v5409_v53 = vsel %vm984_vm7, 16843009, %v8221_v37  ;;  %v1173_v54 = vunpack.c.2.s8 %v5359_v27  ;;  %vm5412_vm12 = vnez %v1050_v43 }
  0xac   : > { %8527 = vst [vmem:[#allocation13_spill] sm:$0xff] %v5356_v26  ;;  %8533 = vst [vmem:[#allocation17_spill] sm:$0xff] %v5406_v52  ;;  %v5417_v56 = vsel %vm985_vm8, 16843009, %v8221_v37  ;;  %v5420_v57 = vsel %vm986_vm9, 16843009, %v8221_v37  ;;  %vm969_vm13 = vnez %v937_v50  ;;  %vm970_vm14 = vnez %v938_v51 }
  0xad   : > { %8534 = vst [vmem:[#allocation18_spill] sm:$0xff] %v5409_v53  ;;  %8537 = vst [vmem:[#allocation19_spill] sm:$0xff] %v5417_v56  ;;  %v1175_v0 = vunpack.c.1.s8 %v5385_v40  ;;  %vm1084_vm15 = vnez %v1052_v49  ;;  %v1013_v1 = vsel %vm967_vm10, 16843009, %v8221_v37  ;;  %v1014_v2 = vsel %vm968_vm11, 16843009, %v8221_v37 }
  0xae   : > { %8538 = vst [vmem:[#allocation20_spill] sm:$0xff] %v5420_v57  ;;  %v5429_v3 = vpack.c.b16 %v1169_v41, %v1170_v47  ;;  %v1176_v4 = vunpack.c.0.s8 %v5385_v40  ;;  %v1178_v5 = vunpack.c.3.s8 %v5385_v40  ;;  %v1106_v8 = vsel %vm5373_vm5, 16843009, %v8221_v37  ;;  %v943_v51 = vld [vmem:[%s5109_s11 + $0x80] sm:$0xff] }
  0xaf   : > { %v1179_v9 = vunpack.c.2.s8 %v5385_v40  ;;  %v1115_v10 = vsel %vm5412_vm12, 16843009, %v8221_v37  ;;  %v1015_v11 = vsel %vm969_vm13, 16843009, %v8221_v37  ;;  %v1016_v12 = vsel %vm970_vm14, 16843009, %v8221_v37 }
  0xb0   : > { %8539 = vst [vmem:[#allocation21_spill] sm:$0xff] %v5429_v3  ;;  %v1157_v13 = vunpack.c.1.s8 %v5378_v36  ;;  %v1158_v14 = vunpack.c.0.s8 %v5378_v36  ;;  %v1116_v15 = vsel %vm1084_vm15, 16843009, %v8221_v37  ;;  %v1045_v16 = vcombine.low %v1013_v1, %v1014_v2 }
  0xb1   : > { %v1160_v17 = vunpack.c.3.s8 %v5378_v36  ;;  %v1161_v18 = vunpack.c.2.s8 %v5378_v36  ;;  %v1163_v19 = vunpack.c.1.s8 %v1106_v8  ;;  %v1164_v20 = vunpack.c.0.s8 %v1106_v8 }
  0xb2   : > { %v1166_v21 = vunpack.c.3.s8 %v1106_v8  ;;  %v1167_v22 = vunpack.c.2.s8 %v1106_v8  ;;  %v1217_v23 = vunpack.c.1.s8 %v1115_v10  ;;  %v1047_v27 = vcombine.low %v1015_v11, %v1016_v12 }
  0xb3   : > { %v1218_v31 = vunpack.c.0.s8 %v1115_v10  ;;  %v1220_v32 = vunpack.c.3.s8 %v1115_v10  ;;  %v1221_v33 = vunpack.c.2.s8 %v1115_v10  ;;  %v1223_v35 = vunpack.c.1.s8 %v1116_v15  ;;  %v946_v10 = vld [vmem:[%s5109_s11 + $0x98] sm:$0xff] }
  0xb4   : > { %v1224_v39 = vunpack.c.0.s8 %v1116_v15  ;;  %v1226_v40 = vunpack.c.3.s8 %v1116_v15  ;;  %v1227_v41 = vunpack.c.2.s8 %v1116_v15  ;;  %vm1077_vm0 = vnez %v1045_v16 }
  0xb5   : > { %v5447_v43 = vpack.c.b16 %v1172_v48, %v1173_v54  ;;  %v5449_v44 = vpack.c.b16 %v1175_v0, %v1176_v4  ;;  %v5451_v36 = vpack.c.b16 %v1178_v5, %v1179_v9  ;;  %v1046_v45 = vcombine.high %v1013_v1, %v1014_v2  ;;  %v945_v9 = vld [vmem:[%s5109_s11 + $0x90] sm:$0xff] }
  0xb6   : > { %v5453_v47 = vpack.c.b16 %v1157_v13, %v1158_v14  ;;  %v5455_v49 = vpack.c.b16 %v1160_v17, %v1161_v18  ;;  %v5457_v50 = vpack.c.b16 %v1163_v19, %v1164_v20  ;;  %vm1078_vm1 = vnez %v1047_v27 }
  0xb7   : > { %8540 = vst [vmem:[#allocation22_spill] sm:$0xff] %v5447_v43  ;;  %8541 = vst [vmem:[#allocation23_spill] sm:$0xff] %v5449_v44  ;;  %v5461_v8 = vpack.c.b16 %v1166_v21, %v1167_v22  ;;  %v5463_v48 = vpack.c.b16 %v1217_v23, %v1218_v31  ;;  %v1109_v54 = vsel %vm1077_vm0, 16843009, %v8221_v37  ;;  %v1048_v0 = vcombine.high %v1015_v11, %v1016_v12 }
  0xb8   : > { %8542 = vst [vmem:[#allocation24_spill] sm:$0xff] %v5451_v36  ;;  %v5466_v4 = vpack.c.b16 %v1220_v32, %v1221_v33  ;;  %v5468_v1 = vpack.c.b16 %v1223_v35, %v1224_v39  ;;  %v5470_v2 = vpack.c.b16 %v1226_v40, %v1227_v41  ;;  %v1049_v5 = vcombine.low %v5366_v30, %v5381_v38 }
  0xb9   : > { %8543 = vst [vmem:[#allocation25_spill] sm:$0xff] %v5463_v48  ;;  %v1110_v13 = vsel %vm1078_vm1, 16843009, %v8221_v37  ;;  %vm5477_vm2 = vnez %v1046_v45  ;;  %vm975_vm3 = vnez %v943_v51  ;;  %vm976_vm4 = vnez %v944_v55 }
  0xba   : > { %8544 = vst [vmem:[#allocation26_spill] sm:$0xff] %v5466_v4  ;;  %8545 = vst [vmem:[#allocation27_spill] sm:$0xff] %v5468_v1  ;;  %v1181_v11 = vunpack.c.1.s8 %v1109_v54  ;;  %v1182_v12 = vunpack.c.0.s8 %v1109_v54  ;;  %v1184_v15 = vunpack.c.3.s8 %v1109_v54  ;;  %v1185_v16 = vunpack.c.2.s8 %v1109_v54 }
  0xbb   : > { %8546 = vst [vmem:[#allocation28_spill] sm:$0xff] %v5470_v2  ;;  %vm1080_vm5 = vnez %v1048_v0  ;;  %v1051_v17 = vcombine.low %v5389_v42, %v5397_v46  ;;  %vm977_vm6 = vnez %v945_v9  ;;  %vm978_vm7 = vnez %v946_v10 }
  0xbc   : > { %v1187_v30 = vunpack.c.1.s8 %v1110_v13  ;;  %vm1081_vm8 = vnez %v1049_v5  ;;  %v1021_v38 = vsel %vm975_vm3, 16843009, %v8221_v37  ;;  %v1022_v18 = vsel %vm976_vm4, 16843009, %v8221_v37 }
  0xbd   : > { %v1188_v19 = vunpack.c.0.s8 %v1110_v13  ;;  %v1190_v20 = vunpack.c.3.s8 %v1110_v13  ;;  %v1191_v21 = vunpack.c.2.s8 %v1110_v13  ;;  %v1111_v22 = vsel %vm5477_vm2, 16843009, %v8221_v37 }
  0xbe   : > { %v5488_v23 = vpack.c.b16 %v1181_v11, %v1182_v12  ;;  %v1112_v27 = vsel %vm1080_vm5, 16843009, %v8221_v37  ;;  %v1023_v42 = vsel %vm977_vm6, 16843009, %v8221_v37  ;;  %v1024_v46 = vsel %vm978_vm7, 16843009, %v8221_v37 }
  0xbf   : > { %v5493_v31 = vpack.c.b16 %v1184_v15, %v1185_v16  ;;  %vm1082_vm9 = vnez %v1051_v17  ;;  %v1113_v32 = vsel %vm1081_vm8, 16843009, %v8221_v37  ;;  %v1053_v33 = vcombine.low %v1021_v38, %v1022_v18 }
  0xc0   : > { %8549 = vst [vmem:[#allocation29_spill] sm:$0xff] %v5488_v23  ;;  %v1193_v35 = vunpack.c.1.s8 %v1111_v22  ;;  %v1194_v39 = vunpack.c.0.s8 %v1111_v22  ;;  %v1196_v40 = vunpack.c.3.s8 %v1111_v22  ;;  %v1197_v41 = vunpack.c.2.s8 %v1111_v22 }
  0xc1   : > { %8550 = vst [vmem:[#allocation30_spill] sm:$0xff] %v5493_v31  ;;  %v5496_v45 = vpack.c.b16 %v1187_v30, %v1188_v19  ;;  %v1199_v51 = vunpack.c.1.s8 %v1112_v27  ;;  %v1200_v55 = vunpack.c.0.s8 %v1112_v27  ;;  %v1055_v54 = vcombine.low %v1023_v42, %v1024_v46  ;;  %v947_v30 = vld [vmem:[%s5109_s11 + $0xa0] sm:$0xff] }
  0xc2   : > { %v1202_v0 = vunpack.c.3.s8 %v1112_v27  ;;  %v1203_v5 = vunpack.c.2.s8 %v1112_v27  ;;  %v1114_v9 = vsel %vm1082_vm9, 16843009, %v8221_v37  ;;  %v1205_v10 = vunpack.c.1.s8 %v1113_v32 }
  0xc3   : > { %8551 = vst [vmem:[#allocation31_spill] sm:$0xff] %v5496_v45  ;;  %v1206_v13 = vunpack.c.0.s8 %v1113_v32  ;;  %v1208_v14 = vunpack.c.3.s8 %v1113_v32  ;;  %v1209_v11 = vunpack.c.2.s8 %v1113_v32  ;;  %vm1085_vm10 = vnez %v1053_v33 }
  0xc4   : > { %v5499_v12 = vpack.c.b16 %v1190_v20, %v1191_v21  ;;  %v5501_v15 = vpack.c.b16 %v1193_v35, %v1194_v39  ;;  %v5503_v16 = vpack.c.b16 %v1196_v40, %v1197_v41  ;;  %v1054_v17 = vcombine.high %v1021_v38, %v1022_v18  ;;  %v5518_v18 = vld [vmem:[%s5097_s23 + $0xe0] sm:$0xff]  ;;  %v5521_v40 = vld [vmem:[%s5097_s23 + $0xe8] sm:$0xff] }
  0xc5   : > { %v5506_v19 = vpack.c.b16 %v1199_v51, %v1200_v55  ;;  %v1211_v22 = vunpack.c.1.s8 %v1114_v9  ;;  %v1212_v27 = vunpack.c.0.s8 %v1114_v9  ;;  %vm1086_vm11 = vnez %v1055_v54  ;;  %8559 = vst [vmem:[#allocation39_spill] sm:$0xff] %v5518_v18  ;;  %8560 = vst [vmem:[#allocation40_spill] sm:$0xff] %v5521_v40  ;;  %v950_v51 = vld [vmem:[%s5109_s11 + $0xb8] sm:$0xff] }
  0xc6   : > { %8552 = vst [vmem:[#allocation32_spill] sm:$0xff] %v5499_v12  ;;  %8553 = vst [vmem:[#allocation33_spill] sm:$0xff] %v5501_v15  ;;  %v1214_v32 = vunpack.c.3.s8 %v1114_v9  ;;  %v1215_v33 = vunpack.c.2.s8 %v1114_v9  ;;  %v1117_v20 = vsel %vm1085_vm10, 16843009, %v8221_v37  ;;  %v1056_v21 = vcombine.high %v1023_v42, %v1024_v46 }
  0xc7   : > { %8554 = vst [vmem:[#allocation34_spill] sm:$0xff] %v5503_v16  ;;  %8555 = vst [vmem:[#allocation35_spill] sm:$0xff] %v5506_v19  ;;  %v5511_v35 = vpack.c.b16 %v1202_v0, %v1203_v5  ;;  %v5513_v39 = vpack.c.b16 %v1205_v10, %v1206_v13  ;;  %v5515_v38 = vpack.c.b16 %v1208_v14, %v1209_v11  ;;  %vm979_vm12 = vnez %v947_v30  ;;  %v5542_v14 = vld [vmem:[%s5097_s23 + $0xf8] sm:$0xff] }
  0xc8   : > { %v1118_v41 = vsel %vm1086_vm11, 16843009, %v8221_v37  ;;  %vm1087_vm13 = vnez %v1054_v17  ;;  %vm980_vm14 = vnez %v948_v63  ;;  %vm981_vm15 = vnez %v949_v62  ;;  %v5539_v63 = vld [vmem:[%s5097_s23 + $0xf0] sm:$0xff]  ;;  %8566 = vst [vmem:[#allocation44_spill] sm:$0xff] %v5542_v14 }
  0xc9   : > { %8556 = vst [vmem:[#allocation36_spill] sm:$0xff] %v5511_v35  ;;  %8557 = vst [vmem:[#allocation37_spill] sm:$0xff] %v5513_v39  ;;  %v1229_v42 = vunpack.c.1.s8 %v1117_v20  ;;  %v1230_v46 = vunpack.c.0.s8 %v1117_v20  ;;  %v1232_v55 = vunpack.c.3.s8 %v1117_v20  ;;  %v1233_v54 = vunpack.c.2.s8 %v1117_v20 }
  0xca   : > { %8558 = vst [vmem:[#allocation38_spill] sm:$0xff] %v5515_v38  ;;  %v5525_v0 = vpack.c.b16 %v1211_v22, %v1212_v27  ;;  %v5527_v5 = vpack.c.b16 %v1214_v32, %v1215_v33  ;;  %vm5529_vm0 = vnez %v1056_v21  ;;  %v5534_v10 = vsel %vm979_vm12, 16843009, %v8221_v37  ;;  %8565 = vst [vmem:[#allocation43_spill] sm:$0xff] %v5539_v63 }
  0xcb   : > { %v1119_v11 = vsel %vm1087_vm13, 16843009, %v8221_v37  ;;  %vm982_vm1 = vnez %v950_v51  ;;  %v5546_v17 = vsel %vm980_vm14, 16843009, %v8221_v37  ;;  %vm8285_vm2 = vcmp.ne.s16.totalorder %v5344_v6, 0 }
  0xcc   : > { %8561 = vst [vmem:[#allocation41_spill] sm:$0xff] %v5525_v0  ;;  %8562 = vst [vmem:[#allocation42_spill] sm:$0xff] %v5527_v5  ;;  %vm8284_vm3 = vcmp.ne.s16.totalorder %v5346_v7, 0  ;;  %v1235_v30 = vunpack.c.1.s8 %v1118_v41  ;;  %v1236_v22 = vunpack.c.0.s8 %v1118_v41  ;;  %v1238_v27 = vunpack.c.3.s8 %v1118_v41 }
  0xcd   : > { %v5552_v32 = vsel %vm981_vm15, 16843009, %v8221_v37  ;;  %v5554_v33 = vpack.c.b16 %v1229_v42, %v1230_v46  ;;  %v5556_v20 = vpack.c.b16 %v1232_v55, %v1233_v54  ;;  %v1239_v21 = vunpack.c.2.s8 %v1118_v41 }
  0xce   : > { %v1120_v51 = vsel %vm5529_vm0, 16843009, %v8221_v37  ;;  %v1241_v18 = vunpack.c.1.s8 %v1119_v11  ;;  %v5564_v40 = vsel %vm982_vm1, 16843009, %v8221_v37  ;;  %v1057_v62 = vcombine.low %v5534_v10, %v5546_v17 }
  0xcf   : > { %8567 = vst [vmem:[#allocation45_spill] sm:$0xff] %v5554_v33  ;;  %8568 = vst [vmem:[#allocation46_spill] sm:$0xff] %v5556_v20  ;;  %v1242_v42 = vunpack.c.0.s8 %v1119_v11  ;;  %v1244_v46 = vunpack.c.3.s8 %v1119_v11  ;;  %v1245_v55 = vunpack.c.2.s8 %v1119_v11  ;;  %v1059_v41 = vcombine.low %v5552_v32, %v5564_v40 }
  0xd0   : > { %v1247_v57 = vunpack.c.1.s8 %v1120_v51  ;;  %v1248_v13 = vunpack.c.0.s8 %v1120_v51  ;;  %vm8252_vm4 = vcmp.ne.s16.totalorder %v5352_v24, 0  ;;  %v5574_v37 = vpack.c.b16 %v1235_v30, %v1236_v22 }
  0xd1   : > { %v1250_v14 = vunpack.c.3.s8 %v1120_v51  ;;  %v1251_v52 = vunpack.c.2.s8 %v1120_v51  ;;  %vm1089_vm6 = vnez %v1057_v62  ;;  %vm8251_vm8 = vcmp.ne.s16.totalorder %v5354_v25, 0 }
  0xd2   : > { %8569 = vst [vmem:[#allocation47_spill] sm:$0xff] %v5574_v37  ;;  %v5580_v0 = vpack.c.b16 %v1238_v27, %v1239_v21  ;;  %vm1090_vm9 = vnez %v1059_v41  ;;  %vm8250_vm10 = vcmp.ne.s16.totalorder %v5356_v26, 0  ;;  %v5583_v30 = vpack.c.b16 %v1241_v18, %v1242_v42 }
  0xd3   : > { %v5585_v22 = vpack.c.b16 %v1244_v46, %v1245_v55  ;;  %v5587_v51 = vpack.c.b16 %v1247_v57, %v1248_v13  ;;  %v5591_v38 = vpack.c.b16 %v1250_v14, %v1251_v52  ;;  %v8575_v39 = vmov 0  }
  0xd4   : > { %8570 = vst [vmem:[#allocation48_spill] sm:$0xff] %v5580_v0  ;;  %8571 = vst [vmem:[#allocation49_spill] sm:$0xff] %v5583_v30  ;;  %v5594_v35 = vsel %vm1089_vm6, 16843009, %v8575_v39  ;;  %vm8249_vm12 = vcmp.ne.s16.totalorder %v5361_v28, 0  ;;  %vm8264_vm14 = vcmp.ne.s16.totalorder %v5363_v29, 0 }
  0xd5   : > { %8572 = vst [vmem:[#allocation50_spill] sm:$0xff] %v5585_v22  ;;  %8573 = vst [vmem:[#allocation51_spill] sm:$0xff] %v5587_v51  ;;  %v5599_v18 = vsel %vm1090_vm9, 16843009, %v8575_v39  ;;  %vm8269_vm15 = vcmp.ne.s16.totalorder %v5371_v34, 0  ;;  %vm8268_vm6 = vcmp.ne.s16.totalorder %v5429_v3, 0 }
  0xd6   : > { %8574 = vst [vmem:[#allocation52_spill] sm:$0xff] %v5591_v38  ;;  %vm8265_vm9 = vcmp.ne.s16.totalorder %v5449_v44, 0 }
 0x10a   : > { %v566_v56 = vpop.permute.xlu0 %565 }
 0x10b   : > { %v671_v54 = vadd.bf16 %v5330_v58, %v566_v56  ;;  %v672_v9 = vadd.bf16 %v5332_v59, %v566_v56  ;;  %v673_v63 = vadd.bf16 %v5334_v60, %v566_v56  ;;  %v5576_v11 = vpop.permute.xlu1 %575  ;;  %v674_v20 = vadd.bf16 %v5336_v61, %v566_v56 }
 0x10c   : > { %v5635_v7 = vadd.bf16 %v5332_v59, %v5576_v11 }
 0x10d   : > { %v799_v53 = vmul.bf16 1009007652, %v671_v54  ;;  %v800_v5 = vmul.bf16 1009007652, %v672_v9  ;;  %vm735_vm5 = vcmp.gt.bf16.partialorder %v671_v54, 0  ;;  %vm736_vm7 = vcmp.gt.bf16.partialorder %v672_v9, 0 }
 0x10e   : > { %v571_v33 = vpop.permute.xlu0 %570  ;;  %v801_v37 = vmul.bf16 1009007652, %v673_v63  ;;  %vm737_vm11 = vcmp.gt.bf16.partialorder %v673_v63, 0  ;;  %v802_v13 = vmul.bf16 1009007652, %v674_v20  ;;  %vm738_vm13 = vcmp.gt.bf16.partialorder %v674_v20, 0 }
 0x10f   : > { %v863_v56 = vsel %vm735_vm5, %v671_v54, %v799_v53  ;;  %v675_v27 = vadd.bf16 %v5330_v58, %v571_v33  ;;  %v864_v21 = vsel %vm736_vm7, %v672_v9, %v800_v5  ;;  %v676_v57 = vadd.bf16 %v5332_v59, %v571_v33  ;;  %v581_v42 = vpop.permute.xlu1 %580 }
 0x110   : > { %v5604_v53 = vsel %vm8285_vm2, %v863_v56, -1.00492276e+30  ;;  %v5608_v52 = vsel %vm8284_vm3, %v864_v21, -1.00492276e+30  ;;  %v677_v14 = vadd.bf16 %v5334_v60, %v571_v33  ;;  %v865_v55 = vsel %vm737_vm11, %v673_v63, %v801_v37 }
 0x111   : > { %8576 = vst [vmem:[#allocation53_spill] sm:$0xff] %v5604_v53  ;;  %8577 = vst [vmem:[#allocation54_spill] sm:$0xff] %v5608_v52  ;;  %v678_v56 = vadd.bf16 %v5336_v61, %v571_v33  ;;  %v803_v21 = vmul.bf16 1009007652, %v675_v27  ;;  %v1485_v62 = vmax.bf16 %v5608_v52, %v5604_v53  ;;  %v804_v6 = vmul.bf16 1009007652, %v676_v57 }
 0x112   : > { %v866_v5 = vsel %vm738_vm13, %v674_v20, %v802_v13  ;;  %vm739_vm0 = vcmp.gt.bf16.partialorder %v675_v27, 0  ;;  %v5626_v37 = vsel %vm8252_vm4, %v865_v55, -1.00492276e+30  ;;  %vm740_vm1 = vcmp.gt.bf16.partialorder %v676_v57, 0  ;;  %v586_v9 = vpop.permute.xlu0 %585 }
 0x113   : > { %8578 = vst [vmem:[#allocation55_spill] sm:$0xff] %v5626_v37  ;;  %v805_v63 = vmul.bf16 1009007652, %v677_v14  ;;  %v5631_v33 = vadd.bf16 %v5330_v58, %v5576_v11  ;;  %v1486_v20 = vmax.bf16 %v1485_v62, %v5626_v37  ;;  %vm741_vm5 = vcmp.gt.bf16.partialorder %v677_v14, 0  ;;  %v5641_v13 = vpop.permute.xlu1 %590 }
 0x114   : > { %vm8266_vm7 = vcmp.ne.s16.totalorder %v5447_v43, 0  ;;  %v5645_v55 = vsel %vm8251_vm8, %v866_v5, -1.00492276e+30  ;;  %vm742_vm11 = vcmp.gt.bf16.partialorder %v678_v56, 0  ;;  %v806_v54 = vmul.bf16 1009007652, %v678_v56 }
 0x115   : > { %8579 = vst [vmem:[#allocation56_spill] sm:$0xff] %v5645_v55  ;;  %v867_v46 = vsel %vm739_vm0, %v675_v27, %v803_v21  ;;  %vm8267_vm13 = vcmp.ne.s16.totalorder %v5451_v36, 0  ;;  %v683_v62 = vadd.bf16 %v5330_v58, %v581_v42  ;;  %v1487_v41 = vmax.bf16 %v1486_v20, %v5645_v55 }
 0x116   : > { %v868_v24 = vsel %vm740_vm1, %v676_v57, %v804_v6  ;;  %v5654_v37 = vsel %vm8250_vm10, %v867_v46, -1.00492276e+30  ;;  %v5658_v5 = vadd.bf16 %v5334_v60, %v5576_v11  ;;  %v684_v25 = vadd.bf16 %v5332_v59, %v581_v42 }
 0x117   : > { %8580 = vst [vmem:[#allocation57_spill] sm:$0xff] %v5654_v37  ;;  %v685_v27 = vadd.bf16 %v5334_v60, %v581_v42  ;;  %v869_v21 = vsel %vm741_vm5, %v677_v14, %v805_v63  ;;  %1488 = vmax.xlane.bf16.xlu0 %v1487_v41  ;;  %v870_v52 = vsel %vm742_vm11, %v678_v56, %v806_v54  ;;  %v5665_v20 = vsel %vm8249_vm12, %v868_v24, -1.00492276e+30  ;;  %v601_v41 = vpop.permute.xlu1 %600 }
 0x118   : > { %8581 = vst [vmem:[#allocation58_spill] sm:$0xff] %v5665_v20  ;;  %v686_v6 = vadd.bf16 %v5336_v61, %v581_v42  ;;  %v682_v57 = vadd.bf16 %v5336_v61, %v5576_v11  ;;  %v5671_v46 = vadd.bf16 %v5330_v58, %v586_v9  ;;  %v5674_v26 = vadd.bf16 %v5332_v59, %v586_v9 }
 0x119   : > { %v5677_v55 = vadd.bf16 %v5334_v60, %v586_v9  ;;  %v1490_v14 = vmax.bf16 %v5665_v20, %v5654_v37  ;;  %vm8275_vm0 = vcmp.ne.s16.totalorder %v5453_v47, 0  ;;  %v5683_v24 = vadd.bf16 %v5336_v61, %v586_v9 }
 0x11a   : > { %v5687_v11 = vsel %vm8264_vm14, %v869_v21, -1.00492276e+30  ;;  %v5691_v42 = vsel %vm8269_vm15, %v870_v52, -1.00492276e+30  ;;  %vm747_vm1 = vcmp.gt.bf16.partialorder %v683_v62, 0  ;;  %vm8274_vm5 = vcmp.ne.s16.totalorder %v5455_v49, 0 }
 0x11b   : > { %8582 = vst [vmem:[#allocation59_spill] sm:$0xff] %v5687_v11  ;;  %vm8277_vm11 = vcmp.ne.s16.totalorder %v5457_v50, 0  ;;  %v1491_v54 = vmax.bf16 %v1490_v14, %v5687_v11  ;;  %vm748_vm12 = vcmp.gt.bf16.partialorder %v684_v25, 0  ;;  %vm749_vm10 = vcmp.gt.bf16.partialorder %v685_v27, 0 }
 0x11c   : > { %vm750_vm8 = vcmp.gt.bf16.partialorder %v686_v6, 0  ;;  %vm8276_vm4 = vcmp.ne.s16.totalorder %v5461_v8, 0  ;;  %v5699_v9 = vadd.bf16 %v5330_v58, %v5641_v13  ;;  %v811_v56 = vmul.bf16 1009007652, %v683_v62 }
 0x11d   : > { %v812_v52 = vmul.bf16 1009007652, %v684_v25  ;;  %v813_v63 = vmul.bf16 1009007652, %v685_v27  ;;  %v5704_v29 = vadd.bf16 %v5332_v59, %v5641_v13  ;;  %v1492_v14 = vmax.bf16 %v1491_v54, %v5691_v42 }
 0x11e   : > { %v814_v34 = vmul.bf16 1009007652, %v686_v6  ;;  %v699_v28 = vadd.bf16 %v5330_v58, %v601_v41  ;;  %v875_v11 = vsel %vm747_vm1, %v683_v62, %v811_v56  ;;  %vm8301_vm14 = vcmp.ne.s16.totalorder %v5463_v48, 0 }
 0x11f   : > { %v876_v20 = vsel %vm748_vm12, %v684_v25, %v812_v52  ;;  %v877_v37 = vsel %vm749_vm10, %v685_v27, %v813_v63  ;;  %1493 = vmax.xlane.bf16.xlu1 %v1492_v14  ;;  %v5711_v38 = vsel %vm8268_vm6, %v875_v11, -1.00492276e+30  ;;  %vm744_vm10 = vcmp.gt.bf16.partialorder %v5635_v7, 0 }
 0x120   : > { %v878_v53 = vsel %vm750_vm8, %v686_v6, %v814_v34  ;;  %v5715_v21 = vsel %vm8266_vm7, %v876_v20, -1.00492276e+30  ;;  %v5719_v54 = vsel %vm8265_vm9, %v877_v37, -1.00492276e+30  ;;  %vm743_vm8 = vcmp.gt.bf16.partialorder %v5631_v33, 0 }
 0x121   : > { %8583 = vst [vmem:[#allocation60_spill] sm:$0xff] %v5719_v54  ;;  %v5724_v25 = vsel %vm8267_vm13, %v878_v53, -1.00492276e+30  ;;  %v1500_v34 = vmax.bf16 %v5715_v21, %v5711_v38  ;;  %vm8300_vm12 = vcmp.ne.s16.totalorder %v5466_v4, 0  ;;  %vm8297_vm1 = vcmp.ne.s16.totalorder %v5468_v1, 0  ;;  %v8594_v1 = vld [vmem:[#allocation38_spill] sm:$0xff] }
 0x122   : > { %8584 = vst [vmem:[#allocation61_spill] sm:$0xff] %v5724_v25  ;;  %vm745_vm9 = vcmp.gt.bf16.partialorder %v5658_v5, 0  ;;  %vm746_vm7 = vcmp.gt.bf16.partialorder %v682_v57, 0  ;;  %v807_v37 = vmul.bf16 1009007652, %v5631_v33  ;;  %v700_v53 = vadd.bf16 %v5332_v59, %v601_v41 }
 0x123   : > { %v808_v62 = vmul.bf16 1009007652, %v5635_v7  ;;  %v1501_v27 = vmax.bf16 %v1500_v34, %v5719_v54  ;;  %v809_v20 = vmul.bf16 1009007652, %v5658_v5  ;;  %v810_v6 = vmul.bf16 1009007652, %v682_v57 }
 0x124   : > { %vm8290_vm13 = vcmp.ne.s16.totalorder %v5470_v2, 0  ;;  %vm1341_vm6 = vcmp.ne.s16.totalorder %v5488_v23, 0  ;;  %v701_v11 = vadd.bf16 %v5334_v60, %v601_v41  ;;  %v871_v56 = vsel %vm743_vm8, %v5631_v33, %v807_v37 }
 0x125   : > { %v872_v52 = vsel %vm744_vm10, %v5635_v7, %v808_v62  ;;  %v702_v63 = vadd.bf16 %v5336_v61, %v601_v41  ;;  %vm1342_vm15 = vcmp.ne.s16.totalorder %v5493_v31, 0  ;;  %v1502_v14 = vmax.bf16 %v1501_v27, %v5724_v25  ;;  %v5759_v41 = vpop.permute.xlu0 %595 }
 0x126   : > { %v873_v34 = vsel %vm745_vm9, %v5658_v5, %v809_v20  ;;  %v874_v36 = vsel %vm746_vm7, %v682_v57, %v810_v6  ;;  %v5752_v44 = vsel %vm8275_vm0, %v871_v56, -1.00492276e+30  ;;  %v816_v33 = vmul.bf16 1009007652, %v5674_v26 }
 0x127   : > { %v5757_v7 = vadd.bf16 %v5334_v60, %v5641_v13  ;;  %v5763_v37 = vsel %vm8274_vm5, %v872_v52, -1.00492276e+30  ;;  %v5767_v5 = vsel %vm8277_vm11, %v873_v34, -1.00492276e+30  ;;  %vm8302_vm7 = vcmp.ne.s16.totalorder %v5496_v45, 0  ;;  %1503 = vmax.xlane.bf16.xlu0 %v1502_v14 }
 0x128   : > { %v5772_v57 = vsel %vm8276_vm4, %v874_v36, -1.00492276e+30  ;;  %v1495_v62 = vmax.bf16 %v5763_v37, %v5752_v44  ;;  %vm763_vm9 = vcmp.gt.bf16.partialorder %v699_v28, 0  ;;  %vm764_vm8 = vcmp.gt.bf16.partialorder %v700_v53, 0 }
 0x129   : > { %vm1344_vm10 = vcmp.ne.s16.totalorder %v5499_v12, 0  ;;  %vm765_vm5 = vcmp.gt.bf16.partialorder %v701_v11, 0  ;;  %vm766_vm0 = vcmp.gt.bf16.partialorder %v702_v63, 0  ;;  %v827_v27 = vmul.bf16 1009007652, %v699_v28  ;;  %v8597_v12 = vld [vmem:[#allocation41_spill] sm:$0xff] }
 0x12a   : > { %v828_v20 = vmul.bf16 1009007652, %v700_v53  ;;  %v5779_v6 = vadd.bf16 %v5330_v58, %v5759_v41  ;;  %v1496_v56 = vmax.bf16 %v1495_v62, %v5767_v5  ;;  %v829_v52 = vmul.bf16 1009007652, %v701_v11 }
 0x12b   : > { %v830_v36 = vmul.bf16 1009007652, %v702_v63  ;;  %v891_v14 = vsel %vm763_vm9, %v699_v28, %v827_v27  ;;  %vm751_vm4 = vcmp.gt.bf16.partialorder %v5671_v46, 0  ;;  %vm752_vm11 = vcmp.gt.bf16.partialorder %v5674_v26, 0 }
 0x12c   : > { %v892_v34 = vsel %vm764_vm8, %v700_v53, %v828_v20  ;;  %v1497_v43 = vmax.bf16 %v1496_v56, %v5772_v57  ;;  %v893_v3 = vsel %vm765_vm5, %v701_v11, %v829_v52  ;;  %v5787_v54 = vsel %vm8301_vm14, %v891_v14, -1.00492276e+30  ;;  %v8589_v56 = vld [vmem:[#allocation36_spill] sm:$0xff]  ;;  %v8592_v14 = vld [vmem:[#allocation37_spill] sm:$0xff] }
 0x12d   : > { %v894_v25 = vsel %vm766_vm0, %v702_v63, %v830_v36  ;;  %8585 = vst [vmem:[#allocation62_spill] sm:$0xff] %v5787_v54  ;;  %vm8312_vm3 = vcmp.ne.s16.totalorder %v5501_v15, 0  ;;  %vm1346_vm2 = vcmp.ne.s16.totalorder %v5503_v16, 0  ;;  %v5793_v28 = vadd.bf16 %v5332_v59, %v5759_v41 }
 0x12e   : > { %v5797_v53 = vsel %vm8300_vm12, %v892_v34, -1.00492276e+30  ;;  %v5801_v11 = vsel %vm8297_vm1, %v893_v3, -1.00492276e+30  ;;  %v8588_v63 = vmul.bf16 1009007652, %v5671_v46  ;;  %1498 = vmax.xlane.bf16.xlu1 %v1497_v43  ;;  %v5813_v3 = vpop.permute.xlu0 %605  ;;  %v880_v43 = vsel %vm752_vm11, %v5674_v26, %v816_v33 }
 0x12f   : > { %8586 = vst [vmem:[#allocation63_spill] sm:$0xff] %v5797_v53  ;;  %8587 = vst [vmem:[#allocation64_spill] sm:$0xff] %v5801_v11  ;;  %vm8309_vm0 = vcmp.ne.s16.totalorder %v5506_v19, 0  ;;  %v1520_v27 = vmax.bf16 %v5797_v53, %v5787_v54  ;;  %vm753_vm5 = vcmp.gt.bf16.partialorder %v5677_v55, 0  ;;  %vm754_vm9 = vcmp.gt.bf16.partialorder %v5683_v24, 0 }
 0x130   : > { %v879_v62 = vsel %vm751_vm4, %v5671_v46, %v8588_v63  ;;  %v817_v20 = vmul.bf16 1009007652, %v5677_v55  ;;  %vm8336_vm8 = vcmp.ne.s16.totalorder %v8589_v56, 0  ;;  %v5817_v52 = vsel %vm8290_vm13, %v894_v25, -1.00492276e+30 }
 0x131   : > { %8590 = vst [vmem:[#allocation65_spill] sm:$0xff] %v5817_v52  ;;  %v818_v46 = vmul.bf16 1009007652, %v5683_v24  ;;  %v5825_v36 = vsel %vm1341_vm6, %v879_v62, -1.00492276e+30  ;;  %vm8310_vm4 = vcmp.ne.s16.totalorder %v8592_v14, 0  ;;  %v697_v34 = vadd.bf16 %v5334_v60, %v5759_v41 }
 0x132   : > { %8591 = vst [vmem:[#allocation66_spill] sm:$0xff] %v5825_v36  ;;  %v1521_v63 = vmax.bf16 %v1520_v27, %v5801_v11  ;;  %v881_v25 = vsel %vm753_vm5, %v5677_v55, %v817_v20  ;;  %v5834_v2 = vsel %vm1342_vm15, %v880_v43, -1.00492276e+30  ;;  %vm8311_vm13 = vcmp.ne.s16.totalorder %v8594_v1, 0  ;;  %v8600_v11 = vld [vmem:[#allocation45_spill] sm:$0xff] }
 0x133   : > { %8593 = vst [vmem:[#allocation67_spill] sm:$0xff] %v5834_v2  ;;  %v823_v26 = vmul.bf16 1009007652, %v5779_v6  ;;  %v824_v33 = vmul.bf16 1009007652, %v5793_v28  ;;  %v882_v62 = vsel %vm754_vm9, %v5683_v24, %v818_v46  ;;  %v1505_v4 = vmax.bf16 %v5834_v2, %v5825_v36 }
 0x134   : > { %v5846_v55 = vadd.bf16 %v5330_v58, %v5813_v3  ;;  %v5850_v27 = vadd.bf16 %v5332_v59, %v5813_v3  ;;  %v1522_v20 = vmax.bf16 %v1521_v63, %v5817_v52  ;;  %v5855_v43 = vsel %vm8302_vm7, %v881_v25, -1.00492276e+30 }
 0x135   : > { %8595 = vst [vmem:[#allocation68_spill] sm:$0xff] %v5855_v43  ;;  %v5859_v24 = vsel %vm1344_vm10, %v882_v62, -1.00492276e+30  ;;  %v1506_v46 = vmax.bf16 %v1505_v4, %v5855_v43  ;;  %v694_v48 = vadd.bf16 %v5336_v61, %v5641_v13  ;;  %vm755_vm11 = vcmp.gt.bf16.partialorder %v5699_v9, 0 }
 0x136   : > { %8596 = vst [vmem:[#allocation69_spill] sm:$0xff] %v5859_v24  ;;  %1523 = vmax.xlane.bf16.xlu0 %v1522_v20  ;;  %vm756_vm5 = vcmp.gt.bf16.partialorder %v5704_v29, 0  ;;  %vm757_vm9 = vcmp.gt.bf16.partialorder %v5757_v7, 0  ;;  %v819_v63 = vmul.bf16 1009007652, %v5699_v9  ;;  %vm8334_vm12 = vcmp.ne.s16.totalorder %v8597_v12, 0 }
 0x137   : > { %v820_v25 = vmul.bf16 1009007652, %v5704_v29  ;;  %v1507_v45 = vmax.bf16 %v1506_v46, %v5859_v24  ;;  %vm758_vm1 = vcmp.gt.bf16.partialorder %v694_v48, 0  ;;  %v821_v62 = vmul.bf16 1009007652, %v5757_v7 }
 0x138   : > { %v822_v4 = vmul.bf16 1009007652, %v694_v48  ;;  %v883_v13 = vsel %vm755_vm11, %v5699_v9, %v819_v63  ;;  %vm759_vm14 = vcmp.gt.bf16.partialorder %v5779_v6, 0  ;;  %vm760_vm7 = vcmp.gt.bf16.partialorder %v5793_v28, 0  ;;  %v8601_v9 = vld [vmem:[#allocation46_spill] sm:$0xff] }
 0x139   : > { %v884_v20 = vsel %vm756_vm5, %v5704_v29, %v820_v25  ;;  %1508 = vmax.xlane.bf16.xlu1 %v1507_v45  ;;  %v885_v23 = vsel %vm757_vm9, %v5757_v7, %v821_v62  ;;  %v5879_v46 = vsel %vm8312_vm3, %v883_v13, -1.00492276e+30  ;;  %vm8323_vm11 = vcmp.ne.s16.totalorder %v8600_v11, 0  ;;  %v8607_v13 = vld [vmem:[#allocation42_spill] sm:$0xff] }
 0x13a   : > { %v886_v31 = vsel %vm758_vm1, %v694_v48, %v822_v4  ;;  %8598 = vst [vmem:[#allocation70_spill] sm:$0xff] %v5879_v46  ;;  %v5883_v52 = vsel %vm1346_vm2, %v884_v20, -1.00492276e+30  ;;  %vm8328_vm5 = vcmp.ne.s16.totalorder %v8601_v9, 0  ;;  %v5889_v29 = vsel %vm8309_vm0, %v885_v23, -1.00492276e+30 }
 0x13b   : > { %8599 = vst [vmem:[#allocation71_spill] sm:$0xff] %v5883_v52  ;;  %8602 = vst [vmem:[#allocation72_spill] sm:$0xff] %v5889_v29  ;;  %v1510_v45 = vmax.bf16 %v5883_v52, %v5879_v46  ;;  %v1263_v48 = vunpack.c.2.s8 %v5599_v18  ;;  %v8603_v7 = vcombine.high %v5534_v10, %v5546_v17  ;;  %v698_v25 = vadd.bf16 %v5336_v61, %v5759_v41 }
 0x13c   : > { %v5905_v62 = vsel %vm8336_vm8, %v886_v31, -1.00492276e+30  ;;  %v825_v23 = vmul.bf16 1009007652, %v697_v34  ;;  %v887_v4 = vsel %vm759_vm14, %v5779_v6, %v823_v26  ;;  %vm8335_vm9 = vcmp.ne.s16.totalorder %v8607_v13, 0  ;;  %v8630_v13 = vld [vmem:[#allocation17_spill] sm:$0xff] }
 0x13d   : > { %vm5897_vm1 = vnez %v8603_v7  ;;  %8606 = vst [vmem:[#allocation73_spill] sm:$0xff] %v5905_v62  ;;  %v1511_v10 = vmax.bf16 %v1510_v45, %v5889_v29  ;;  %vm761_vm0 = vcmp.gt.bf16.partialorder %v697_v34, 0  ;;  %v888_v17 = vsel %vm760_vm7, %v5793_v28, %v824_v33 }
 0x13e   : > { %v5917_v41 = vsel %vm8310_vm4, %v887_v4, -1.00492276e+30  ;;  %v831_v31 = vmul.bf16 1009007652, %v5846_v55  ;;  %v832_v20 = vmul.bf16 1009007652, %v5850_v27  ;;  %v8610_v26 = vcombine.high %v5552_v32, %v5564_v40 }
 0x13f   : > { %8608 = vst [vmem:[#allocation74_spill] sm:$0xff] %v5917_v41  ;;  %v5923_v6 = vsel %vm8311_vm13, %v888_v17, -1.00492276e+30  ;;  %v1512_v28 = vmax.bf16 %v1511_v10, %v5905_v62  ;;  %vm767_vm7 = vcmp.gt.bf16.partialorder %v5846_v55, 0  ;;  %vm768_vm4 = vcmp.gt.bf16.partialorder %v5850_v27, 0  ;;  %v8613_v17 = vld [vmem:[#allocation47_spill] sm:$0xff]  ;;  %v611_v10 = vpop.permute.xlu1 %610 }
 0x140   : > { %8609 = vst [vmem:[#allocation75_spill] sm:$0xff] %v5923_v6  ;;  %vm5928_vm14 = vnez %v8610_v26  ;;  %v5938_v33 = vsel %vm5897_vm1, 16843009, %v8575_v39  ;;  %v705_v7 = vadd.bf16 %v5334_v60, %v5813_v3  ;;  %v826_v4 = vmul.bf16 1009007652, %v698_v25 }
 0x141   : > { %v889_v40 = vsel %vm761_vm0, %v697_v34, %v825_v23  ;;  %v1515_v32 = vmax.bf16 %v5923_v6, %v5917_v41  ;;  %vm8339_vm13 = vcmp.ne.s16.totalorder %v8613_v17, 0  ;;  %vm762_vm3 = vcmp.gt.bf16.partialorder %v698_v25, 0  ;;  %1513 = vmax.xlane.bf16.xlu1 %v1512_v28  ;;  %v8641_v17 = vld [vmem:[#allocation39_spill] sm:$0xff] }
 0x142   : > { %v8614_v26 = vunpack.c.0.s8 %v5594_v35  ;;  %v8615_v14 = vunpack.c.1.s8 %v5594_v35  ;;  %v8617_v63 = vunpack.c.2.s8 %v5594_v35  ;;  %v8618_v19 = vunpack.c.3.s8 %v5594_v35 }
 0x143   : > { %v8620_v34 = vunpack.c.0.s8 %v5599_v18  ;;  %v8621_v23 = vunpack.c.1.s8 %v5599_v18  ;;  %v707_v16 = vadd.bf16 %v5330_v58, %v611_v10  ;;  %v708_v53 = vadd.bf16 %v5332_v59, %v611_v10 }
 0x144   : > { %v5949_v1 = vpack.c.b16 %v8615_v14, %v8614_v26  ;;  %v5955_v15 = vpack.c.b16 %v8618_v19, %v8617_v63  ;;  %v895_v14 = vsel %vm767_vm7, %v5846_v55, %v831_v31  ;;  %v896_v19 = vsel %vm768_vm4, %v5850_v27, %v832_v20 }
 0x145   : > { %v5961_v56 = vpack.c.b16 %v8621_v23, %v8620_v34  ;;  %vm8338_vm0 = vcmp.ne.s16.totalorder %v5583_v30, 0  ;;  %vm8356_vm1 = vcmp.ne.s16.totalorder %v5585_v22, 0  ;;  %v5975_v35 = vsel %vm8334_vm12, %v889_v40, -1.00492276e+30 }
 0x146   : > { %8616 = vst [vmem:[#allocation76_spill] sm:$0xff] %v5949_v1  ;;  %8619 = vst [vmem:[#allocation77_spill] sm:$0xff] %v5955_v15  ;;  %v8624_v26 = vunpack.c.3.s8 %v5599_v18  ;;  %v5984_v55 = vsel %vm5928_vm14, 16843009, %v8575_v39  ;;  %v1265_v31 = vunpack.c.1.s8 %v5938_v33  ;;  %v706_v27 = vadd.bf16 %v5336_v61, %v5813_v3 }
 0x147   : > { %8622 = vst [vmem:[#allocation78_spill] sm:$0xff] %v5961_v56  ;;  %8623 = vst [vmem:[#allocation79_spill] sm:$0xff] %v5975_v35  ;;  %v890_v20 = vsel %vm762_vm3, %v698_v25, %v826_v4  ;;  %v1516_v28 = vmax.bf16 %v1515_v32, %v5975_v35  ;;  %v833_v40 = vmul.bf16 1009007652, %v705_v7  ;;  %vm8357_vm4 = vcmp.ne.s16.totalorder %v5580_v0, 0  ;;  %v8640_v0 = vld [vmem:[#allocation40_spill] sm:$0xff] }
 0x148   : > { %v5979_v63 = vpack.c.b16 %v8624_v26, %v1263_v48  ;;  %vm769_vm7 = vcmp.gt.bf16.partialorder %v705_v7, 0  ;;  %v5994_v18 = vsel %vm8323_vm11, %v895_v14, -1.00492276e+30  ;;  %v5998_v48 = vsel %vm8328_vm5, %v896_v19, -1.00492276e+30  ;;  %v616_v14 = vpop.permute.xlu1 %615 }
 0x149   : > { %8626 = vst [vmem:[#allocation81_spill] sm:$0xff] %v5994_v18  ;;  %8627 = vst [vmem:[#allocation82_spill] sm:$0xff] %v5998_v48  ;;  %v1266_v45 = vunpack.c.0.s8 %v5938_v33  ;;  %v709_v3 = vadd.bf16 %v5334_v60, %v611_v10  ;;  %v835_v34 = vmul.bf16 1009007652, %v707_v16  ;;  %v836_v25 = vmul.bf16 1009007652, %v708_v53 }
 0x14a   : > { %8625 = vst [vmem:[#allocation80_spill] sm:$0xff] %v5979_v63  ;;  %vm8355_vm3 = vcmp.ne.s16.totalorder %v5587_v51, 0  ;;  %v1268_v4 = vunpack.c.3.s8 %v5938_v33  ;;  %v6006_v32 = vsel %vm8335_vm9, %v890_v20, -1.00492276e+30  ;;  %vm771_vm14 = vcmp.gt.bf16.partialorder %v707_v16, 0  ;;  %v8629_v20 = vld [vmem:[#allocation18_spill] sm:$0xff] }
 0x14b   : > { %8628 = vst [vmem:[#allocation83_spill] sm:$0xff] %v6006_v32  ;;  %vm772_vm11 = vcmp.gt.bf16.partialorder %v708_v53, 0  ;;  %v1269_v23 = vunpack.c.2.s8 %v5938_v33  ;;  %v1517_v19 = vmax.bf16 %v1516_v28, %v6006_v32  ;;  %v834_v26 = vmul.bf16 1009007652, %v706_v27  ;;  %v8631_v32 = vld [vmem:[#allocation52_spill] sm:$0xff] }
 0x14c   : > { %v897_v9 = vsel %vm769_vm7, %v705_v7, %v833_v40  ;;  %v1525_v11 = vmax.bf16 %v5998_v48, %v5994_v18  ;;  %v711_v12 = vadd.bf16 %v5330_v58, %v616_v14  ;;  %v712_v54 = vadd.bf16 %v5332_v59, %v616_v14 }
 0x14d   : > { %vm770_vm5 = vcmp.gt.bf16.partialorder %v706_v27, 0  ;;  %v1062_v35 = vcombine.high %v8630_v13, %v8629_v20  ;;  %1518 = vmax.xlane.bf16.xlu1 %v1517_v19  ;;  %v710_v33 = vadd.bf16 %v5336_v61, %v611_v10  ;;  %v837_v6 = vmul.bf16 1009007652, %v709_v3 }
 0x14e   : > { %v899_v41 = vsel %vm771_vm14, %v707_v16, %v835_v34  ;;  %v900_v28 = vsel %vm772_vm11, %v708_v53, %v836_v25  ;;  %vm8369_vm12 = vcmp.ne.s16.totalorder %v8631_v32, 0  ;;  %vm1365_vm7 = vcmp.ne.s16.totalorder %v5949_v1, 0 }
 0x14f   : > { %vm1366_vm9 = vcmp.ne.s16.totalorder %v5955_v15, 0  ;;  %v6023_v7 = vsel %vm8339_vm13, %v897_v9, -1.00492276e+30  ;;  %vm773_vm8 = vcmp.gt.bf16.partialorder %v709_v3, 0  ;;  %v6025_v40 = vpack.c.b16 %v1265_v31, %v1266_v45  ;;  %v6041_v31 = vpop.permute.xlu0 %620 }
 0x150   : > { %8632 = vst [vmem:[#allocation18_spill] sm:$0xff] %v6023_v7  ;;  %v1271_v19 = vunpack.c.1.s8 %v5984_v55  ;;  %v898_v48 = vsel %vm770_vm5, %v706_v27, %v834_v26  ;;  %v1526_v10 = vmax.bf16 %v1525_v11, %v6023_v7  ;;  %v6029_v16 = vpack.c.b16 %v1268_v4, %v1269_v23 }
 0x151   : > { %8633 = vst [vmem:[#allocation17_spill] sm:$0xff] %v6025_v40  ;;  %v1272_v53 = vunpack.c.0.s8 %v5984_v55  ;;  %v713_v34 = vadd.bf16 %v5334_v60, %v616_v14  ;;  %v6035_v25 = vsel %vm8338_vm0, %v899_v41, -1.00492276e+30  ;;  %v6039_v9 = vsel %vm8356_vm1, %v900_v28, -1.00492276e+30  ;;  %v6048_v41 = vpop.permute.xlu1 %625  ;;  %v8638_v28 = vld [vmem:[#allocation20_spill] sm:$0xff] }
 0x152   : > { %8634 = vst [vmem:[#allocation84_spill] sm:$0xff] %v6029_v16  ;;  %8635 = vst [vmem:[#allocation85_spill] sm:$0xff] %v6035_v25  ;;  %vm1095_vm11 = vnez %v1062_v35  ;;  %v838_v27 = vmul.bf16 1009007652, %v710_v33  ;;  %v901_v45 = vsel %vm773_vm8, %v709_v3, %v837_v6  ;;  %v839_v11 = vmul.bf16 1009007652, %v711_v12 }
 0x153   : > { %8636 = vst [vmem:[#allocation86_spill] sm:$0xff] %v6039_v9  ;;  %v840_v4 = vmul.bf16 1009007652, %v712_v54  ;;  %vm1367_vm5 = vcmp.ne.s16.totalorder %v5961_v56, 0  ;;  %v6046_v23 = vsel %vm8357_vm4, %v898_v48, -1.00492276e+30  ;;  %v1530_v35 = vmax.bf16 %v6039_v9, %v6035_v25 }
 0x154   : > { %8637 = vst [vmem:[#allocation87_spill] sm:$0xff] %v6046_v23  ;;  %vm774_vm14 = vcmp.gt.bf16.partialorder %v710_v33, 0  ;;  %vm775_vm0 = vcmp.gt.bf16.partialorder %v711_v12, 0  ;;  %vm776_vm13 = vcmp.gt.bf16.partialorder %v712_v54, 0  ;;  %v1527_v26 = vmax.bf16 %v1526_v10, %v6046_v23  ;;  %v8639_v6 = vld [vmem:[#allocation19_spill] sm:$0xff] }
 0x155   : > { %v1064_v3 = vcombine.high %v8639_v6, %v8638_v28  ;;  %v1127_v22 = vsel %vm1095_vm11, 16843009, %v8575_v39  ;;  %v715_v30 = vadd.bf16 %v5330_v58, %v6041_v31  ;;  %v716_v48 = vadd.bf16 %v5332_v59, %v6041_v31 }
 0x156   : > { %v8642_v7 = vpack.c.bf16 %v8640_v0, %v8641_v17  ;;  %v6065_v10 = vsel %vm8355_vm3, %v901_v45, -1.00492276e+30  ;;  %v714_v9 = vadd.bf16 %v5336_v61, %v616_v14  ;;  %1528 = vmax.xlane.bf16.xlu1 %v1527_v26  ;;  %v902_v25 = vsel %vm774_vm14, %v710_v33, %v838_v27 }
 0x157   : > { %8643 = vst [vmem:[#allocation20_spill] sm:$0xff] %v6065_v10  ;;  %v841_v23 = vmul.bf16 1009007652, %v713_v34  ;;  %v903_v18 = vsel %vm775_vm0, %v711_v12, %v839_v11  ;;  %v904_v29 = vsel %vm776_vm13, %v712_v54, %v840_v4  ;;  %vm1368_vm8 = vcmp.ne.s16.totalorder %v5979_v63, 0  ;;  %v8647_v12 = vld [vmem:[#allocation44_spill] sm:$0xff]  ;;  %v8648_v54 = vld [vmem:[#allocation43_spill] sm:$0xff]  ;;  %v631_v11 = vpop.permute.xlu1 %630 }
 0x158   : > { %635 = vperm.xlu0 %4554, %v8642_v7   ;;  %vm777_vm11 = vcmp.gt.bf16.partialorder %v713_v34, 0  ;;  %v6069_v62 = vpack.c.b16 %v1271_v19, %v1272_v53  ;;  %v1274_v52 = vunpack.c.3.s8 %v5984_v55  ;;  %v1275_v0 = vunpack.c.2.s8 %v5984_v55  ;;  %v4576_v63 = vld [vmem:[%s5102_s19 + $0x68] sm:$0xff]  }
 0x159   : > { %v1531_v17 = vmax.bf16 %v1530_v35, %v6065_v10  ;;  %vm8371_vm3 = vcmp.ne.s16.totalorder %v6025_v40, 0  ;;  %vm8370_vm1 = vcmp.ne.s16.totalorder %v6029_v16, 0  ;;  %vm6076_vm4 = vnez %v1064_v3 }
 0x15a   : > { %8644 = vst [vmem:[#allocation19_spill] sm:$0xff] %v6069_v62  ;;  %v8649_v33 = vpack.c.bf16 %v8647_v12, %v8648_v54  ;;  %v6085_v7 = vsel %vm8369_vm12, %v902_v25, -1.00492276e+30  ;;  %v6089_v55 = vsel %vm1365_vm7, %v903_v18, -1.00492276e+30  ;;  %v1289_v53 = vunpack.c.1.s8 %v1127_v22 }
 0x15b   : > { %8650 = vst [vmem:[#allocation40_spill] sm:$0xff] %v6085_v7  ;;  %8651 = vst [vmem:[#allocation39_spill] sm:$0xff] %v6089_v55  ;;  %v6093_v19 = vsel %vm1366_vm9, %v904_v29, -1.00492276e+30  ;;  %v843_v27 = vmul.bf16 1009007652, %v715_v30  ;;  %v905_v26 = vsel %vm777_vm11, %v713_v34, %v841_v23  ;;  %v1290_v25 = vunpack.c.0.s8 %v1127_v22 }
 0x15c   : > { %640 = vperm.xlu0 %4554, %v8649_v33   ;;  %8652 = vst [vmem:[#allocation44_spill] sm:$0xff] %v6093_v19  ;;  %v844_v45 = vmul.bf16 1009007652, %v716_v48  ;;  %v842_v4 = vmul.bf16 1009007652, %v714_v9  ;;  %vm778_vm13 = vcmp.gt.bf16.partialorder %v714_v9, 0  ;;  %v717_v35 = vadd.bf16 %v5334_v60, %v6041_v31 }
 0x15d   : > { %vm779_vm0 = vcmp.gt.bf16.partialorder %v715_v30, 0  ;;  %vm780_vm14 = vcmp.gt.bf16.partialorder %v716_v48, 0  ;;  %v1532_v18 = vmax.bf16 %v1531_v17, %v6085_v7  ;;  %v1535_v29 = vmax.bf16 %v6093_v19, %v6089_v55  ;;  %v958_v19 = vld [vmem:[%s5109_s11 + $0xf8] sm:$0xff] }
 0x15e   : > { %v1128_v3 = vsel %vm6076_vm4, 16843009, %v8575_v39  ;;  %v723_v12 = vadd.bf16 %v5330_v58, %v631_v11  ;;  %v6107_v34 = vsel %vm1367_vm5, %v905_v26, -1.00492276e+30  ;;  %v1292_v23 = vunpack.c.3.s8 %v1127_v22 }
 0x15f   : > { %8653 = vst [vmem:[#allocation43_spill] sm:$0xff] %v6107_v34  ;;  %v1293_v54 = vunpack.c.2.s8 %v1127_v22  ;;  %v724_v33 = vadd.bf16 %v5332_v59, %v631_v11  ;;  %1533 = vmax.xlane.bf16.xlu1 %v1532_v18  ;;  %v906_v32 = vsel %vm778_vm13, %v714_v9, %v842_v4  ;;  %v907_v17 = vsel %vm779_vm0, %v715_v30, %v843_v27 }
 0x160   : > { %v908_v51 = vsel %vm780_vm14, %v716_v48, %v844_v45  ;;  %v6110_v15 = vpack.c.b16 %v1274_v52, %v1275_v0  ;;  %v6112_v1 = vpack.c.b16 %v1289_v53, %v1290_v25  ;;  %v1295_v14 = vunpack.c.1.s8 %v1128_v3 }
 0x161   : > { %v1296_v7 = vunpack.c.0.s8 %v1128_v3  ;;  %v718_v10 = vadd.bf16 %v5336_v61, %v6041_v31  ;;  %v1536_v26 = vmax.bf16 %v1535_v29, %v6107_v34  ;;  %vm781_vm4 = vcmp.gt.bf16.partialorder %v717_v35, 0 }
 0x162   : > { %8654 = vst [vmem:[#allocation88_spill] sm:$0xff] %v6110_v15  ;;  %8655 = vst [vmem:[#allocation89_spill] sm:$0xff] %v6112_v1  ;;  %v845_v56 = vmul.bf16 1009007652, %v717_v35  ;;  %v6119_v22 = vsel %vm1368_vm8, %v906_v32, -1.00492276e+30  ;;  %v6129_v9 = vpack.c.b16 %v1292_v23, %v1293_v54  ;;  %v725_v31 = vadd.bf16 %v5334_v60, %v631_v11 }
 0x163   : > { %8656 = vst [vmem:[#allocation90_spill] sm:$0xff] %v6119_v22  ;;  %v6123_v30 = vsel %vm8371_vm3, %v907_v17, -1.00492276e+30  ;;  %v6127_v52 = vsel %vm8370_vm1, %v908_v51, -1.00492276e+30  ;;  %vm1371_vm11 = vcmp.ne.s16.totalorder %v6069_v62, 0  ;;  %v1298_v32 = vunpack.c.3.s8 %v1128_v3 }
 0x164   : > { %8657 = vst [vmem:[#allocation91_spill] sm:$0xff] %v6123_v30  ;;  %8658 = vst [vmem:[#allocation92_spill] sm:$0xff] %v6127_v52  ;;  %v851_v48 = vmul.bf16 1009007652, %v723_v12  ;;  %v852_v0 = vmul.bf16 1009007652, %v724_v33  ;;  %v1299_v53 = vunpack.c.2.s8 %v1128_v3  ;;  %v1537_v27 = vmax.bf16 %v1536_v26, %v6119_v22 }
 0x165   : > { %8659 = vst [vmem:[#allocation93_spill] sm:$0xff] %v6129_v9  ;;  %vm787_vm13 = vcmp.gt.bf16.partialorder %v723_v12, 0  ;;  %vm788_vm0 = vcmp.gt.bf16.partialorder %v724_v33, 0  ;;  %v846_v45 = vmul.bf16 1009007652, %v718_v10  ;;  %v909_v4 = vsel %vm781_vm4, %v717_v35, %v845_v56  ;;  %v4581_v22 = vld [vmem:[%s5102_s19 + $0xf0] sm:$0xff]  }
 0x166   : > { %v1540_v51 = vmax.bf16 %v6127_v52, %v6123_v30  ;;  %vm782_vm14 = vcmp.gt.bf16.partialorder %v718_v10, 0  ;;  %v6137_v25 = vpack.c.b16 %v1295_v14, %v1296_v7  ;;  %vm8395_vm12 = vcmp.ne.s16.totalorder %v6112_v1, 0 }
 0x167   : > { %vm8390_vm1 = vcmp.ne.s16.totalorder %v6129_v9, 0  ;;  %1538 = vmax.xlane.bf16.xlu1 %v1537_v27  ;;  %v726_v18 = vadd.bf16 %v5336_v61, %v631_v11  ;;  %v853_v29 = vmul.bf16 1009007652, %v725_v31  ;;  %v915_v3 = vsel %vm787_vm13, %v723_v12, %v851_v48  ;;  %v4556_v27 = vld [vmem:[%s5102_s19 + $0x40] sm:$0xff]  }
 0x168   : > { %8660 = vst [vmem:[#allocation94_spill] sm:$0xff] %v6137_v25  ;;  %v916_v23 = vsel %vm788_vm0, %v724_v33, %v852_v0  ;;  %v6144_v54 = vsel %vm1371_vm11, %v909_v4, -1.00492276e+30  ;;  %vm789_vm4 = vcmp.gt.bf16.partialorder %v725_v31, 0  ;;  %v910_v56 = vsel %vm782_vm14, %v718_v10, %v846_v45  ;;  %v4557_v45 = vld [vmem:[%s5102_s19 + $0xc0] sm:$0xff]   ;;  %4269 = vmatprep.subr.bf16.mxu0 %v4556_v27  ;;  %v4568_v27 = vld [vmem:[%s5102_s19 + $0x58] sm:$0xff]  }
 0x169   : > { %8661 = vst [vmem:[#allocation95_spill] sm:$0xff] %v6144_v54  ;;  %vm8399_vm3 = vcmp.ne.s16.totalorder %v6110_v15, 0  ;;  %v1541_v7 = vmax.bf16 %v1540_v51, %v6144_v54  ;;  %v6150_v35 = vsel %vm8395_vm12, %v915_v3, -1.00492276e+30  ;;  %v6154_v11 = vsel %vm8390_vm1, %v916_v23, -1.00492276e+30  ;;  %4381 = vmatprep.subr.bf16.mxu1 %v4557_v45 }
 0x16a   : > { %8662 = vst [vmem:[#allocation96_spill] sm:$0xff] %v6150_v35  ;;  %8663 = vst [vmem:[#allocation97_spill] sm:$0xff] %v6154_v11  ;;  %v854_v12 = vmul.bf16 1009007652, %v726_v18  ;;  %v917_v33 = vsel %vm789_vm4, %v725_v31, %v853_v29  ;;  %v6156_v17 = vpack.c.b16 %v1298_v32, %v1299_v53  ;;  %vm8389_vm13 = vcmp.ne.s16.totalorder %v6137_v25, 0  ;;  %v4558_v4 = vld [vmem:[%s5102_s19] sm:$0xff]  }
 0x16b   : > { %v6161_v10 = vsel %vm8399_vm3, %v910_v56, -1.00492276e+30  ;;  %vm790_vm0 = vcmp.gt.bf16.partialorder %v726_v18, 0  ;;  %v1550_v26 = vmax.bf16 %v6154_v11, %v6150_v35  ;;  %v6168_v31 = vsel %vm8389_vm13, %v917_v33, -1.00492276e+30  ;;  %v4559_v51 = vld [vmem:[%s5102_s19 + $0x80] sm:$0xff]   ;;  %4270 = vmatpush3.bf16.msra.mxu0 %v4558_v4 }
 0x16c   : > { %8664 = vst [vmem:[#allocation98_spill] sm:$0xff] %v6156_v17  ;;  %8665 = vst [vmem:[#allocation99_spill] sm:$0xff] %v6161_v10  ;;  %v1542_v14 = vmax.bf16 %v1541_v7, %v6161_v10  ;;  %v918_v48 = vsel %vm790_vm0, %v726_v18, %v854_v12  ;;  %vm8372_vm14 = vcmp.ne.s16.totalorder %v6156_v17, 0  ;;  %4382 = vmatpush3.bf16.msra.mxu1 %v4559_v51  ;;  %v4560_v18 = vld [vmem:[%s5102_s19 + $0x48] sm:$0xff]   ;;  %v4564_v56 = vld [vmem:[%s5102_s19 + $0x50] sm:$0xff]   ;;  %vm2525_vm4 = vcmask 7168  }
 0x16d   : > { %8666 = vst [vmem:[#allocation100_spill] sm:$0xff] %v6168_v31  ;;  %v1551_v0 = vmax.bf16 %v1550_v26, %v6168_v31  ;;  %v6174_v32 = vsel %vm8372_vm14, %v918_v48, -1.00492276e+30  ;;  %v4561_v29 = vld [vmem:[%s5102_s19 + $0xc8] sm:$0xff]   ;;  %4271 = vmatprep.subr.bf16.mxu0 %v4560_v18  ;;  %v4565_v7 = vld [vmem:[%s5102_s19 + $0xd0] sm:$0xff]   ;;  %v4569_v45 = vld [vmem:[%s5102_s19 + $0xd8] sm:$0xff]   ;;  %v6263_v11 = vadd.bf16 %v5334_v60, %v6048_v41 }
 0x16e   : > { %8667 = vst [vmem:[#allocation101_spill] sm:$0xff] %v6174_v32  ;;  %v4562_v3 = vld [vmem:[%s5102_s19 + $0x8] sm:$0xff]   ;;  %4383 = vmatprep.subr.bf16.mxu1 %v4561_v29  ;;  %v4566_v12 = vld [vmem:[%s5102_s19 + $0x10] sm:$0xff]   ;;  %v4570_v4 = vld [vmem:[%s5102_s19 + $0x18] sm:$0xff]  }
 0x16f   : > { %1543 = vmax.xlane.bf16.xlu1 %v1542_v14  ;;  %v1552_v53 = vmax.bf16 %v1551_v0, %v6174_v32  ;;  %v4563_v23 = vld [vmem:[%s5102_s19 + $0x88] sm:$0xff]   ;;  %4272 = vmatpush3.bf16.msra.mxu0 %v4562_v3  ;;  %v4567_v33 = vld [vmem:[%s5102_s19 + $0x90] sm:$0xff]   ;;  %v6189_v14 = vld [vmem:[#allocation2] sm:$0xff]  ;;  %v8669_v3 = vcombine.low %v8630_v13, %v8629_v20  ;;  %vm785_vm3 = vcmp.gt.bf16.partialorder %v6263_v11, 0 }
 0x170   : > { %4384 = vmatpush3.bf16.msra.mxu1 %v4563_v23  ;;  %4273 = vmatprep.subr.bf16.mxu0 %v4564_v56  ;;  %v6191_v26 = vld [vmem:[#allocation2 + $0x8] sm:$0xff]  ;;  %v4571_v51 = vld [vmem:[%s5102_s19 + $0x98] sm:$0xff]   ;;  %v4573_v17 = vld [vmem:[%s5102_s19 + $0xe0] sm:$0xff]  }
 0x171   : > { %4385 = vmatprep.subr.bf16.mxu1 %v4565_v7  ;;  %vm1093_vm0 = vnez %v8669_v3  ;;  %v6218_v13 = vld [vmem:[#allocation2 + $0x18] sm:$0xff]  ;;  %v719_v3 = vadd.bf16 %v5330_v58, %v6048_v41  ;;  %v4574_v32 = vld [vmem:[%s5102_s19 + $0x20] sm:$0xff]   ;;  %v4577_v10 = vld [vmem:[%s5102_s19 + $0xe8] sm:$0xff]  }
 0x172   : > { %v6250_v56 = vld [vmem:[#allocation2 + $0x38] sm:$0xff]  ;;  %v4575_v31 = vld [vmem:[%s5102_s19 + $0xa0] sm:$0xff]  }
 0x173   : > { %4274 = vmatpush3.bf16.msra.mxu0 %v4566_v12  ;;  %v6216_v12 = vld [vmem:[#allocation2 + $0x10] sm:$0xff] }
 0x174   : > { %4386 = vmatpush3.bf16.msra.mxu1 %v4567_v33  ;;  %4275 = vmatprep.subr.bf16.mxu0 %v4568_v27  ;;  %8670 = vst [vmem:[#allocation103_spill] sm:$0xff] %v6216_v12  ;;  %v1125_v33 = vsel %vm1093_vm0, 16843009, %v8575_v39 }
 0x175   : > { %4387 = vmatprep.subr.bf16.mxu1 %v4569_v45  ;;  %v8672_v45 = vcombine.low %v8639_v6, %v8638_v28  ;;  %v4572_v28 = vld [vmem:[%s5102_s19 + $0x60] sm:$0xff]  }
 0x177   : > { %1553 = vmax.xlane.bf16.xlu1 %v1552_v53  ;;  %4276 = vmatpush3.bf16.msra.mxu0 %v4570_v4  ;;  %vm6230_vm14 = vnez %v8672_v45  ;;  %v6248_v45 = vld [vmem:[#allocation2 + $0x30] sm:$0xff] }
 0x178   : > { %4388 = vmatpush3.bf16.msra.mxu1 %v4571_v51  ;;  %v1277_v51 = vunpack.c.1.s8 %v1125_v33  ;;  %8675 = vst [vmem:[#allocation105_spill] sm:$0xff] %v6248_v45  ;;  %v1126_v6 = vsel %vm6230_vm14, 16843009, %v8575_v39  ;;  %4277 = vmatprep.subr.bf16.mxu0 %v4572_v28  ;;  %vm783_vm14 = vcmp.gt.bf16.partialorder %v719_v3, 0  ;;  %v6289_v28 = vld [vmem:[#allocation2 + $0x28] sm:$0xff] }
 0x179   : > { %4389 = vmatprep.subr.bf16.mxu1 %v4573_v17 }
 0x17b   : > { %4278 = vmatpush3.bf16.msra.mxu0 %v4574_v32  ;;  %v6287_v32 = vld [vmem:[#allocation2 + $0x20] sm:$0xff] }
 0x17c   : > { %4390 = vmatpush3.bf16.msra.mxu1 %v4575_v31  ;;  %v956_v31 = vld [vmem:[%s5109_s11 + $0xe8] sm:$0xff]  ;;  %8678 = vst [vmem:[#allocation108_spill] sm:$0xff] %v6287_v32  ;;  %4279 = vmatprep.subr.bf16.mxu0 %v4576_v63 }
 0x17d   : > { %4391 = vmatprep.subr.bf16.mxu1 %v4577_v10 }
 0x1a8   : > { %v1489_v48 = vpop.xlane.xlu0 %1488 }
 0x1a9   : > { %v1565_v0 = vunpack.c.l.bf16 %v1489_v48  ;;  %v1566_v53 = vunpack.c.h.bf16 %v1489_v48 }
 0x1ab   : > { %v6198_v18 = vmax.f32 %v6189_v14, %v1565_v0  ;;  %v6201_v29 = vmax.f32 %v6191_v26, %v1566_v53 }
 0x1ad   : > { %8668 = vst [vmem:[#allocation102_spill] sm:$0xff] %v6201_v29  ;;  %3425 = vst.msk [vmem:[#allocation2] sm:$0xff] %vm2525_vm4, %v6198_v18  ;;  %v1725_v7 = vpack.c.bf16 %v6201_v29, %v6198_v18 }
 0x1ae   : > { %3426 = vst.msk [vmem:[#allocation2 + $0x8] sm:$0xff] %vm2525_vm4, %v6201_v29 }
 0x1af   : > { %1743 = vperm.xlu0 %4554, %v1725_v7   ;;  %v1278_v7 = vunpack.c.0.s8 %v1125_v33 }
 0x1b0   : > { %v1494_v20 = vpop.xlane.xlu1 %1493 }
 0x1b1   : > { %v1567_v48 = vunpack.c.l.bf16 %v1494_v20  ;;  %v1568_v0 = vunpack.c.h.bf16 %v1494_v20  ;;  %v1280_v20 = vunpack.c.3.s8 %v1125_v33  ;;  %v6257_v1 = vpack.c.b16 %v1277_v51, %v1278_v7 }
 0x1b2   : > { %v6275_v51 = vadd.bf16 %v5336_v61, %v6048_v41  ;;  %v1283_v7 = vunpack.c.1.s8 %v1126_v6 }
 0x1b3   : > { %v6222_v53 = vmax.f32 %v6216_v12, %v1567_v48  ;;  %v6225_v27 = vmax.f32 %v6218_v13, %v1568_v0  ;;  %v1281_v48 = vunpack.c.2.s8 %v1125_v33  ;;  %v720_v0 = vadd.bf16 %v5332_v59, %v6048_v41  ;;  %8676 = vst [vmem:[#allocation106_spill] sm:$0xff] %v6257_v1 }
 0x1b4   : > { %v1287_v41 = vunpack.c.2.s8 %v1126_v6  ;;  %vm8409_vm13 = vcmp.ne.s16.totalorder %v6257_v1, 0 }
 0x1b5   : > { %8671 = vst [vmem:[#allocation104_spill] sm:$0xff] %v6222_v53  ;;  %3427 = vst.msk [vmem:[#allocation2 + $0x10] sm:$0xff] %vm2525_vm4, %v6222_v53  ;;  %v1726_v33 = vpack.c.bf16 %v6225_v27, %v6222_v53  ;;  %v848_v35 = vmul.bf16 1009007652, %v720_v0  ;;  %v6265_v15 = vpack.c.b16 %v1280_v20, %v1281_v48  ;;  %vm784_vm0 = vcmp.gt.bf16.partialorder %v720_v0, 0  ;;  %v955_v48 = vld [vmem:[%s5109_s11 + $0xe0] sm:$0xff] }
 0x1b6   : > { %3428 = vst.msk [vmem:[#allocation2 + $0x18] sm:$0xff] %vm2525_vm4, %v6225_v27  ;;  %v1284_v20 = vunpack.c.0.s8 %v1126_v6  ;;  %vm987_vm12 = vnez %v955_v48  ;;  %v6344_v48 = vld [vmem:[#allocation2 + $0x70] sm:$0xff] }
 0x1b7   : > { %1748 = vperm.xlu1 %4555, %v1726_v33   ;;  %v847_v33 = vmul.bf16 1009007652, %v719_v3  ;;  %8677 = vst [vmem:[#allocation107_spill] sm:$0xff] %v6265_v15  ;;  %v912_v62 = vsel %vm784_vm0, %v720_v0, %v848_v35  ;;  %vm8408_vm1 = vcmp.ne.s16.totalorder %v6265_v15, 0  ;;  %v4578_v35 = vld [vmem:[%s5102_s19 + $0x28] sm:$0xff]   ;;  %8684 = vst [vmem:[#allocation114_spill] sm:$0xff] %v6344_v48 }
 0x1b8   : > { %v1504_v23 = vpop.xlane.xlu0 %1503  ;;  %v4579_v0 = vld [vmem:[%s5102_s19 + $0xa8] sm:$0xff]   ;;  %4280 = vmatpush3.bf16.msra.mxu0 %v4578_v35  ;;  %v6358_v15 = vld [vmem:[#allocation2 + $0x40] sm:$0xff] }
 0x1b9   : > { %v1571_v25 = vunpack.c.l.bf16 %v1504_v23  ;;  %v1572_v9 = vunpack.c.h.bf16 %v1504_v23  ;;  %4392 = vmatpush3.bf16.msra.mxu1 %v4579_v0  ;;  %8685 = vst [vmem:[#allocation115_spill] sm:$0xff] %v6358_v15 }
 0x1ba   : > { %4393 = vmatprep.subr.bf16.mxu1 %v4581_v22 }
 0x1bb   : > { %v6268_v23 = vmax.f32 %v6248_v45, %v1571_v25  ;;  %v6271_v4 = vmax.f32 %v6250_v56, %v1572_v9  ;;  %v1286_v9 = vunpack.c.3.s8 %v1126_v6  ;;  %v911_v25 = vsel %vm783_vm14, %v719_v3, %v847_v33 }
 0x1bc   : > { %v849_v6 = vmul.bf16 1009007652, %v6263_v11  ;;  %v850_v3 = vmul.bf16 1009007652, %v6275_v51  ;;  %v6300_v33 = vpack.c.b16 %v1283_v7, %v1284_v20  ;;  %vm988_vm14 = vnez %v956_v31  ;;  %v957_v20 = vld [vmem:[%s5109_s11 + $0xf0] sm:$0xff] }
 0x1bd   : > { %3431 = vst.msk [vmem:[#allocation2 + $0x30] sm:$0xff] %vm2525_vm4, %v6268_v23  ;;  %3432 = vst.msk [vmem:[#allocation2 + $0x38] sm:$0xff] %vm2525_vm4, %v6271_v4  ;;  %v6313_v30 = vsel %vm8409_vm13, %v911_v25, -1.00492276e+30  ;;  %v6317_v7 = vsel %vm8408_vm1, %v912_v62, -1.00492276e+30  ;;  %v6321_v34 = vpack.c.b16 %v1286_v9, %v1287_v41  ;;  %vm990_vm1 = vnez %v958_v19 }
 0x1be   : > { %8679 = vst [vmem:[#allocation109_spill] sm:$0xff] %v6300_v33  ;;  %8681 = vst [vmem:[#allocation111_spill] sm:$0xff] %v6313_v30  ;;  %v4583_v25 = vld [vmem:[%s5102_s19 + $0xb0] sm:$0xff]   ;;  %v6342_v10 = vsel %vm988_vm14, 16843009, %v8575_v39  ;;  %v6346_v9 = vld [vmem:[#allocation2 + $0x78] sm:$0xff]  ;;  %v913_v35 = vsel %vm785_vm3, %v6263_v11, %v849_v6  ;;  %vm989_vm14 = vnez %v957_v20  ;;  %v1545_v22 = vmax.bf16 %v6317_v7, %v6313_v30 }
 0x1bf   : > { %v1499_v17 = vpop.xlane.xlu1 %1498  ;;  %8682 = vst [vmem:[#allocation112_spill] sm:$0xff] %v6317_v7  ;;  %8683 = vst [vmem:[#allocation113_spill] sm:$0xff] %v6321_v34  ;;  %vm8467_vm0 = vcmp.ne.s16.totalorder %v6300_v33, 0  ;;  %vm8433_vm13 = vcmp.ne.s16.totalorder %v6321_v34, 0  ;;  %4394 = vmatpush3.bf16.msra.mxu1 %v4583_v25  ;;  %v6360_v11 = vld [vmem:[#allocation2 + $0x48] sm:$0xff]  ;;  %v4587_v19 = vld [vmem:[%s5102_s19 + $0xb8] sm:$0xff]  }
 0x1c0   : > { %v1569_v16 = vunpack.c.l.bf16 %v1499_v17  ;;  %v1570_v40 = vunpack.c.h.bf16 %v1499_v17  ;;  %v4580_v17 = vld [vmem:[%s5102_s19 + $0x70] sm:$0xff]   ;;  %v6373_v1 = vsel %vm8467_vm0, %v913_v35, -1.00492276e+30  ;;  %v6377_v7 = vsel %vm989_vm14, 16843009, %v8575_v39 }
 0x1c1   : > { %4281 = vmatprep.subr.bf16.mxu0 %v4580_v17  ;;  %8686 = vst [vmem:[#allocation116_spill] sm:$0xff] %v6373_v1  ;;  %v1546_v35 = vmax.bf16 %v1545_v22, %v6373_v1  ;;  %v4584_v22 = vld [vmem:[%s5102_s19 + $0x78] sm:$0xff]   ;;  %vm8782_vm0 = vcmp.ne.s16.totalorder %v5461_v8, 0 }
 0x1c2   : > { %v6306_v54 = vmax.f32 %v6287_v32, %v1569_v16  ;;  %v6309_v52 = vmax.f32 %v6289_v28, %v1570_v40  ;;  %v6326_v16 = vsel %vm987_vm12, 16843009, %v8575_v39  ;;  %v4582_v40 = vld [vmem:[%s5102_s19 + $0x30] sm:$0xff]   ;;  %vm786_vm12 = vcmp.gt.bf16.partialorder %v6275_v51, 0 }
 0x1c3   : > { %v1065_v17 = vcombine.low %v6326_v16, %v6342_v10  ;;  %4282 = vmatpush3.bf16.msra.mxu0 %v4582_v40  ;;  %v914_v62 = vsel %vm786_vm12, %v6275_v51, %v850_v3  ;;  %v6420_v51 = vld [vmem:[#allocation2 + $0x50] sm:$0xff] }
 0x1c4   : > { %8680 = vst [vmem:[#allocation110_spill] sm:$0xff] %v6306_v54  ;;  %3429 = vst.msk [vmem:[#allocation2 + $0x20] sm:$0xff] %vm2525_vm4, %v6306_v54  ;;  %v1727_v63 = vpack.c.bf16 %v6309_v52, %v6306_v54  ;;  %4283 = vmatprep.subr.bf16.mxu0 %v4584_v22 }
 0x1c5   : > { %3430 = vst.msk [vmem:[#allocation2 + $0x28] sm:$0xff] %vm2525_vm4, %v6309_v52  ;;  %8688 = vst [vmem:[#allocation118_spill] sm:$0xff] %v6420_v51 }
 0x1c6   : > { %1753 = vperm.xlu1 %4555, %v1727_v63  }
 0x1c7   : > { %v1524_v41 = vpop.xlane.xlu0 %1523 }
 0x1c8   : > { %v1579_v0 = vunpack.c.l.bf16 %v1524_v41  ;;  %v1580_v31 = vunpack.c.h.bf16 %v1524_v41 }
 0x1ca   : > { %v1509_v6 = vpop.xlane.xlu1 %1508  ;;  %v6363_v63 = vmax.f32 %v6344_v48, %v1579_v0  ;;  %v6366_v41 = vmax.f32 %v6346_v9, %v1580_v31  ;;  %v6381_v0 = vsel %vm990_vm1, 16843009, %v8575_v39  ;;  %vm1097_vm1 = vnez %v1065_v17  ;;  %v4585_v17 = vld [vmem:[%s5102_s19 + $0xf8] sm:$0xff]  }
 0x1cb   : > { %v1573_v40 = vunpack.c.l.bf16 %v1509_v6  ;;  %v1574_v25 = vunpack.c.h.bf16 %v1509_v6  ;;  %v6402_v6 = vsel %vm8433_vm13, %v914_v62, -1.00492276e+30  ;;  %v1067_v31 = vcombine.low %v6377_v7, %v6381_v0  ;;  %4395 = vmatprep.subr.bf16.mxu1 %v4585_v17 }
 0x1cc   : > { %3439 = vst.msk [vmem:[#allocation2 + $0x70] sm:$0xff] %vm2525_vm4, %v6363_v63  ;;  %3440 = vst.msk [vmem:[#allocation2 + $0x78] sm:$0xff] %vm2525_vm4, %v6366_v41  ;;  %v1129_v62 = vsel %vm1097_vm1, 16843009, %v8575_v39  ;;  %v1547_v33 = vmax.bf16 %v1546_v35, %v6402_v6  ;;  %4396 = vmatpush3.bf16.msra.mxu1 %v4587_v19 }
 0x1cd   : > { %v6394_v3 = vmax.f32 %v6358_v15, %v1573_v40  ;;  %v6397_v20 = vmax.f32 %v6360_v11, %v1574_v25  ;;  %8687 = vst [vmem:[#allocation117_spill] sm:$0xff] %v6402_v6  ;;  %v4586_v25 = vld [vmem:[%s5102_s19 + $0x38] sm:$0xff]   ;;  %vm6424_vm3 = vnez %v1067_v31  ;;  %v1301_v55 = vunpack.c.1.s8 %v1129_v62 }
 0x1ce   : > { %v6422_v40 = vld [vmem:[#allocation2 + $0x58] sm:$0xff]  ;;  %4284 = vmatpush3.bf16.msra.mxu0 %v4586_v25  ;;  %1548 = vmax.xlane.bf16.xlu0 %v1547_v33  ;;  %v1302_v54 = vunpack.c.0.s8 %v1129_v62  ;;  %v1304_v17 = vunpack.c.3.s8 %v1129_v62  ;;  %v1305_v6 = vunpack.c.2.s8 %v1129_v62 }
 0x1cf   : > { %3433 = vst.msk [vmem:[#allocation2 + $0x40] sm:$0xff] %vm2525_vm4, %v6394_v3  ;;  %3434 = vst.msk [vmem:[#allocation2 + $0x48] sm:$0xff] %vm2525_vm4, %v6397_v20 }
 0x1d0   : > { %v6449_v62 = vpack.c.b16 %v1304_v17, %v1305_v6 }
 0x1d2   : > { %v1514_v1 = vpop.xlane.xlu1 %1513  ;;  %8692 = vst [vmem:[#allocation120_spill] sm:$0xff] %v6449_v62 }
 0x1d3   : > { %v1575_v15 = vunpack.c.l.bf16 %v1514_v1  ;;  %v1576_v48 = vunpack.c.h.bf16 %v1514_v1  ;;  %v6452_v1 = vld [vmem:[#allocation2 + $0x60] sm:$0xff] }
 0x1d4   : > { %8693 = vst [vmem:[#allocation121_spill] sm:$0xff] %v6452_v1 }
 0x1d5   : > { %v6431_v32 = vmax.f32 %v6420_v51, %v1575_v15  ;;  %v6434_v31 = vmax.f32 %v6422_v40, %v1576_v48  ;;  %v1130_v15 = vsel %vm6424_vm3, 16843009, %v8575_v39  ;;  %v6447_v48 = vpack.c.b16 %v1301_v55, %v1302_v54  ;;  %v6454_v51 = vld [vmem:[#allocation2 + $0x68] sm:$0xff] }
 0x1d6   : > { %v1307_v24 = vunpack.c.1.s8 %v1130_v15  ;;  %v1308_v43 = vunpack.c.0.s8 %v1130_v15  ;;  %vm8457_vm3 = vcmp.ne.s16.totalorder %v6449_v62, 0  ;;  %v1310_v6 = vunpack.c.3.s8 %v1130_v15 }
 0x1d7   : > { %v636_v34 = vpop.permute.xlu0 %635  ;;  %3435 = vst.msk [vmem:[#allocation2 + $0x50] sm:$0xff] %vm2525_vm4, %v6431_v32  ;;  %3436 = vst.msk [vmem:[#allocation2 + $0x58] sm:$0xff] %vm2525_vm4, %v6434_v31  ;;  %vm8462_vm1 = vcmp.ne.s16.totalorder %v6447_v48, 0  ;;  %v1311_v17 = vunpack.c.2.s8 %v1130_v15 }
 0x1d8   : > { %v727_v35 = vadd.bf16 %v5330_v58, %v636_v34  ;;  %v728_v22 = vadd.bf16 %v5332_v59, %v636_v34  ;;  %8691 = vst [vmem:[#allocation119_spill] sm:$0xff] %v6447_v48  ;;  %v729_v19 = vadd.bf16 %v5334_v60, %v636_v34  ;;  %v730_v53 = vadd.bf16 %v5336_v61, %v636_v34  ;;  %v6485_v34 = vld [vmem:[#allocation2 + $0x80] sm:$0xff] }
 0x1d9   : > { %v6465_v29 = vpack.c.b16 %v1307_v24, %v1308_v43  ;;  %v6483_v24 = vpack.c.b16 %v1310_v6, %v1311_v17  ;;  %8698 = vst [vmem:[#allocation126_spill] sm:$0xff] %v6485_v34 }
 0x1da   : > { %v855_v33 = vmul.bf16 1009007652, %v727_v35  ;;  %v856_v25 = vmul.bf16 1009007652, %v728_v22  ;;  %vm791_vm12 = vcmp.gt.bf16.partialorder %v727_v35, 0  ;;  %vm792_vm14 = vcmp.gt.bf16.partialorder %v728_v22, 0 }
 0x1db   : > { %vm793_vm13 = vcmp.gt.bf16.partialorder %v729_v19, 0  ;;  %v857_v12 = vmul.bf16 1009007652, %v729_v19  ;;  %8694 = vst [vmem:[#allocation122_spill] sm:$0xff] %v6465_v29  ;;  %8697 = vst [vmem:[#allocation125_spill] sm:$0xff] %v6483_v24 }
 0x1dc   : > { %v919_v36 = vsel %vm791_vm12, %v727_v35, %v855_v33  ;;  %v920_v45 = vsel %vm792_vm14, %v728_v22, %v856_v25  ;;  %v6487_v22 = vld [vmem:[#allocation2 + $0x88] sm:$0xff]  ;;  %v858_v33 = vmul.bf16 1009007652, %v730_v53  ;;  %vm8456_vm12 = vcmp.ne.s16.totalorder %v6465_v29, 0 }
 0x1dd   : > { %v6481_v43 = vsel %vm8457_vm3, %v920_v45, -1.00492276e+30  ;;  %8699 = vst [vmem:[#allocation127_spill] sm:$0xff] %v6487_v22  ;;  %v921_v25 = vsel %vm793_vm13, %v729_v19, %v857_v12  ;;  %vm794_vm14 = vcmp.gt.bf16.partialorder %v730_v53, 0  ;;  %vm8439_vm13 = vcmp.ne.s16.totalorder %v6483_v24, 0 }
 0x1de   : > { %v1519_v46 = vpop.xlane.xlu1 %1518  ;;  %8696 = vst [vmem:[#allocation124_spill] sm:$0xff] %v6481_v43  ;;  %v6500_v17 = vsel %vm8456_vm12, %v921_v25, -1.00492276e+30  ;;  %v922_v35 = vsel %vm794_vm14, %v730_v53, %v858_v33  ;;  %v1066_v53 = vcombine.high %v6326_v16, %v6342_v10  ;;  %v6518_v33 = vld [vmem:[#allocation2 + $0x90] sm:$0xff]  ;;  %v6520_v25 = vld [vmem:[#allocation2 + $0x98] sm:$0xff]  ;;  %v1068_v16 = vcombine.high %v6377_v7, %v6381_v0 }
 0x1df   : > { %v1577_v2 = vunpack.c.l.bf16 %v1519_v46  ;;  %v1578_v30 = vunpack.c.h.bf16 %v1519_v46  ;;  %8701 = vst [vmem:[#allocation129_spill] sm:$0xff] %v6500_v17  ;;  %8703 = vst [vmem:[#allocation131_spill] sm:$0xff] %v6518_v33 }
 0x1e0   : > { %8704 = vst [vmem:[#allocation132_spill] sm:$0xff] %v6520_v25  ;;  %vm1099_vm14 = vnez %v1066_v53  ;;  %v6544_v53 = vld [vmem:[#allocation2 + $0xa8] sm:$0xff] }
 0x1e1   : > { %v6459_v55 = vmax.f32 %v6452_v1, %v1577_v2  ;;  %v6462_v54 = vmax.f32 %v6454_v51, %v1578_v30  ;;  %v6477_v2 = vsel %vm8462_vm1, %v919_v36, -1.00492276e+30  ;;  %8708 = vst [vmem:[#allocation136_spill] sm:$0xff] %v6544_v53 }
 0x1e2   : > { %8695 = vst [vmem:[#allocation123_spill] sm:$0xff] %v6477_v2  ;;  %v1555_v30 = vmax.bf16 %v6481_v43, %v6477_v2 }
 0x1e3   : > { %3437 = vst.msk [vmem:[#allocation2 + $0x60] sm:$0xff] %vm2525_vm4, %v6459_v55  ;;  %3438 = vst.msk [vmem:[#allocation2 + $0x68] sm:$0xff] %vm2525_vm4, %v6462_v54 }
 0x1e4   : > { %v1556_v12 = vmax.bf16 %v1555_v30, %v6500_v17 }
 0x1e7   : > { %v1529_v15 = vpop.xlane.xlu1 %1528 }
 0x1e8   : > { %v1581_v36 = vunpack.c.l.bf16 %v1529_v15  ;;  %v1582_v46 = vunpack.c.h.bf16 %v1529_v15 }
 0x1ea   : > { %v6493_v45 = vmax.f32 %v6485_v34, %v1581_v36  ;;  %v6496_v6 = vmax.f32 %v6487_v22, %v1582_v46  ;;  %v6514_v46 = vsel %vm8439_vm13, %v922_v35, -1.00492276e+30  ;;  %v1728_v22 = vpack.c.bf16 %v6271_v4, %v6268_v23 }
 0x1eb   : > { %8702 = vst [vmem:[#allocation130_spill] sm:$0xff] %v6514_v46  ;;  %v1557_v36 = vmax.bf16 %v1556_v12, %v6514_v46  ;;  %vm1100_vm13 = vnez %v1068_v16 }
 0x1ec   : > { %8700 = vst [vmem:[#allocation128_spill] sm:$0xff] %v6496_v6  ;;  %3441 = vst.msk [vmem:[#allocation2 + $0x80] sm:$0xff] %vm2525_vm4, %v6493_v45  ;;  %1758 = vperm.xlu0 %4554, %v1728_v22   ;;  %v6542_v22 = vld [vmem:[#allocation2 + $0xa0] sm:$0xff]  ;;  %v1132_v46 = vsel %vm1100_vm13, 16843009, %v8575_v39 }
 0x1ed   : > { %3442 = vst.msk [vmem:[#allocation2 + $0x88] sm:$0xff] %vm2525_vm4, %v6496_v6  ;;  %1558 = vmax.xlane.bf16.xlu1 %v1557_v36  ;;  %8707 = vst [vmem:[#allocation135_spill] sm:$0xff] %v6542_v22  ;;  %v1322_v2 = vunpack.c.3.s8 %v1132_v46 }
 0x1f0   : > { %v1534_v30 = vpop.xlane.xlu1 %1533 }
 0x1f1   : > { %v1583_v15 = vunpack.c.l.bf16 %v1534_v30  ;;  %v1584_v19 = vunpack.c.h.bf16 %v1534_v30 }
 0x1f3   : > { %v6526_v24 = vmax.f32 %v6518_v33, %v1583_v15  ;;  %v6529_v35 = vmax.f32 %v6520_v25, %v1584_v19  ;;  %v1131_v19 = vsel %vm1099_vm14, 16843009, %v8575_v39  ;;  %v641_v15 = vpop.permute.xlu0 %640  ;;  %v1319_v39 = vunpack.c.1.s8 %v1132_v46 }
 0x1f4   : > { %v1313_v36 = vunpack.c.1.s8 %v1131_v19  ;;  %v1314_v10 = vunpack.c.0.s8 %v1131_v19  ;;  %v731_v12 = vadd.bf16 %v5330_v58, %v641_v15  ;;  %v732_v25 = vadd.bf16 %v5332_v59, %v641_v15 }
 0x1f5   : > { %8705 = vst [vmem:[#allocation133_spill] sm:$0xff] %v6526_v24  ;;  %8706 = vst [vmem:[#allocation134_spill] sm:$0xff] %v6529_v35  ;;  %v1316_v33 = vunpack.c.3.s8 %v1131_v19  ;;  %v1317_v29 = vunpack.c.2.s8 %v1131_v19  ;;  %v733_v16 = vadd.bf16 %v5334_v60, %v641_v15 }
 0x1f6   : > { %3443 = vst.msk [vmem:[#allocation2 + $0x90] sm:$0xff] %vm2525_vm4, %v6526_v24  ;;  %3444 = vst.msk [vmem:[#allocation2 + $0x98] sm:$0xff] %vm2525_vm4, %v6529_v35  ;;  %v859_v58 = vmul.bf16 1009007652, %v731_v12  ;;  %v860_v59 = vmul.bf16 1009007652, %v732_v25  ;;  %v6563_v19 = vpack.c.b16 %v1313_v36, %v1314_v10  ;;  %v1323_v10 = vunpack.c.2.s8 %v1132_v46 }
 0x1f7   : > { %vm795_vm14 = vcmp.gt.bf16.partialorder %v731_v12, 0  ;;  %vm796_vm13 = vcmp.gt.bf16.partialorder %v732_v25, 0  ;;  %v734_v36 = vadd.bf16 %v5336_v61, %v641_v15  ;;  %v6603_v15 = vld [vmem:[#allocation2 + $0xd0] sm:$0xff] }
 0x1f8   : > { %v1539_v7 = vpop.xlane.xlu1 %1538  ;;  %8711 = vst [vmem:[#allocation139_spill] sm:$0xff] %v6563_v19  ;;  %v923_v34 = vsel %vm795_vm14, %v731_v12, %v859_v58  ;;  %v924_v1 = vsel %vm796_vm13, %v732_v25, %v860_v59  ;;  %vm8461_vm12 = vcmp.ne.s16.totalorder %v6563_v19, 0  ;;  %vm797_vm14 = vcmp.gt.bf16.partialorder %v733_v16, 0  ;;  %8721 = vst [vmem:[#allocation149_spill] sm:$0xff] %v6603_v15  ;;  %v6605_v58 = vld [vmem:[#allocation2 + $0xd8] sm:$0xff] }
 0x1f9   : > { %v1585_v0 = vunpack.c.l.bf16 %v1539_v7  ;;  %v1586_v30 = vunpack.c.h.bf16 %v1539_v7  ;;  %v6570_v7 = vld [vmem:[#allocation2 + $0xb8] sm:$0xff]  ;;  %v861_v25 = vmul.bf16 1009007652, %v733_v16  ;;  %v6595_v61 = vsel %vm8461_vm12, %v923_v34, -1.00492276e+30  ;;  %8722 = vst [vmem:[#allocation150_spill] sm:$0xff] %v6605_v58 }
 0x1fa   : > { %8714 = vst [vmem:[#allocation142_spill] sm:$0xff] %v6570_v7  ;;  %8718 = vst [vmem:[#allocation146_spill] sm:$0xff] %v6595_v61 }
 0x1fb   : > { %v6549_v62 = vmax.f32 %v6542_v22, %v1585_v0  ;;  %v6552_v48 = vmax.f32 %v6544_v53, %v1586_v30  ;;  %v6565_v0 = vpack.c.b16 %v1316_v33, %v1317_v29  ;;  %v1320_v30 = vunpack.c.0.s8 %v1132_v46  ;;  %v6568_v22 = vld [vmem:[#allocation2 + $0xb0] sm:$0xff] }
 0x1fc   : > { %8713 = vst [vmem:[#allocation141_spill] sm:$0xff] %v6568_v22  ;;  %v6601_v46 = vpack.c.b16 %v1322_v2, %v1323_v10 }
 0x1fd   : > { %8709 = vst [vmem:[#allocation137_spill] sm:$0xff] %v6549_v62  ;;  %8710 = vst [vmem:[#allocation138_spill] sm:$0xff] %v6552_v48  ;;  %vm8458_vm3 = vcmp.ne.s16.totalorder %v6565_v0, 0  ;;  %v6580_v60 = vpack.c.b16 %v1319_v39, %v1320_v30  ;;  %v862_v39 = vmul.bf16 1009007652, %v734_v36  ;;  %v925_v30 = vsel %vm797_vm14, %v733_v16, %v861_v25 }
 0x1fe   : > { %3445 = vst.msk [vmem:[#allocation2 + $0xa0] sm:$0xff] %vm2525_vm4, %v6549_v62  ;;  %3446 = vst.msk [vmem:[#allocation2 + $0xa8] sm:$0xff] %vm2525_vm4, %v6552_v48  ;;  %vm8459_vm14 = vcmp.ne.s16.totalorder %v6601_v46, 0 }
 0x1ff   : > { %8712 = vst [vmem:[#allocation140_spill] sm:$0xff] %v6565_v0  ;;  %8717 = vst [vmem:[#allocation145_spill] sm:$0xff] %v6580_v60  ;;  %vm8460_vm13 = vcmp.ne.s16.totalorder %v6580_v60, 0 }
 0x200   : > { %v1544_v53 = vpop.xlane.xlu1 %1543  ;;  %8720 = vst [vmem:[#allocation148_spill] sm:$0xff] %v6601_v46  ;;  %v6620_v16 = vsel %vm8460_vm13, %v925_v30, -1.00492276e+30 }
 0x201   : > { %v1587_v17 = vunpack.c.l.bf16 %v1544_v53  ;;  %v1588_v43 = vunpack.c.h.bf16 %v1544_v53  ;;  %v1729_v53 = vpack.c.bf16 %v6397_v20, %v6394_v3  ;;  %8725 = vst [vmem:[#allocation153_spill] sm:$0xff] %v6620_v16 }
 0x203   : > { %v6575_v29 = vmax.f32 %v6568_v22, %v1587_v17  ;;  %v6578_v33 = vmax.f32 %v6570_v7, %v1588_v43  ;;  %v6599_v43 = vsel %vm8458_vm3, %v924_v1, -1.00492276e+30  ;;  %1763 = vperm.xlu1 %4555, %v1729_v53   ;;  %v1730_v1 = vpack.c.bf16 %v6434_v31, %v6431_v32  ;;  %v8861_v7 = vld [vmem:[#allocation99_spill] sm:$0xff] }
 0x204   : > { %8719 = vst [vmem:[#allocation147_spill] sm:$0xff] %v6599_v43  ;;  %v1560_v34 = vmax.bf16 %v6599_v43, %v6595_v61  ;;  %vm798_vm3 = vcmp.gt.bf16.partialorder %v734_v36, 0  ;;  %v8905_v61 = vld [vmem:[#allocation121_spill] sm:$0xff] }
 0x205   : > { %8715 = vst [vmem:[#allocation143_spill] sm:$0xff] %v6575_v29  ;;  %8716 = vst [vmem:[#allocation144_spill] sm:$0xff] %v6578_v33  ;;  %v926_v53 = vsel %vm798_vm3, %v734_v36, %v862_v39 }
 0x206   : > { %3447 = vst.msk [vmem:[#allocation2 + $0xb0] sm:$0xff] %vm2525_vm4, %v6575_v29  ;;  %3448 = vst.msk [vmem:[#allocation2 + $0xb8] sm:$0xff] %vm2525_vm4, %v6578_v33  ;;  %v1561_v25 = vmax.bf16 %v1560_v34, %v6620_v16  ;;  %v6638_v39 = vsel %vm8459_vm14, %v926_v53, -1.00492276e+30  ;;  %v8727_v34 = vpack.c.bf16 %v6366_v41, %v6363_v63  ;;  %v8728_v53 = vsub.f32 %v6189_v14, %v6198_v18 }
 0x207   : > { %1768 = vperm.xlu1 %4555, %v1730_v1   ;;  %8726 = vst [vmem:[#allocation154_spill] sm:$0xff] %v6638_v39  ;;  %v1733_v1 = vpack.c.bf16 %v6496_v6, %v6493_v45 }
 0x208   : > { %v1554_v59 = vpop.xlane.xlu1 %1553  ;;  %v1562_v30 = vmax.bf16 %v1561_v25, %v6638_v39  ;;  %v1661_v25 = vmul.f32 1.442695, %v8728_v53 }
 0x209   : > { %v1591_v17 = vunpack.c.l.bf16 %v1554_v59  ;;  %v1592_v12 = vunpack.c.h.bf16 %v1554_v59 }
 0x20a   : > { %4588 = vpow2.f32 %v1661_v25 }
 0x20b   : > { %v6613_v2 = vmax.f32 %v6603_v15, %v1591_v17  ;;  %v6616_v10 = vmax.f32 %v6605_v58, %v1592_v12  ;;  %v1731_v12 = vpack.c.bf16 %v6462_v54, %v6459_v55  ;;  %1563 = vmax.xlane.bf16.xlu0 %v1562_v30  ;;  %v1735_v17 = vpack.c.bf16 %v6552_v48, %v6549_v62  ;;  %v8883_v62 = vld [vmem:[#allocation26_spill] sm:$0xff] }
 0x20c   : > { %v8729_v30 = vsub.f32 %v6218_v13, %v6225_v27  ;;  %v8733_v13 = vsub.f32 %v6360_v11, %v6397_v20  ;;  %v8738_v11 = vsub.f32 %v6454_v51, %v6462_v54 }
 0x20d   : > { %8723 = vst [vmem:[#allocation151_spill] sm:$0xff] %v6613_v2  ;;  %8724 = vst [vmem:[#allocation152_spill] sm:$0xff] %v6616_v10  ;;  %1773 = vperm.xlu1 %4555, %v1731_v12   ;;  %v1736_v12 = vpack.c.bf16 %v6578_v33, %v6575_v29  ;;  %v8860_v33 = vld [vmem:[#allocation95_spill] sm:$0xff] }
 0x20e   : > { %3451 = vst.msk [vmem:[#allocation2 + $0xd0] sm:$0xff] %vm2525_vm4, %v6613_v2  ;;  %3452 = vst.msk [vmem:[#allocation2 + $0xd8] sm:$0xff] %vm2525_vm4, %v6616_v10  ;;  %v1679_v27 = vmul.f32 1.442695, %v8733_v13  ;;  %v1687_v20 = vmul.f32 1.442695, %v8738_v11 }
 0x20f   : > { %v8746_v11 = vld [vmem:[#allocation58_spill] sm:$0xff] }
 0x211   : > { %1778 = vperm.xlu1 %4555, %v8727_v34   ;;  %v1667_v34 = vmul.f32 1.442695, %v8729_v30  ;;  %v8739_v30 = vld [vmem:[#allocation53_spill] sm:$0xff] }
 0x213   : > { %4590 = vpow2.f32 %v1667_v34 }
 0x214   : > { %v6664_v18 = vpop.eup %4588 }
 0x215   : > { %1783 = vperm.xlu1 %4555, %v1733_v1   ;;  %v8730_v1 = vsub.f32 %v6289_v28, %v6309_v52  ;;  %8732 = vst [vmem:[#allocation155_spill] sm:$0xff] %v6664_v18  ;;  %v8735_v28 = vsub.f32 %v6422_v40, %v6434_v31  ;;  %v8741_v40 = vld [vmem:[#allocation55_spill] sm:$0xff] }
 0x217   : > { %v1671_v59 = vmul.f32 1.442695, %v8730_v1  ;;  %v8740_v1 = vld [vmem:[#allocation54_spill] sm:$0xff] }
 0x219   : > { %1793 = vperm.xlu1 %4555, %v1735_v17   ;;  %v1734_v17 = vpack.c.bf16 %v6529_v35, %v6526_v24  ;;  %4592 = vpow2.f32 %v1671_v59  ;;  %v1683_v59 = vmul.f32 1.442695, %v8735_v28 }
 0x21d   : > { %1798 = vperm.xlu1 %4555, %v1736_v12   ;;  %v8731_v12 = vsub.f32 %v6250_v56, %v6271_v4  ;;  %v6670_v52 = vpop.eup %4590  ;;  %v8737_v4 = vsub.f32 %v6346_v9, %v6366_v41 }
 0x21e   : > { %8734 = vst [vmem:[#allocation156_spill] sm:$0xff] %v6670_v52 }
 0x21f   : > { %v1675_v14 = vmul.f32 1.442695, %v8731_v12  ;;  %v1691_v53 = vmul.f32 1.442695, %v8737_v4  ;;  %v8742_v12 = vld [vmem:[#allocation56_spill] sm:$0xff] }
 0x221   : > { %4594 = vpow2.f32 %v1675_v14 }
 0x222   : > { %4596 = vpow2.f32 %v1679_v27 }
 0x223   : > { %v6676_v56 = vpop.eup %4592  ;;  %4598 = vpow2.f32 %v1683_v59  ;;  %v8745_v59 = vld [vmem:[#allocation57_spill] sm:$0xff] }
 0x224   : > { %8736 = vst [vmem:[#allocation157_spill] sm:$0xff] %v6676_v56  ;;  %4600 = vpow2.f32 %v1691_v53 }
 0x225   : > { %1788 = vperm.xlu0 %4554, %v1734_v17   ;;  %4602 = vpow2.f32 %v1687_v20 }
 0x229   : > { %2592 = vperm.xlu0 %4554, %v6664_v18  }
 0x22b   : > { %v6689_v13 = vpop.eup %4594 }
 0x22c   : > { %8743 = vst [vmem:[#allocation53_spill] sm:$0xff] %v6689_v13  ;;  %v6692_v54 = vpop.eup %4596 }
 0x22d   : > { %2607 = vperm.xlu0 %4554, %v6670_v52   ;;  %8744 = vst [vmem:[#allocation54_spill] sm:$0xff] %v6692_v54 }
 0x22e   : > { %v1744_v25 = vpop.permute.xlu0 %1743 }
 0x22f   : > { %v1821_v34 = vsub.bf16 %v8739_v30, %v1744_v25  ;;  %v1822_v17 = vsub.bf16 %v8740_v1, %v1744_v25  ;;  %v1823_v31 = vsub.bf16 %v8741_v40, %v1744_v25  ;;  %v1824_v14 = vsub.bf16 %v8742_v12, %v1744_v25  ;;  %v8747_v25 = vld [vmem:[#allocation59_spill] sm:$0xff]  ;;  %v6699_v1 = vpop.eup %4598 }
 0x230   : > { %8748 = vst [vmem:[#allocation55_spill] sm:$0xff] %v6699_v1  ;;  %v6702_v12 = vpop.eup %4600 }
 0x231   : > { %2617 = vperm.xlu0 %4554, %v6676_v56   ;;  %v1886_v9 = vmul.bf16 1069105081, %v1821_v34  ;;  %v1889_v41 = vmul.bf16 1069105081, %v1822_v17  ;;  %v1892_v27 = vmul.bf16 1069105081, %v1823_v31 }
 0x232   : > { %v1895_v51 = vmul.bf16 1069105081, %v1824_v14  ;;  %8749 = vst [vmem:[#allocation56_spill] sm:$0xff] %v6702_v12  ;;  %v6704_v14 = vpop.eup %4602 }
 0x233   : > { %4604 = vpow.bf16 %v1886_v9  ;;  %8750 = vst [vmem:[#allocation57_spill] sm:$0xff] %v6704_v14 }
 0x234   : > { %4606 = vpow.bf16 %v1889_v41  ;;  %v8751_v41 = vld [vmem:[#allocation9_spill] sm:$0xff] }
 0x235   : > { %2627 = vperm.xlu0 %4554, %v6689_v13   ;;  %4608 = vpow.bf16 %v1892_v27  ;;  %vm8752_vm3 = vcmp.ne.s16.totalorder %v8751_v41, 0 }
 0x236   : > { %v1749_v28 = vpop.permute.xlu1 %1748  ;;  %4610 = vpow.bf16 %v1895_v51  ;;  %vm8756_vm12 = vmmov %vm8752_vm3 }
 0x237   : > { %v1825_v4 = vsub.bf16 %v8745_v59, %v1749_v28  ;;  %v1826_v53 = vsub.bf16 %v8746_v11, %v1749_v28  ;;  %v1827_v30 = vsub.bf16 %v8747_v25, %v1749_v28  ;;  %v1828_v34 = vsub.bf16 %v5691_v42, %v1749_v28  ;;  %v8753_v28 = vld [vmem:[#allocation10_spill] sm:$0xff] }
 0x238   : > { %vm8754_vm14 = vcmp.ne.s16.totalorder %v8753_v28, 0 }
 0x239   : > { %2637 = vperm.xlu0 %4554, %v6692_v54   ;;  %v1898_v20 = vmul.bf16 1069105081, %v1825_v4  ;;  %v1901_v17 = vmul.bf16 1069105081, %v1826_v53  ;;  %v1904_v40 = vmul.bf16 1069105081, %v1827_v30  ;;  %vm8755_vm13 = vmmov %vm8754_vm14 }
 0x23a   : > { %v1907_v31 = vmul.bf16 1069105081, %v1828_v34  ;;  %v8757_v53 = vld [vmem:[#allocation11_spill] sm:$0xff]  ;;  %v8763_v54 = vld [vmem:[#allocation13_spill] sm:$0xff] }
 0x23b   : > { %4612 = vpow.bf16 %v1898_v20  ;;  %vm8758_vm1 = vcmp.ne.s16.totalorder %v8757_v53, 0  ;;  %v8759_v20 = vld [vmem:[#allocation12_spill] sm:$0xff] }
 0x23c   : > { %4614 = vpow.bf16 %v1901_v17 }
 0x23d   : > { %2647 = vperm.xlu0 %4554, %v6699_v1   ;;  %4616 = vpow.bf16 %v1904_v40 }
 0x23e   : > { %4618 = vpow.bf16 %v1907_v31  ;;  %v4605_v9 = vpop.eup %4604 }
 0x23f   : > { %v4607_v42 = vpop.eup %4606  ;;  %v6709_v27 = vsel %vm8752_vm3, %v4605_v9, 0  ;;  %vm8760_vm3 = vcmp.ne.s16.totalorder %v8759_v20, 0  ;;  %v8768_v20 = vld [vmem:[#allocation16_spill] sm:$0xff] }
 0x240   : > { %v4609_v51 = vpop.eup %4608  ;;  %4201 = vmatprep.mubr.msk.bf16.mxu0 %vm8754_vm14, %v4607_v42  ;;  %v2078_v59 = vsel %vm8755_vm13, %v4607_v42, 0  ;;  %v2205_v4 = vunpack.c.l.bf16 %v6709_v27  ;;  %vm8762_vm13 = vmmov %vm8760_vm3 }
 0x241   : > { %2657 = vperm.xlu0 %4554, %v6704_v14   ;;  %v4611_v11 = vpop.eup %4610  ;;  %4202 = vmatmul.mubr.msk.bf16.vlgmr.msra.gmra.mrb[0].mxu0 %vm8756_vm12, %v4605_v9  ;;  %v6721_v25 = vsel %vm8758_vm1, %v4609_v51, 0  ;;  %v2206_v30 = vunpack.c.l.bf16 %v2078_v59  ;;  %vm8761_vm12 = vmmov %vm8758_vm1  ;;  %vm8764_vm1 = vcmp.ne.s16.totalorder %v8763_v54, 0  ;;  %v2209_v54 = vunpack.c.h.bf16 %v6709_v27 }
 0x242   : > { %4233 = vmatprep.mubr.msk.bf16.mxu1 %vm8760_vm3, %v4611_v11  ;;  %v6733_v9 = vsel %vm8762_vm13, %v4611_v11, 0  ;;  %v2207_v41 = vunpack.c.l.bf16 %v6721_v25  ;;  %vm8770_vm13 = vmmov %vm8764_vm1 }
 0x243   : > { %4234 = vmatmul.mubr.msk.bf16.vlgmr.msra.gmra.mrb[0].mxu1 %vm8761_vm12, %v4609_v51  ;;  %v2333_v28 = vadd.f32 %v2206_v30, %v2205_v4  ;;  %v8765_v51 = vld [vmem:[#allocation14_spill] sm:$0xff]  ;;  %v2208_v4 = vunpack.c.l.bf16 %v6733_v9  ;;  %vm8769_vm12 = vcmp.ne.s16.totalorder %v8768_v20, 0 }
 0x244   : > { %vm8766_vm14 = vcmp.ne.s16.totalorder %v8765_v51, 0  ;;  %v2210_v51 = vunpack.c.h.bf16 %v2078_v59 }
 0x245   : > { %2667 = vperm.xlu0 %4554, %v6702_v12   ;;  %v1754_v34 = vpop.permute.xlu1 %1753  ;;  %vm8767_vm3 = vmmov %vm8766_vm14 }
 0x246   : > { %v1829_v17 = vsub.bf16 %v5752_v44, %v1754_v34  ;;  %v1830_v40 = vsub.bf16 %v5763_v37, %v1754_v34  ;;  %v1831_v31 = vsub.bf16 %v5767_v5, %v1754_v34  ;;  %v1832_v42 = vsub.bf16 %v5772_v57, %v1754_v34  ;;  %v4613_v36 = vpop.eup %4612 }
 0x247   : > { %v4615_v1 = vpop.eup %4614  ;;  %v2081_v5 = vsel %vm8764_vm1, %v4613_v36, 0  ;;  %v2334_v57 = vadd.f32 %v2333_v28, %v2207_v41  ;;  %v2338_v20 = vadd.f32 %v2210_v51, %v2209_v54 }
 0x248   : > { %v1910_v12 = vmul.bf16 1069105081, %v1829_v17  ;;  %v1913_v14 = vmul.bf16 1069105081, %v1830_v40  ;;  %v1916_v44 = vmul.bf16 1069105081, %v1831_v31  ;;  %v4617_v34 = vpop.eup %4616  ;;  %4203 = vmatprep.mubr.msk.bf16.mxu0 %vm8766_vm14, %v4615_v1  ;;  %v2217_v30 = vunpack.c.h.bf16 %v2081_v5 }
 0x249   : > { %v1919_v37 = vmul.bf16 1069105081, %v1832_v42  ;;  %v2082_v11 = vsel %vm8767_vm3, %v4615_v1, 0  ;;  %v4619_v53 = vpop.eup %4618  ;;  %4204 = vmatmul.mubr.msk.bf16.gmra.mrb[4].mxu0 %vm8770_vm13, %v4613_v36  ;;  %v8771_v17 = vld [vmem:[#allocation15_spill] sm:$0xff]  ;;  %v6749_v40 = vadd.f32 %v2334_v57, %v2208_v4  ;;  %vm8775_vm3 = vmmov %vm8769_vm12  ;;  %vm8778_vm13 = vcmp.ne.s16.totalorder %v5455_v49, 0 }
 0x24a   : > { %4620 = vpow.bf16 %v1910_v12  ;;  %4235 = vmatprep.mubr.msk.bf16.mxu1 %vm8769_vm12, %v4619_v53  ;;  %vm8772_vm1 = vcmp.ne.s16.totalorder %v8771_v17, 0  ;;  %v2218_v31 = vunpack.c.h.bf16 %v2082_v11  ;;  %v2084_v1 = vsel %vm8775_vm3, %v4619_v53, 0 }
 0x24b   : > { %4622 = vpow.bf16 %v1913_v14  ;;  %v2083_v12 = vsel %vm8772_vm1, %v4617_v34, 0  ;;  %8773 = vst [vmem:[#allocation58_spill] sm:$0xff] %v6749_v40  ;;  %vm8774_vm14 = vmmov %vm8772_vm1  ;;  %v2220_v41 = vunpack.c.h.bf16 %v2084_v1  ;;  %vm8777_vm12 = vcmp.ne.s16.totalorder %v5453_v47, 0 }
 0x24c   : > { %4624 = vpow.bf16 %v1916_v44  ;;  %4236 = vmatmul.mubr.msk.bf16.gmra.mrb[4].mxu1 %vm8774_vm14, %v4617_v34  ;;  %v2219_v14 = vunpack.c.h.bf16 %v2083_v12  ;;  %v2348_v42 = vadd.f32 %v2218_v31, %v2217_v30  ;;  %vm8779_vm1 = vmmov %vm8778_vm13  ;;  %vm8781_vm3 = vcmp.ne.s16.totalorder %v5457_v50, 0  ;;  %v6778_v50 = vld [vmem:[#allocation2 + $0xc0] sm:$0xff] }
 0x24d   : > { %4626 = vpow.bf16 %v1919_v37  ;;  %vm8780_vm14 = vmmov %vm8777_vm12  ;;  %v2213_v17 = vunpack.c.l.bf16 %v2081_v5  ;;  %v2214_v31 = vunpack.c.l.bf16 %v2082_v11  ;;  %v2211_v47 = vunpack.c.h.bf16 %v6721_v25  ;;  %8786 = vst [vmem:[#allocation10_spill] sm:$0xff] %v6778_v50 }
 0x24e   : > { %v2349_v28 = vadd.f32 %v2348_v42, %v2219_v14  ;;  %v2212_v5 = vunpack.c.h.bf16 %v6733_v9  ;;  %v2215_v11 = vunpack.c.l.bf16 %v2083_v12 }
 0x250   : > { %v6755_v44 = vadd.f32 %v2349_v28, %v2220_v41 }
 0x252   : > { %8776 = vst [vmem:[#allocation59_spill] sm:$0xff] %v6755_v44  ;;  %v8907_v44 = vld [vmem:[#allocation48_spill] sm:$0xff] }
 0x255   : > { %v4621_v36 = vpop.eup %4620 }
 0x256   : > { %v4623_v57 = vpop.eup %4622  ;;  %v2085_v37 = vsel %vm8777_vm12, %v4621_v36, 0  ;;  %vm8783_vm12 = vmmov %vm8782_vm0 }
 0x257   : > { %v4625_v4 = vpop.eup %4624  ;;  %4205 = vmatprep.mubr.msk.bf16.mxu0 %vm8778_vm13, %v4623_v57  ;;  %v2086_v34 = vsel %vm8779_vm1, %v4623_v57, 0  ;;  %v2225_v53 = vunpack.c.h.bf16 %v2085_v37  ;;  %vm8784_vm13 = vmmov %vm8781_vm3  ;;  %v2343_v57 = vadd.f32 %v2214_v31, %v2213_v17  ;;  %v2221_v13 = vunpack.c.l.bf16 %v2085_v37 }
 0x258   : > { %v4627_v30 = vpop.eup %4626  ;;  %4206 = vmatmul.mubr.msk.bf16.gmra.mrb[8].mxu0 %vm8780_vm14, %v4621_v36  ;;  %v2087_v27 = vsel %vm8781_vm3, %v4625_v4, 0  ;;  %v2226_v59 = vunpack.c.h.bf16 %v2086_v34  ;;  %v2339_v36 = vadd.f32 %v2338_v20, %v2211_v47  ;;  %v2222_v56 = vunpack.c.l.bf16 %v2086_v34  ;;  %v8790_v47 = vld [vmem:[#allocation60_spill] sm:$0xff] }
 0x259   : > { %4237 = vmatprep.mubr.msk.bf16.mxu1 %vm8782_vm0, %v4627_v30  ;;  %v2088_v14 = vsel %vm8783_vm12, %v4627_v30, 0  ;;  %v2227_v49 = vunpack.c.h.bf16 %v2087_v27  ;;  %v2344_v54 = vadd.f32 %v2343_v57, %v2215_v11  ;;  %v2223_v20 = vunpack.c.l.bf16 %v2087_v27 }
 0x25a   : > { %4238 = vmatmul.mubr.msk.bf16.gmra.mrb[8].mxu1 %vm8784_vm13, %v4625_v4  ;;  %v2358_v42 = vadd.f32 %v2226_v59, %v2225_v53  ;;  %v2228_v41 = vunpack.c.h.bf16 %v2088_v14  ;;  %v2340_v8 = vadd.f32 %v2339_v36, %v2212_v5  ;;  %v2353_v51 = vadd.f32 %v2222_v56, %v2221_v13  ;;  %v6780_v4 = vld [vmem:[#allocation2 + $0xc8] sm:$0xff] }
 0x25b   : > { %8787 = vst [vmem:[#allocation11_spill] sm:$0xff] %v6780_v4  ;;  %v2216_v59 = vunpack.c.l.bf16 %v2084_v1  ;;  %v2224_v27 = vunpack.c.l.bf16 %v2088_v14 }
 0x25c   : > { %v2359_v28 = vadd.f32 %v2358_v42, %v2227_v49  ;;  %v2354_v12 = vadd.f32 %v2353_v51, %v2223_v20  ;;  %v8797_v20 = vld [vmem:[#allocation21_spill] sm:$0xff] }
 0x25d   : > { %v2345_v9 = vadd.f32 %v2344_v54, %v2216_v59  ;;  %vm8798_vm0 = vcmp.ne.s16.totalorder %v8797_v20, 0 }
 0x25e   : > { %v6775_v52 = vadd.f32 %v2359_v28, %v2228_v41  ;;  %v2355_v17 = vadd.f32 %v2354_v12, %v2224_v27  ;;  %v8791_v28 = vld [vmem:[#allocation61_spill] sm:$0xff]  ;;  %vm8805_vm3 = vmmov %vm8798_vm0 }
 0x25f   : > { %v1549_v53 = vpop.xlane.xlu0 %1548 }
 0x260   : > { %8785 = vst [vmem:[#allocation9_spill] sm:$0xff] %v6775_v52  ;;  %v1589_v25 = vunpack.c.l.bf16 %v1549_v53  ;;  %v1590_v30 = vunpack.c.h.bf16 %v1549_v53 }
 0x262   : > { %v6783_v37 = vmax.f32 %v6778_v50, %v1589_v25  ;;  %v6786_v34 = vmax.f32 %v6780_v4, %v1590_v30  ;;  %v6808_v25 = vld [vmem:[#allocation2 + $0xe0] sm:$0xff]  ;;  %v6810_v30 = vld [vmem:[#allocation2 + $0xe8] sm:$0xff]  ;;  %v6978_v50 = vld [vmem:[#allocation2 + $0xf8] sm:$0xff] }
 0x263   : > { %8795 = vst [vmem:[#allocation14_spill] sm:$0xff] %v6808_v25  ;;  %8796 = vst [vmem:[#allocation16_spill] sm:$0xff] %v6810_v30 }
 0x264   : > { %2341 = vadd.xlane.f32.xlu0 %v2340_v8  ;;  %8788 = vst [vmem:[#allocation12_spill] sm:$0xff] %v6783_v37  ;;  %8789 = vst [vmem:[#allocation13_spill] sm:$0xff] %v6786_v34  ;;  %v1737_v1 = vpack.c.bf16 %v6786_v34, %v6783_v37  ;;  %v8792_v8 = vpack.c.bf16 %v6616_v10, %v6613_v2 }
 0x265   : > { %3449 = vst.msk [vmem:[#allocation2 + $0xc0] sm:$0xff] %vm2525_vm4, %v6783_v37  ;;  %3450 = vst.msk [vmem:[#allocation2 + $0xc8] sm:$0xff] %vm2525_vm4, %v6786_v34 }
 0x266   : > { %1803 = vperm.xlu1 %4555, %v1737_v1  }
 0x268   : > { %2346 = vadd.xlane.f32.xlu0 %v2345_v9 }
 0x26a   : > { %1808 = vperm.xlu1 %4555, %v8792_v8  }
 0x26b   : > { %v1759_v31 = vpop.permute.xlu0 %1758 }
 0x26c   : > { %v1833_v49 = vsub.bf16 %v5711_v38, %v1759_v31  ;;  %v1834_v42 = vsub.bf16 %v5715_v21, %v1759_v31  ;;  %v1835_v41 = vsub.bf16 %v8790_v47, %v1759_v31  ;;  %2356 = vadd.xlane.f32.xlu0 %v2355_v17  ;;  %v1836_v36 = vsub.bf16 %v8791_v28, %v1759_v31  ;;  %v8793_v21 = vld [vmem:[#allocation102_spill] sm:$0xff]  ;;  %v8803_v47 = vld [vmem:[#allocation104_spill] sm:$0xff] }
 0x26d   : > { %v8794_v51 = vsub.f32 %v6191_v26, %v8793_v21  ;;  %v8799_v17 = vld [vmem:[#allocation22_spill] sm:$0xff]  ;;  %8879 = vst [vmem:[#allocation104_spill] sm:$0xff] %v6978_v50 }
 0x26e   : > { %v1922_v57 = vmul.bf16 1069105081, %v1833_v49  ;;  %v1925_v5 = vmul.bf16 1069105081, %v1834_v42  ;;  %v1928_v11 = vmul.bf16 1069105081, %v1835_v41 }
 0x26f   : > { %v1931_v14 = vmul.bf16 1069105081, %v1836_v36  ;;  %v1663_v53 = vmul.f32 1.442695, %v8794_v51  ;;  %vm8800_vm1 = vcmp.ne.s16.totalorder %v8799_v17, 0  ;;  %v8802_v42 = vld [vmem:[#allocation103_spill] sm:$0xff] }
 0x270   : > { %4628 = vpow.bf16 %v1922_v57  ;;  %vm8801_vm14 = vmmov %vm8800_vm1  ;;  %v8804_v41 = vsub.f32 %v8802_v42, %v8803_v47  ;;  %v8806_v36 = vld [vmem:[#allocation23_spill] sm:$0xff] }
 0x271   : > { %4630 = vpow.bf16 %v1925_v5  ;;  %vm8807_vm12 = vcmp.ne.s16.totalorder %v8806_v36, 0 }
 0x272   : > { %4632 = vpow.bf16 %v1928_v11  ;;  %v1665_v28 = vmul.f32 1.442695, %v8804_v41 }
 0x273   : > { %4634 = vpow.bf16 %v1931_v14 }
 0x274   : > { %4636 = vpow2.f32 %v1663_v53 }
 0x275   : > { %4638 = vpow2.f32 %v1665_v28 }
 0x27b   : > { %v4629_v38 = vpop.eup %4628 }
 0x27c   : > { %v4631_v54 = vpop.eup %4630  ;;  %v2089_v9 = vsel %vm8798_vm0, %v4629_v38, 0 }
 0x27d   : > { %v4633_v12 = vpop.eup %4632  ;;  %4207 = vmatprep.mubr.msk.bf16.mxu0 %vm8800_vm1, %v4631_v54  ;;  %v2090_v31 = vsel %vm8801_vm14, %v4631_v54, 0  ;;  %v2229_v49 = vunpack.c.l.bf16 %v2089_v9  ;;  %v2233_v11 = vunpack.c.h.bf16 %v2089_v9  ;;  %v8810_v54 = vld [vmem:[#allocation24_spill] sm:$0xff]  ;;  %vm8815_vm1 = vmmov %vm8807_vm12 }
 0x27e   : > { %v1559_v59 = vpop.xlane.xlu1 %1558  ;;  %v4635_v26 = vpop.eup %4634  ;;  %4208 = vmatmul.mubr.msk.bf16.gmra.mrb[12].mxu0 %vm8805_vm3, %v4629_v38  ;;  %v2091_v57 = vsel %vm8807_vm12, %v4633_v12, 0  ;;  %v2230_v5 = vunpack.c.l.bf16 %v2090_v31  ;;  %vm8811_vm13 = vcmp.ne.s16.totalorder %v8810_v54, 0  ;;  %v2234_v51 = vunpack.c.h.bf16 %v2090_v31  ;;  %v8819_v54 = vld [vmem:[#allocation69_spill] sm:$0xff] }
 0x27f   : > { %v1593_v1 = vunpack.c.l.bf16 %v1559_v59  ;;  %v1594_v27 = vunpack.c.h.bf16 %v1559_v59  ;;  %4239 = vmatprep.mubr.msk.bf16.mxu1 %vm8811_vm13, %v4635_v26  ;;  %vm8812_vm0 = vmmov %vm8811_vm13  ;;  %v8813_v59 = vld [vmem:[#allocation105_spill] sm:$0xff]  ;;  %v2231_v9 = vunpack.c.l.bf16 %v2091_v57  ;;  %v2235_v18 = vunpack.c.h.bf16 %v2091_v57 }
 0x280   : > { %v2092_v21 = vsel %vm8812_vm0, %v4635_v26, 0  ;;  %v8814_v38 = vsub.f32 %v8813_v59, %v6268_v23  ;;  %4240 = vmatmul.mubr.msk.bf16.gmra.mrb[12].mxu1 %vm8815_vm1, %v4633_v12  ;;  %v2363_v42 = vadd.f32 %v2230_v5, %v2229_v49  ;;  %v8816_v23 = vld [vmem:[#allocation66_spill] sm:$0xff]  ;;  %v8817_v26 = vld [vmem:[#allocation67_spill] sm:$0xff]  ;;  %v8818_v12 = vld [vmem:[#allocation68_spill] sm:$0xff]  ;;  %v2368_v47 = vadd.f32 %v2234_v51, %v2233_v11 }
 0x281   : > { %v6826_v8 = vmax.f32 %v6808_v25, %v1593_v1  ;;  %v6829_v14 = vmax.f32 %v6810_v30, %v1594_v27  ;;  %v2232_v1 = vunpack.c.l.bf16 %v2092_v21  ;;  %v8824_v11 = vld [vmem:[#allocation110_spill] sm:$0xff] }
 0x282   : > { %v1673_v20 = vmul.f32 1.442695, %v8814_v38  ;;  %v1764_v17 = vpop.permute.xlu1 %1763  ;;  %v2364_v59 = vadd.f32 %v2363_v42, %v2231_v9  ;;  %v2236_v9 = vunpack.c.h.bf16 %v2092_v21  ;;  %v2369_v53 = vadd.f32 %v2368_v47, %v2235_v18  ;;  %v8823_v42 = vld [vmem:[#allocation108_spill] sm:$0xff]  ;;  %v8830_v21 = vld [vmem:[#allocation79_spill] sm:$0xff] }
 0x283   : > { %8808 = vst [vmem:[#allocation15_spill] sm:$0xff] %v6826_v8  ;;  %8809 = vst [vmem:[#allocation60_spill] sm:$0xff] %v6829_v14  ;;  %v1837_v31 = vsub.bf16 %v8816_v23, %v1764_v17  ;;  %v1838_v41 = vsub.bf16 %v8817_v26, %v1764_v17  ;;  %v1839_v36 = vsub.bf16 %v8818_v12, %v1764_v17  ;;  %v8820_v26 = vld [vmem:[#allocation70_spill] sm:$0xff]  ;;  %v8821_v12 = vld [vmem:[#allocation71_spill] sm:$0xff] }
 0x284   : > { %3453 = vst.msk [vmem:[#allocation2 + $0xe0] sm:$0xff] %vm2525_vm4, %v6826_v8  ;;  %3454 = vst.msk [vmem:[#allocation2 + $0xe8] sm:$0xff] %vm2525_vm4, %v6829_v14  ;;  %v1840_v49 = vsub.bf16 %v8819_v54, %v1764_v17  ;;  %v1739_v5 = vpack.c.bf16 %v6829_v14, %v6826_v8  ;;  %v2365_v56 = vadd.f32 %v2364_v59, %v2232_v1  ;;  %4640 = vpow2.f32 %v1673_v20  ;;  %v8822_v54 = vld [vmem:[#allocation73_spill] sm:$0xff]  ;;  %v8829_v59 = vld [vmem:[#allocation75_spill] sm:$0xff] }
 0x285   : > { %v1934_v38 = vmul.bf16 1069105081, %v1837_v31  ;;  %v1937_v13 = vmul.bf16 1069105081, %v1838_v41  ;;  %v1940_v23 = vmul.bf16 1069105081, %v1839_v36  ;;  %v8825_v28 = vsub.f32 %v8823_v42, %v8824_v11 }
 0x286   : > { %1813 = vperm.xlu1 %4555, %v1739_v5   ;;  %v1769_v27 = vpop.permute.xlu1 %1768  ;;  %v1943_v17 = vmul.bf16 1069105081, %v1840_v49  ;;  %2366 = vadd.xlane.f32.xlu0 %v2365_v56  ;;  %v8826_v31 = vld [vmem:[#allocation72_spill] sm:$0xff]  ;;  %v6861_v41 = vadd.f32 %v2369_v53, %v2236_v9  ;;  %v8828_v49 = vld [vmem:[#allocation74_spill] sm:$0xff]  ;;  %v8834_v9 = vld [vmem:[#allocation63_spill] sm:$0xff] }
 0x287   : > { %v1841_v30 = vsub.bf16 %v8820_v26, %v1769_v27  ;;  %v1842_v10 = vsub.bf16 %v8821_v12, %v1769_v27  ;;  %v1844_v58 = vsub.bf16 %v8822_v54, %v1769_v27  ;;  %v1669_v51 = vmul.f32 1.442695, %v8825_v28  ;;  %v8858_v8 = vld [vmem:[#allocation36_spill] sm:$0xff] }
 0x288   : > { %4642 = vpow.bf16 %v1934_v38  ;;  %v1843_v1 = vsub.bf16 %v8826_v31, %v1769_v27  ;;  %8827 = vst [vmem:[#allocation61_spill] sm:$0xff] %v6861_v41  ;;  %v8831_v38 = vld [vmem:[#allocation83_spill] sm:$0xff]  ;;  %v6867_v27 = vpop.eup %4636  ;;  %v8837_v31 = vld [vmem:[#allocation65_spill] sm:$0xff]  ;;  %vm8859_vm14 = vcmp.ne.s16.totalorder %v8858_v8, 0  ;;  %v8906_v41 = vsub.f32 %v8905_v61, %v6459_v55  ;;  %v8911_v61 = vld [vmem:[#allocation86_spill] sm:$0xff] }
 0x289   : > { %4644 = vpow.bf16 %v1937_v13  ;;  %v1949_v57 = vmul.bf16 1069105081, %v1842_v10  ;;  %v1946_v36 = vmul.bf16 1069105081, %v1841_v30  ;;  %v1955_v18 = vmul.bf16 1069105081, %v1844_v58  ;;  %v6871_v42 = vpop.eup %4638  ;;  %vm8870_vm0 = vmmov %vm8859_vm14 }
 0x28a   : > { %4646 = vpow.bf16 %v1940_v23  ;;  %v1952_v26 = vmul.bf16 1069105081, %v1843_v1  ;;  %8832 = vst [vmem:[#allocation102_spill] sm:$0xff] %v6867_v27  ;;  %v8833_v30 = vld [vmem:[#allocation62_spill] sm:$0xff]  ;;  %8835 = vst [vmem:[#allocation21_spill] sm:$0xff] %v6871_v42 }
 0x28b   : > { %4648 = vpow.bf16 %v1943_v17  ;;  %v8836_v17 = vld [vmem:[#allocation64_spill] sm:$0xff]  ;;  %v1685_v52 = vmul.f32 1.442695, %v8906_v41 }
 0x28c   : > { %v1774_v20 = vpop.permute.xlu1 %1773  ;;  %4650 = vpow2.f32 %v1669_v51  ;;  %v8912_v41 = vld [vmem:[#allocation20_spill] sm:$0xff] }
 0x28d   : > { %v1845_v5 = vsub.bf16 %v8828_v49, %v1774_v20  ;;  %v1846_v56 = vsub.bf16 %v8829_v59, %v1774_v20  ;;  %v1847_v47 = vsub.bf16 %v8830_v21, %v1774_v20  ;;  %v1848_v12 = vsub.bf16 %v8831_v38, %v1774_v20  ;;  %v8838_v49 = vld [vmem:[#allocation81_spill] sm:$0xff]  ;;  %v8839_v59 = vld [vmem:[#allocation82_spill] sm:$0xff] }
 0x28e   : > { %4652 = vpow.bf16 %v1949_v57  ;;  %v6874_v28 = vpop.eup %4640  ;;  %v8840_v21 = vld [vmem:[#allocation18_spill] sm:$0xff] }
 0x28f   : > { %v1958_v13 = vmul.bf16 1069105081, %v1845_v5  ;;  %4654 = vpow.bf16 %v1946_v36  ;;  %v1961_v23 = vmul.bf16 1069105081, %v1846_v56  ;;  %v1964_v58 = vmul.bf16 1069105081, %v1847_v47 }
 0x290   : > { %v1779_v10 = vpop.permute.xlu1 %1778  ;;  %4656 = vpow.bf16 %v1955_v18  ;;  %v1967_v51 = vmul.bf16 1069105081, %v1848_v12  ;;  %v8841_v12 = vld [vmem:[#allocation87_spill] sm:$0xff] }
 0x291   : > { %v1849_v54 = vsub.bf16 %v8833_v30, %v1779_v10  ;;  %v1850_v53 = vsub.bf16 %v8834_v9, %v1779_v10  ;;  %v1851_v11 = vsub.bf16 %v8836_v17, %v1779_v10  ;;  %4658 = vpow.bf16 %v1952_v26 }
 0x292   : > { %v1852_v1 = vsub.bf16 %v8837_v31, %v1779_v10  ;;  %4660 = vpow.bf16 %v1958_v13 }
 0x293   : > { %v1970_v57 = vmul.bf16 1069105081, %v1849_v54  ;;  %v1973_v20 = vmul.bf16 1069105081, %v1850_v53  ;;  %4662 = vpow.bf16 %v1961_v23  ;;  %v4643_v47 = vpop.eup %4642  ;;  %v1976_v38 = vmul.bf16 1069105081, %v1851_v11 }
 0x294   : > { %v1784_v36 = vpop.permute.xlu1 %1783  ;;  %4664 = vpow.bf16 %v1964_v58  ;;  %v4645_v30 = vpop.eup %4644  ;;  %v1979_v26 = vmul.bf16 1069105081, %v1852_v1  ;;  %v8845_v11 = vld [vmem:[#allocation39_spill] sm:$0xff]  ;;  %v6890_v1 = vsel %vm1341_vm6, %v4643_v47, 0 }
 0x295   : > { %v1853_v5 = vsub.bf16 %v8838_v49, %v1784_v36  ;;  %v1854_v56 = vsub.bf16 %v8839_v59, %v1784_v36  ;;  %v1855_v18 = vsub.bf16 %v8840_v21, %v1784_v36  ;;  %4666 = vpow.bf16 %v1967_v51  ;;  %v4647_v10 = vpop.eup %4646  ;;  %4209 = vmatprep.mubr.msk.bf16.mxu0 %vm1342_vm15, %v4645_v30  ;;  %v8849_v21 = vld [vmem:[#allocation90_spill] sm:$0xff] }
 0x296   : > { %v1856_v9 = vsub.bf16 %v8841_v12, %v1784_v36  ;;  %4668 = vpow.bf16 %v1970_v57  ;;  %v4649_v31 = vpop.eup %4648  ;;  %4210 = vmatmul.mubr.msk.bf16.gmra.mrb[16].mxu0 %vm1341_vm6, %v4643_v47  ;;  %v6894_v57 = vsel %vm1342_vm15, %v4645_v30, 0  ;;  %v8852_v30 = vld [vmem:[#allocation31_spill] sm:$0xff] }
 0x297   : > { %v1982_v13 = vmul.bf16 1069105081, %v1853_v5  ;;  %v1985_v54 = vmul.bf16 1069105081, %v1854_v56  ;;  %v1988_v53 = vmul.bf16 1069105081, %v1855_v18  ;;  %v6883_v49 = vpop.eup %4650  ;;  %4670 = vpow.bf16 %v1973_v20  ;;  %4241 = vmatprep.mubr.msk.bf16.mxu1 %vm1344_vm10, %v4649_v31 }
 0x298   : > { %v1794_v17 = vpop.permute.xlu1 %1793  ;;  %8843 = vst [vmem:[#allocation22_spill] sm:$0xff] %v6883_v49  ;;  %4672 = vpow.bf16 %v1976_v38  ;;  %v8847_v5 = vld [vmem:[#allocation44_spill] sm:$0xff]  ;;  %v8848_v20 = vld [vmem:[#allocation43_spill] sm:$0xff]  ;;  %v1991_v23 = vmul.bf16 1069105081, %v1856_v9  ;;  %vm8853_vm15 = vcmp.ne.s16.totalorder %v8852_v30, 0 }
 0x299   : > { %v1861_v51 = vsub.bf16 %v8845_v11, %v1794_v17  ;;  %v1862_v59 = vsub.bf16 %v8847_v5, %v1794_v17  ;;  %v1863_v56 = vsub.bf16 %v8848_v20, %v1794_v17  ;;  %v1864_v18 = vsub.bf16 %v8849_v21, %v1794_v17  ;;  %v4653_v12 = vpop.eup %4652  ;;  %v8850_v11 = vld [vmem:[#allocation114_spill] sm:$0xff]  ;;  %4242 = vmatmul.mubr.msk.bf16.gmra.mrb[16].mxu1 %vm8853_vm15, %v4647_v10  ;;  %vm8854_vm6 = vmmov %vm8853_vm15  ;;  %v8856_v9 = vld [vmem:[#allocation91_spill] sm:$0xff] }
 0x29a   : > { %v8851_v58 = vsub.f32 %v8850_v11, %v6363_v63  ;;  %4674 = vpow.bf16 %v1979_v26  ;;  %v6910_v38 = vsel %vm8854_vm6, %v4647_v10, 0  ;;  %v4655_v5 = vpop.eup %4654  ;;  %4211 = vmatprep.mubr.msk.bf16.mxu0 %vm1346_vm2, %v4653_v12  ;;  %v2237_v63 = vunpack.c.l.bf16 %v6890_v1 }
 0x29b   : > { %4676 = vpow.bf16 %v1982_v13  ;;  %v2006_v20 = vmul.bf16 1069105081, %v1861_v51  ;;  %v2238_v21 = vunpack.c.l.bf16 %v6894_v57  ;;  %v4657_v26 = vpop.eup %4656  ;;  %v6920_v10 = vsel %vm1344_vm10, %v4649_v31, 0 }
 0x29c   : > { %v6904_v47 = vmul.f32 1.442695, %v8851_v58  ;;  %v1799_v17 = vpop.permute.xlu1 %1798  ;;  %4678 = vpow.bf16 %v1985_v54  ;;  %v8857_v58 = vld [vmem:[#allocation92_spill] sm:$0xff]  ;;  %v4659_v13 = vpop.eup %4658  ;;  %v2009_v51 = vmul.bf16 1069105081, %v1862_v59  ;;  %4243 = vmatprep.mubr.msk.bf16.mxu1 %vm8859_vm14, %v4657_v26  ;;  %v2240_v31 = vunpack.c.l.bf16 %v6920_v10 }
 0x29d   : > { %v1865_v11 = vsub.bf16 %v8856_v9, %v1799_v17  ;;  %v1866_v34 = vsub.bf16 %v8857_v58, %v1799_v17  ;;  %4680 = vpow.bf16 %v1988_v53  ;;  %v2012_v30 = vmul.bf16 1069105081, %v1863_v56  ;;  %v4661_v25 = vpop.eup %4660  ;;  %v8862_v53 = vld [vmem:[#allocation33_spill] sm:$0xff] }
 0x29e   : > { %v2015_v4 = vmul.bf16 1069105081, %v1864_v18  ;;  %4682 = vpow.bf16 %v1991_v23  ;;  %v1867_v54 = vsub.bf16 %v8860_v33, %v1799_v17  ;;  %v1868_v9 = vsub.bf16 %v8861_v7, %v1799_v17  ;;  %v4663_v2 = vpop.eup %4662  ;;  %v8865_v33 = vld [vmem:[#allocation35_spill] sm:$0xff] }
 0x29f   : > { %v2239_v58 = vunpack.c.l.bf16 %v6910_v38  ;;  %4684 = vpow.bf16 %v2006_v20  ;;  %v2373_v36 = vadd.f32 %v2238_v21, %v2237_v63  ;;  %vm8863_vm10 = vcmp.ne.s16.totalorder %v8862_v53, 0  ;;  %v4665_v56 = vpop.eup %4664  ;;  %v8867_v63 = vld [vmem:[#allocation38_spill] sm:$0xff] }
 0x2a0   : > { %v6930_v59 = vsel %vm8863_vm10, %v4655_v5, 0  ;;  %v2018_v18 = vmul.bf16 1069105081, %v1865_v11  ;;  %v6932_v15 = vmul.bf16 1069105081, %v1866_v34  ;;  %vm8864_vm3 = vmmov %vm8863_vm10  ;;  %v6938_v7 = vsel %vm1346_vm2, %v4653_v12, 0  ;;  %v4667_v20 = vpop.eup %4666 }
 0x2a1   : > { %4212 = vmatmul.mubr.msk.bf16.gmra.mrb[20].mxu0 %vm8864_vm3, %v4655_v5  ;;  %vm8866_vm12 = vcmp.ne.s16.totalorder %v8865_v33, 0  ;;  %4686 = vpow.bf16 %v2009_v51  ;;  %v2374_v17 = vadd.f32 %v2373_v36, %v2239_v58  ;;  %vm8868_vm13 = vcmp.ne.s16.totalorder %v8867_v63, 0  ;;  %v6948_v11 = vpop.eup %4668  ;;  %v8871_v5 = vld [vmem:[#allocation37_spill] sm:$0xff]  ;;  %v8873_v53 = vld [vmem:[#allocation42_spill] sm:$0xff]  ;;  %v6976_v63 = vld [vmem:[#allocation2 + $0xf0] sm:$0xff] }
 0x2a2   : > { %v6942_v23 = vsel %vm8866_vm12, %v4659_v13, 0  ;;  %4213 = vmatprep.mubr.msk.bf16.mxu0 %vm8868_vm13, %v4663_v2  ;;  %v2245_v34 = vunpack.c.l.bf16 %v6930_v59  ;;  %v2246_v21 = vunpack.c.l.bf16 %v6938_v7  ;;  %4688 = vpow.bf16 %v2012_v30  ;;  %vm8869_vm2 = vmmov %vm8866_vm12  ;;  %v4671_v58 = vpop.eup %4670  ;;  %v8876_v33 = vld [vmem:[#allocation41_spill] sm:$0xff]  ;;  %8878 = vst [vmem:[#allocation103_spill] sm:$0xff] %v6976_v63 }
 0x2a3   : > { %v2024_v14 = vmul.bf16 1069105081, %v1867_v54  ;;  %4244 = vmatmul.mubr.msk.bf16.gmra.mrb[20].mxu1 %vm8869_vm2, %v4659_v13  ;;  %v6954_v12 = vsel %vm8870_vm0, %v4657_v26, 0  ;;  %vm8872_vm1 = vcmp.ne.s16.totalorder %v8871_v5, 0  ;;  %v2375_v36 = vadd.f32 %v2374_v17, %v2240_v31  ;;  %vm8875_vm6 = vmmov %vm8868_vm13  ;;  %v1564_v13 = vpop.xlane.xlu0 %1563  ;;  %v6967_v8 = vpop.eup %4672 }
 0x2a4   : > { %v6958_v51 = vsel %vm8872_vm1, %v4661_v25, 0  ;;  %vm8874_vm15 = vcmp.ne.s16.totalorder %v8873_v53, 0  ;;  %v2247_v48 = vunpack.c.l.bf16 %v6942_v23  ;;  %v2383_v30 = vadd.f32 %v2246_v21, %v2245_v34  ;;  %vm8885_vm13 = vmmov %vm8872_vm1 }
 0x2a5   : > { %4245 = vmatprep.mubr.msk.bf16.mxu1 %vm8874_vm15, %v4667_v20  ;;  %v6965_v54 = vsel %vm8875_vm6, %v4663_v2, 0  ;;  %4690 = vpow.bf16 %v2015_v4  ;;  %v2027_v26 = vmul.bf16 1069105081, %v1868_v9  ;;  %vm8877_vm14 = vcmp.ne.s16.totalorder %v8876_v33, 0  ;;  %v4675_v17 = vpop.eup %4674  ;;  %2376 = vadd.xlane.f32.xlu0 %v2375_v36  ;;  %vm8880_vm10 = vmmov %vm8874_vm15 }
 0x2a6   : > { %v6971_v37 = vsel %vm8877_vm14, %v4665_v56, 0  ;;  %v2253_v31 = vunpack.c.l.bf16 %v6958_v51  ;;  %4692 = vpow.bf16 %v2018_v18  ;;  %v2248_v34 = vunpack.c.l.bf16 %v6954_v12  ;;  %v6980_v4 = vpop.eup %4676  ;;  %v8881_v18 = vld [vmem:[#allocation25_spill] sm:$0xff]  ;;  %vm8893_vm15 = vmmov %vm8877_vm14 }
 0x2a7   : > { %v2384_v21 = vadd.f32 %v2383_v30, %v2247_v48  ;;  %v2254_v2 = vunpack.c.l.bf16 %v6965_v54  ;;  %v6984_v9 = vsel %vm8880_vm10, %v4667_v20, 0  ;;  %v1595_v35 = vunpack.c.l.bf16 %v1564_v13  ;;  %v4679_v48 = vpop.eup %4678 }
 0x2a8   : > { %v1596_v6 = vunpack.c.h.bf16 %v1564_v13  ;;  %vm8882_vm3 = vcmp.ne.s16.totalorder %v8881_v18, 0  ;;  %v2255_v29 = vunpack.c.l.bf16 %v6971_v37  ;;  %vm8884_vm12 = vcmp.ne.s16.totalorder %v8883_v62, 0  ;;  %v6996_v46 = vpop.eup %4680  ;;  %v8888_v13 = vld [vmem:[#allocation27_spill] sm:$0xff]  ;;  %v8894_v62 = vld [vmem:[#allocation45_spill] sm:$0xff] }
 0x2a9   : > { %v6989_v36 = vsel %vm8882_vm3, %v6948_v11, 0  ;;  %v2385_v30 = vadd.f32 %v2384_v21, %v2248_v34  ;;  %v2393_v22 = vadd.f32 %v2254_v2, %v2253_v31  ;;  %v6994_v24 = vsel %vm8884_vm12, %v4671_v58, 0  ;;  %4214 = vmatmul.mubr.msk.bf16.gmra.mrb[24].mxu0 %vm8885_vm13, %v4661_v25  ;;  %v4683_v21 = vpop.eup %4682  ;;  %vm8890_vm0 = vmmov %vm8884_vm12 }
 0x2aa   : > { %v7001_v20 = vmax.f32 %v6976_v63, %v1595_v35  ;;  %v7004_v53 = vmax.f32 %v6978_v50, %v1596_v6  ;;  %vm8889_vm2 = vcmp.ne.s16.totalorder %v8888_v13, 0  ;;  %v2261_v31 = vunpack.c.l.bf16 %v6989_v36  ;;  %4215 = vmatprep.mubr.msk.bf16.mxu0 %vm8890_vm0, %v4671_v58  ;;  %v8891_v35 = vld [vmem:[#allocation28_spill] sm:$0xff]  ;;  %v7020_v5 = vpop.eup %4684  ;;  %v8896_v58 = vld [vmem:[#allocation46_spill] sm:$0xff]  ;;  %v8899_v63 = vld [vmem:[#allocation47_spill] sm:$0xff] }
 0x2ab   : > { %v7009_v34 = vsel %vm8889_vm2, %v6967_v8, 0  ;;  %2386 = vadd.xlane.f32.xlu0 %v2385_v30  ;;  %v2256_v2 = vunpack.c.l.bf16 %v6984_v9  ;;  %v2394_v60 = vadd.f32 %v2393_v22, %v2255_v29  ;;  %vm8892_vm1 = vcmp.ne.s16.totalorder %v8891_v35, 0  ;;  %4246 = vmatmul.mubr.msk.bf16.gmra.mrb[24].mxu1 %vm8893_vm15, %v4665_v56  ;;  %v1789_v35 = vpop.permute.xlu0 %1788 }
 0x2ac   : > { %8886 = vst [vmem:[#allocation23_spill] sm:$0xff] %v7001_v20  ;;  %8887 = vst [vmem:[#allocation24_spill] sm:$0xff] %v7004_v53  ;;  %v7017_v25 = vsel %vm8892_vm1, %v4675_v17, 0  ;;  %v2262_v6 = vunpack.c.l.bf16 %v6994_v24  ;;  %vm8895_vm6 = vcmp.ne.s16.totalorder %v8894_v62, 0  ;;  %vm8897_vm14 = vcmp.ne.s16.totalorder %v8896_v58, 0  ;;  %v7045_v50 = vpop.eup %4686 }
 0x2ad   : > { %3455 = vst.msk [vmem:[#allocation2 + $0xf0] sm:$0xff] %vm2525_vm4, %v7001_v20  ;;  %3456 = vst.msk [vmem:[#allocation2 + $0xf8] sm:$0xff] %vm2525_vm4, %v7004_v53  ;;  %v7035_v29 = vsel %vm8895_vm6, %v6980_v4, 0  ;;  %v7039_v56 = vsel %vm8897_vm14, %v4679_v48, 0  ;;  %4694 = vpow.bf16 %v6932_v15  ;;  %v2395_v33 = vadd.f32 %v2394_v60, %v2256_v2  ;;  %v7054_v15 = vpop.eup %4688  ;;  %v8901_v60 = vld [vmem:[#allocation115_spill] sm:$0xff] }
 0x2ae   : > { %vm8898_vm10 = vmmov %vm8892_vm1  ;;  %v2263_v22 = vunpack.c.l.bf16 %v7009_v34  ;;  %v2403_v30 = vadd.f32 %v2262_v6, %v2261_v31  ;;  %4696 = vpow.bf16 %v2024_v14  ;;  %vm8900_vm3 = vcmp.ne.s16.totalorder %v8899_v63, 0  ;;  %v8903_v6 = vld [vmem:[#allocation118_spill] sm:$0xff]  ;;  %v8931_v63 = vld [vmem:[#allocation88_spill] sm:$0xff] }
 0x2af   : > { %4247 = vmatprep.mubr.msk.bf16.mxu1 %vm8898_vm10, %v4675_v17  ;;  %v7050_v0 = vsel %vm8900_vm3, %v6996_v46, 0  ;;  %v2269_v19 = vunpack.c.l.bf16 %v7035_v29  ;;  %v2270_v39 = vunpack.c.l.bf16 %v7039_v56  ;;  %v8902_v17 = vsub.f32 %v8901_v60, %v6394_v3  ;;  %2396 = vadd.xlane.f32.xlu0 %v2395_v33  ;;  %vm8914_vm2 = vmmov %vm8897_vm14 }
 0x2b0   : > { %4698 = vpow.bf16 %v2027_v26  ;;  %v2264_v31 = vunpack.c.l.bf16 %v7017_v25  ;;  %v2404_v14 = vadd.f32 %v2403_v30, %v2263_v22  ;;  %v8904_v16 = vsub.f32 %v8903_v6, %v6431_v32  ;;  %v7071_v26 = vpop.eup %4690  ;;  %v8910_v32 = vld [vmem:[#allocation85_spill] sm:$0xff]  ;;  %v8913_v6 = vld [vmem:[#allocation40_spill] sm:$0xff]  ;;  %vm8924_vm15 = vmmov %vm8895_vm6 }
 0x2b1   : > { %v1677_v2 = vmul.f32 1.442695, %v8902_v17  ;;  %4700 = vpow2.f32 %v6904_v47  ;;  %vm8908_vm12 = vcmp.ne.s16.totalorder %v8907_v44, 0  ;;  %v2271_v30 = vunpack.c.l.bf16 %v7050_v0  ;;  %v7076_v60 = vpop.eup %4692  ;;  %vm8929_vm10 = vmmov %vm8900_vm3 }
 0x2b2   : > { %v1681_v43 = vmul.f32 1.442695, %v8904_v16  ;;  %v7069_v3 = vsel %vm8908_vm12, %v4683_v21, 0  ;;  %v2405_v33 = vadd.f32 %v2404_v14, %v2264_v31  ;;  %v2413_v22 = vadd.f32 %v2270_v39, %v2269_v19  ;;  %vm8917_vm1 = vmmov %vm8908_vm12 }
 0x2b3   : > { %v1740_v47 = vpack.c.bf16 %v7004_v53, %v7001_v20  ;;  %vm8909_vm13 = vcmp.ne.s16.totalorder %v8881_v18, 0  ;;  %v1857_v55 = vsub.bf16 %v8910_v32, %v1789_v35  ;;  %v1858_v16 = vsub.bf16 %v8911_v61, %v1789_v35 }
 0x2b4   : > { %4216 = vmatmul.mubr.msk.bf16.gmra.mrb[28].mxu0 %vm8909_vm13, %v6948_v11  ;;  %v1859_v17 = vsub.bf16 %v8912_v41, %v1789_v35  ;;  %v1860_v31 = vsub.bf16 %v8913_v6, %v1789_v35  ;;  %4702 = vpow2.f32 %v1677_v2  ;;  %2406 = vadd.xlane.f32.xlu0 %v2405_v33  ;;  %v2272_v19 = vunpack.c.l.bf16 %v7069_v3 }
 0x2b5   : > { %v2414_v39 = vadd.f32 %v2413_v22, %v2271_v30  ;;  %4217 = vmatprep.mubr.msk.bf16.mxu0 %vm8914_vm2, %v4679_v48  ;;  %v7091_v11 = vsel %vm1365_vm7, %v7020_v5, 0  ;;  %4704 = vpow2.f32 %v1681_v43  ;;  %vm8916_vm0 = vcmp.ne.s16.totalorder %v8888_v13, 0  ;;  %1818 = vperm.xlu1 %4555, %v1740_v47   ;;  %v8921_v22 = vld [vmem:[#allocation126_spill] sm:$0xff] }
 0x2b6   : > { %4248 = vmatmul.mubr.msk.bf16.gmra.mrb[28].mxu1 %vm8916_vm0, %v6967_v8  ;;  %v1994_v18 = vmul.bf16 1069105081, %v1857_v55  ;;  %v1997_v2 = vmul.bf16 1069105081, %v1858_v16  ;;  %v2000_v35 = vmul.bf16 1069105081, %v1859_v17  ;;  %4706 = vpow2.f32 %v1685_v52 }
 0x2b7   : > { %v2415_v33 = vadd.f32 %v2414_v39, %v2272_v19  ;;  %4249 = vmatprep.mubr.msk.bf16.mxu1 %vm8917_vm1, %v4683_v21  ;;  %v2003_v48 = vmul.bf16 1069105081, %v1860_v31  ;;  %v7101_v30 = vsel %vm1366_vm9, %v7045_v50, 0  ;;  %v2285_v43 = vunpack.c.l.bf16 %v7091_v11  ;;  %v8955_v52 = vld [vmem:[#allocation17_spill] sm:$0xff] }
 0x2b8   : > { %4708 = vpow.bf16 %v1994_v18  ;;  %v2286_v8 = vunpack.c.l.bf16 %v7101_v30  ;;  %v7105_v13 = vpop.eup %4694  ;;  %v7111_v44 = vsel %vm1367_vm5, %v7054_v15, 0  ;;  %v8922_v47 = vsub.f32 %v8921_v22, %v6493_v45  ;;  %v8925_v18 = vld [vmem:[#allocation17_spill] sm:$0xff] }
 0x2b9   : > { %2416 = vadd.xlane.f32.xlu0 %v2415_v33  ;;  %4710 = vpow.bf16 %v1997_v2  ;;  %2597 = vperm.xlu1 %4555, %v6867_v27   ;;  %v7113_v21 = vpop.eup %4696  ;;  %v7123_v61 = vsel %vm1368_vm8, %v7071_v26, 0  ;;  %v2287_v39 = vunpack.c.l.bf16 %v7111_v44  ;;  %vm8926_vm6 = vcmp.ne.s16.totalorder %v8925_v18, 0 }
 0x2ba   : > { %4712 = vpow.bf16 %v2000_v35  ;;  %8920 = vst [vmem:[#allocation105_spill] sm:$0xff] %v7113_v21  ;;  %v7118_v32 = vmul.f32 1.442695, %v8922_v47  ;;  %v2433_v45 = vadd.f32 %v2286_v8, %v2285_v43  ;;  %v7140_v2 = vsel %vm8926_vm6, %v7076_v60, 0  ;;  %v8927_v35 = vld [vmem:[#allocation84_spill] sm:$0xff] }
 0x2bb   : > { %4714 = vpow.bf16 %v2003_v48  ;;  %v7125_v16 = vpop.eup %4698  ;;  %vm8928_vm14 = vcmp.ne.s16.totalorder %v8927_v35, 0  ;;  %v7160_v47 = vsel %vm1371_vm11, %v7113_v21, 0  ;;  %vm8932_vm3 = vcmp.ne.s16.totalorder %v8931_v63, 0 }
 0x2bc   : > { %v7127_v41 = vpop.eup %4700  ;;  %4218 = vmatmul.mubr.msk.bf16.gmra.mrb[32].mxu0 %vm8924_vm15, %v6980_v4  ;;  %v7145_v33 = vsel %vm8928_vm14, %v7105_v13, 0  ;;  %v2241_v19 = vunpack.c.h.bf16 %v6890_v1  ;;  %v2242_v31 = vunpack.c.h.bf16 %v6894_v57  ;;  %v7171_v48 = vadd.f32 %v2433_v45, %v2287_v39 }
 0x2bd   : > { %2602 = vperm.xlu1 %4555, %v6871_v42   ;;  %v2293_v43 = vunpack.c.l.bf16 %v7140_v2  ;;  %v2294_v4 = vunpack.c.l.bf16 %v7145_v33  ;;  %v2249_v6 = vunpack.c.h.bf16 %v6930_v59  ;;  %v2297_v53 = vunpack.c.h.bf16 %v7140_v2 }
 0x2be   : > { %4250 = vmatmul.mubr.msk.bf16.gmra.mrb[32].mxu1 %vm8929_vm10, %v6996_v46  ;;  %v7155_v8 = vpop.eup %4702  ;;  %v7165_v46 = vsel %vm8932_vm3, %v7125_v16, 0  ;;  %v2243_v20 = vunpack.c.h.bf16 %v6910_v38  ;;  %v2378_v40 = vadd.f32 %v2242_v31, %v2241_v19  ;;  %v2250_v1 = vunpack.c.h.bf16 %v6938_v7  ;;  %v8933_v19 = vld [vmem:[#allocation49_spill] sm:$0xff] }
 0x2bf   : > { %v7169_v62 = vpop.eup %4704  ;;  %v2298_v57 = vunpack.c.h.bf16 %v7145_v33  ;;  %v2299_v45 = vunpack.c.h.bf16 %v7160_v47  ;;  %v2257_v39 = vunpack.c.h.bf16 %v6958_v51  ;;  %v2258_v42 = vunpack.c.h.bf16 %v6965_v54  ;;  %v8935_v51 = vld [vmem:[#allocation50_spill] sm:$0xff] }
 0x2c0   : > { %v7176_v17 = vpop.eup %4706  ;;  %v2244_v27 = vunpack.c.h.bf16 %v6920_v10  ;;  %v2379_v22 = vadd.f32 %v2378_v40, %v2243_v20  ;;  %v2251_v2 = vunpack.c.h.bf16 %v6942_v23  ;;  %v2388_v38 = vadd.f32 %v2250_v1, %v2249_v6 }
 0x2c1   : > { %2612 = vperm.xlu1 %4555, %v6883_v49   ;;  %vm8934_vm12 = vcmp.ne.s16.totalorder %v8933_v19, 0  ;;  %v2252_v49 = vunpack.c.h.bf16 %v6954_v12  ;;  %v2259_v33 = vunpack.c.h.bf16 %v6971_v37  ;;  %v2398_v21 = vadd.f32 %v2258_v42, %v2257_v39  ;;  %v8939_v12 = vld [vmem:[#allocation51_spill] sm:$0xff]  ;;  %v8941_v39 = vld [vmem:[#allocation52_spill] sm:$0xff] }
 0x2c2   : > { %vm8936_vm13 = vcmp.ne.s16.totalorder %v8935_v51, 0  ;;  %v7196_v23 = vadd.f32 %v2379_v22, %v2244_v27  ;;  %vm8938_vm0 = vmmov %vm8934_vm12  ;;  %vm8940_vm1 = vcmp.ne.s16.totalorder %v8939_v12, 0  ;;  %v2389_v1 = vadd.f32 %v2388_v38, %v2251_v2 }
 0x2c3   : > { %v4709_v59 = vpop.eup %4708  ;;  %vm8937_vm2 = vmmov %vm8936_vm13  ;;  %vm8942_vm15 = vcmp.ne.s16.totalorder %v8941_v39, 0  ;;  %v2260_v22 = vunpack.c.h.bf16 %v6984_v9  ;;  %v2300_v38 = vunpack.c.h.bf16 %v7165_v46  ;;  %v2266_v9 = vunpack.c.h.bf16 %v6994_v24 }
 0x2c4   : > { %v4711_v31 = vpop.eup %4710  ;;  %v2113_v7 = vsel %vm8934_vm12, %v4709_v59, 0  ;;  %vm8943_vm6 = vmmov %vm8942_vm15  ;;  %v7218_v58 = vadd.f32 %v2389_v1, %v2252_v49  ;;  %4716 = vpow2.f32 %v7118_v32  ;;  %v8953_v14 = vunpack.c.h.bf16 %v7123_v61 }
 0x2c5   : > { %v4713_v18 = vpop.eup %4712  ;;  %4219 = vmatprep.mubr.msk.bf16.mxu0 %vm8936_vm13, %v4711_v31  ;;  %v2114_v10 = vsel %vm8937_vm2, %v4711_v31, 0  ;;  %v2277_v40 = vunpack.c.l.bf16 %v2113_v7  ;;  %v2281_v54 = vunpack.c.h.bf16 %v2113_v7  ;;  %2622 = vperm.xlu1 %4555, %v6874_v28   ;;  %v2399_v31 = vadd.f32 %v2398_v21, %v2259_v33  ;;  %vm8944_vm14 = vmmov %vm8940_vm1 }
 0x2c6   : > { %v4715_v20 = vpop.eup %4714  ;;  %4220 = vmatmul.mubr.msk.bf16.gmra.mrb[36].mxu0 %vm8938_vm0, %v4709_v59  ;;  %v2115_v37 = vsel %vm8940_vm1, %v4713_v18, 0  ;;  %v2278_v42 = vunpack.c.l.bf16 %v2114_v10  ;;  %v2282_v6 = vunpack.c.h.bf16 %v2114_v10  ;;  %v2265_v59 = vunpack.c.h.bf16 %v6989_v36  ;;  %v7223_v36 = vpop.permute.xlu0 %2592 }
 0x2c7   : > { %4251 = vmatprep.mubr.msk.bf16.mxu1 %vm8942_vm15, %v4715_v20  ;;  %4221 = vmatprep.mubr.msk.bf16.mxu0 %vm1366_vm9, %v7045_v50  ;;  %v2116_v27 = vsel %vm8943_vm6, %v4715_v20, 0  ;;  %v2279_v19 = vunpack.c.l.bf16 %v2115_v37  ;;  %v2443_v7 = vadd.f32 %v2294_v4, %v2293_v43  ;;  %v2283_v50 = vunpack.c.h.bf16 %v2115_v37 }
 0x2c8   : > { %4252 = vmatmul.mubr.msk.bf16.gmra.mrb[36].mxu1 %vm8944_vm14, %v4713_v18  ;;  %v2423_v2 = vadd.f32 %v2278_v42, %v2277_v40  ;;  %v7220_v51 = vadd.f32 %v2399_v31, %v2260_v22  ;;  %v2280_v21 = vunpack.c.l.bf16 %v2116_v27  ;;  %v8945_v33 = vunpack.c.h.bf16 %v7035_v29  ;;  %v8959_v31 = vld [vmem:[#allocation111_spill] sm:$0xff] }
 0x2c9   : > { %4253 = vmatprep.mubr.msk.bf16.mxu1 %vm1368_vm8, %v7071_v26  ;;  %2632 = vperm.xlu1 %4555, %v7155_v8   ;;  %v8946_v4 = vunpack.c.h.bf16 %v7039_v56  ;;  %v2428_v55 = vadd.f32 %v2282_v6, %v2281_v54  ;;  %v2267_v26 = vunpack.c.h.bf16 %v7009_v34  ;;  %v2408_v49 = vadd.f32 %v2266_v9, %v2265_v59  ;;  %v8960_v59 = vld [vmem:[#allocation112_spill] sm:$0xff]  ;;  %v2142_v9 = vld [vmem:[#allocation3 + $0x8] sm:$0xff] }
 0x2ca   : > { %v2424_v18 = vadd.f32 %v2423_v2, %v2279_v19  ;;  %v8947_v10 = vunpack.c.h.bf16 %v7091_v11  ;;  %v8948_v40 = vunpack.c.h.bf16 %v7101_v30  ;;  %v2448_v20 = vadd.f32 %v2298_v57, %v2297_v53  ;;  %v8961_v2 = vld [vmem:[#allocation116_spill] sm:$0xff] }
 0x2cb   : > { %v2418_v43 = vadd.f32 %v8946_v4, %v8945_v33  ;;  %v2284_v12 = vunpack.c.h.bf16 %v2116_v27  ;;  %v8949_v42 = vunpack.c.h.bf16 %v7050_v0  ;;  %v2429_v39 = vadd.f32 %v2428_v55, %v2283_v50 }
 0x2cc   : > { %v2438_v24 = vadd.f32 %v8948_v40, %v8947_v10  ;;  %v2425_v37 = vadd.f32 %v2424_v18, %v2280_v21  ;;  %v2268_v29 = vunpack.c.h.bf16 %v7017_v25  ;;  %v2409_v56 = vadd.f32 %v2408_v49, %v2267_v26  ;;  %v8963_v26 = vld [vmem:[#allocation96_spill] sm:$0xff]  ;;  %v8964_v10 = vld [vmem:[#allocation97_spill] sm:$0xff] }
 0x2cd   : > { %v2419_v1 = vadd.f32 %v2418_v43, %v8949_v42  ;;  %v8950_v54 = vunpack.c.h.bf16 %v7111_v44  ;;  %v2449_v34 = vadd.f32 %v2448_v20, %v2299_v45  ;;  %2642 = vperm.xlu1 %4555, %v7169_v62   ;;  %v2288_v53 = vunpack.c.l.bf16 %v7123_v61  ;;  %v8967_v42 = vld [vmem:[#allocation102_spill] sm:$0xff] }
 0x2ce   : > { %4222 = vmatmul.mubr.msk.bf16.gmra.mrb[40].mxu0 %vm1365_vm7, %v7020_v5  ;;  %v8951_v0 = vunpack.c.h.bf16 %v7069_v3  ;;  %v7250_v25 = vadd.f32 %v2429_v39, %v2284_v12  ;;  %2426 = vadd.xlane.f32.xlu0 %v2425_v37  ;;  %vm8952_vm9 = vcmp.ne.s16.totalorder %v8927_v35, 0  ;;  %v2295_v30 = vunpack.c.l.bf16 %v7160_v47  ;;  %v7264_v3 = vpop.permute.xlu0 %2607  ;;  %vm8954_vm7 = vmmov %vm8932_vm3  ;;  %v8966_v12 = vld [vmem:[#allocation101_spill] sm:$0xff] }
 0x2cf   : > { %v2439_v6 = vadd.f32 %v2438_v24, %v8950_v54  ;;  %4223 = vmatprep.mubr.msk.bf16.mxu0 %vm8952_vm9, %v7105_v13  ;;  %v7256_v44 = vadd.f32 %v2409_v56, %v2268_v29  ;;  %v7262_v32 = vadd.f32 %v2449_v34, %v2300_v38  ;;  %v2435_v13 = vadd.f32 %v7171_v48, %v2288_v53  ;;  %v8965_v24 = vld [vmem:[#allocation100_spill] sm:$0xff]  ;;  %v2143_v34 = vld [vmem:[#allocation3 + $0x10] sm:$0xff] }
 0x2d0   : > { %v7248_v11 = vadd.f32 %v2419_v1, %v8951_v0  ;;  %4254 = vmatmul.mubr.msk.bf16.gmra.mrb[40].mxu1 %vm1367_vm5, %v7054_v15  ;;  %v2444_v35 = vadd.f32 %v2443_v7, %v2295_v30  ;;  %v2296_v61 = vunpack.c.l.bf16 %v7165_v46  ;;  %vm8956_vm5 = vcmp.ne.s16.totalorder %v8955_v52, 0  ;;  %v7281_v15 = vpop.eup %4716  ;;  %v8962_v7 = vld [vmem:[#allocation117_spill] sm:$0xff] }
 0x2d1   : > { %v7260_v5 = vadd.f32 %v2439_v6, %v8953_v14  ;;  %4255 = vmatprep.mubr.msk.bf16.mxu1 %vm8954_vm7, %v7125_v16  ;;  %2652 = vperm.xlu1 %4555, %v7176_v17   ;;  %v8957_v16 = vld [vmem:[#allocation105_spill] sm:$0xff]  ;;  %v2174_v1 = vmul.f32 %v8967_v42, %v2142_v9 }
 0x2d2   : > { %2436 = vadd.xlane.f32.xlu0 %v2435_v13  ;;  %v2445_v47 = vadd.f32 %v2444_v35, %v2296_v61  ;;  %v7275_v57 = vpop.permute.xlu0 %2617  ;;  %v8968_v0 = vld [vmem:[#allocation21_spill] sm:$0xff]  ;;  %v8969_v61 = vld [vmem:[#allocation58_spill] sm:$0xff] }
 0x2d3   : > { %v2175_v30 = vmul.f32 %v8968_v0, %v2143_v34  ;;  %v2145_v13 = vld [vmem:[#allocation3 + $0x20] sm:$0xff]  ;;  %v8992_v0 = vld [vmem:[#allocation98_spill] sm:$0xff] }
 0x2d4   : > { %v8987_v42 = vld [vmem:[#allocation93_spill] sm:$0xff]  ;;  %vm8993_vm9 = vcmp.ne.s16.totalorder %v8992_v0, 0 }
 0x2d5   : > { %2662 = vperm.xlu1 %4555, %v7127_v41   ;;  %vm8988_vm15 = vcmp.ne.s16.totalorder %v8987_v42, 0  ;;  %vm8994_vm7 = vmmov %vm8993_vm9 }
 0x2d6   : > { %4224 = vmatmul.mubr.msk.bf16.gmra.mrb[44].mxu0 %vm8956_vm5, %v7076_v60  ;;  %2446 = vadd.xlane.f32.xlu0 %v2445_v47  ;;  %v7287_v63 = vpop.permute.xlu0 %2627  ;;  %v8970_v47 = vld [vmem:[#allocation22_spill] sm:$0xff]  ;;  %vm8989_vm6 = vmmov %vm8988_vm15 }
 0x2d7   : > { %v2177_v52 = vmul.f32 %v8970_v47, %v2145_v13 }
 0x2d8   : > { %4256 = vmatmul.mubr.msk.bf16.gmra.mrb[44].mxu1 %vm1371_vm11, %v8957_v16 }
 0x2d9   : > { %2672 = vperm.xlu1 %4555, %v7281_v15  }
 0x2da   : > { %v7289_v46 = vpop.permute.xlu0 %2637 }
 0x2de   : > { %v7291_v45 = vpop.permute.xlu0 %2647 }
 0x2e2   : > { %v7293_v27 = vpop.permute.xlu0 %2657 }
 0x2e5   : > { %v1804_v22 = vpop.permute.xlu1 %1803 }
 0x2e6   : > { %v1869_v60 = vsub.bf16 %v8959_v31, %v1804_v22  ;;  %v1870_v19 = vsub.bf16 %v8960_v59, %v1804_v22  ;;  %v1871_v38 = vsub.bf16 %v8961_v2, %v1804_v22  ;;  %v1872_v50 = vsub.bf16 %v8962_v7, %v1804_v22  ;;  %v7299_v4 = vpop.permute.xlu0 %2667  ;;  %v8973_v2 = vld [vmem:[#allocation59_spill] sm:$0xff] }
 0x2e8   : > { %v2030_v21 = vmul.bf16 1069105081, %v1869_v60  ;;  %v2033_v18 = vmul.bf16 1069105081, %v1870_v19  ;;  %v2036_v33 = vmul.bf16 1069105081, %v1871_v38 }
 0x2e9   : > { %v2039_v43 = vmul.bf16 1069105081, %v1872_v50  ;;  %v1809_v55 = vpop.permute.xlu1 %1808  ;;  %v8971_v60 = vld [vmem:[#allocation106_spill] sm:$0xff]  ;;  %v8974_v38 = vld [vmem:[#allocation107_spill] sm:$0xff] }
 0x2ea   : > { %4718 = vpow.bf16 %v2030_v21  ;;  %v1873_v49 = vsub.bf16 %v8963_v26, %v1809_v55  ;;  %v1874_v40 = vsub.bf16 %v8964_v10, %v1809_v55  ;;  %v1875_v20 = vsub.bf16 %v8965_v24, %v1809_v55  ;;  %v8978_v21 = vld [vmem:[#allocation109_spill] sm:$0xff] }
 0x2eb   : > { %4720 = vpow.bf16 %v2033_v18  ;;  %v1876_v37 = vsub.bf16 %v8966_v12, %v1809_v55  ;;  %vm8972_vm8 = vcmp.ne.s16.totalorder %v8971_v60, 0  ;;  %vm8975_vm11 = vcmp.ne.s16.totalorder %v8974_v38, 0  ;;  %v8980_v55 = vld [vmem:[#allocation113_spill] sm:$0xff] }
 0x2ec   : > { %4722 = vpow.bf16 %v2036_v33  ;;  %v2042_v39 = vmul.bf16 1069105081, %v1873_v49  ;;  %v2045_v29 = vmul.bf16 1069105081, %v1874_v40  ;;  %v2048_v56 = vmul.bf16 1069105081, %v1875_v20  ;;  %vm8976_vm10 = vmmov %vm8975_vm11 }
 0x2ed   : > { %4724 = vpow.bf16 %v2039_v43  ;;  %v2051_v54 = vmul.bf16 1069105081, %v1876_v37  ;;  %vm8977_vm3 = vmmov %vm8972_vm8  ;;  %vm8979_vm12 = vcmp.ne.s16.totalorder %v8978_v21, 0  ;;  %vm8981_vm13 = vcmp.ne.s16.totalorder %v8980_v55, 0  ;;  %v8984_v24 = vld [vmem:[#allocation89_spill] sm:$0xff] }
 0x2ee   : > { %4726 = vpow.bf16 %v2042_v39  ;;  %vm8982_vm2 = vmmov %vm8981_vm13  ;;  %vm8985_vm1 = vcmp.ne.s16.totalorder %v8984_v24, 0  ;;  %v8986_v37 = vld [vmem:[#allocation9_spill] sm:$0xff] }
 0x2ef   : > { %4728 = vpow.bf16 %v2045_v29  ;;  %vm8983_vm0 = vmmov %vm8979_vm12 }
 0x2f0   : > { %4730 = vpow.bf16 %v2048_v56  ;;  %vm9000_vm5 = vmmov %vm8985_vm1 }
 0x2f1   : > { %v2342_v6 = vpop.xlane.xlu0 %2341  ;;  %4732 = vpow.bf16 %v2051_v54 }
 0x2f2   : > { %v2494_v53 = vadd.f32 %v2342_v6, %v2174_v1  ;;  %v8990_v6 = vld [vmem:[#allocation94_spill] sm:$0xff] }
 0x2f3   : > { %vm8991_vm14 = vcmp.ne.s16.totalorder %v8990_v6, 0  ;;  %v9010_v6 = vld [vmem:[#allocation125_spill] sm:$0xff] }
 0x2f4   : > { %2527 = vst.msk [vmem:[#allocation3 + $0x8] sm:$0xff] %vm2525_vm4, %v2494_v53 }
 0x2f5   : > { %v2347_v14 = vpop.xlane.xlu0 %2346  ;;  %v4719_v16 = vpop.eup %4718 }
 0x2f6   : > { %v2495_v35 = vadd.f32 %v2347_v14, %v2175_v30  ;;  %v4721_v22 = vpop.eup %4720  ;;  %v7313_v59 = vsel %vm8972_vm8, %v4719_v16, 0  ;;  %vm9001_vm8 = vmmov %vm8991_vm14 }
 0x2f7   : > { %v4723_v19 = vpop.eup %4722  ;;  %4225 = vmatprep.mubr.msk.bf16.mxu0 %vm8975_vm11, %v4721_v22  ;;  %v7320_v7 = vsel %vm8976_vm10, %v4721_v22, 0  ;;  %v2301_v50 = vunpack.c.l.bf16 %v7313_v59 }
 0x2f8   : > { %2528 = vst.msk [vmem:[#allocation3 + $0x10] sm:$0xff] %vm2525_vm4, %v2495_v35  ;;  %v4725_v9 = vpop.eup %4724  ;;  %4226 = vmatmul.mubr.msk.bf16.gmra.mrb[48].mxu0 %vm8977_vm3, %v4719_v16  ;;  %v7328_v18 = vsel %vm8979_vm12, %v4723_v19, 0  ;;  %v2302_v33 = vunpack.c.l.bf16 %v7320_v7  ;;  %v8995_v35 = vld [vmem:[#allocation61_spill] sm:$0xff] }
 0x2f9   : > { %v2357_v48 = vpop.xlane.xlu0 %2356  ;;  %v4727_v43 = vpop.eup %4726  ;;  %4257 = vmatprep.mubr.msk.bf16.mxu1 %vm8981_vm13, %v4725_v9  ;;  %v7335_v26 = vsel %vm8982_vm2, %v4725_v9, 0  ;;  %v2303_v10 = vunpack.c.l.bf16 %v7328_v18  ;;  %vm9011_vm2 = vcmp.ne.s16.totalorder %v9010_v6, 0 }
 0x2fa   : > { %v2497_v31 = vadd.f32 %v2357_v48, %v2177_v52  ;;  %v4729_v49 = vpop.eup %4728  ;;  %4258 = vmatmul.mubr.msk.bf16.gmra.mrb[48].mxu1 %vm8983_vm0, %v4723_v19  ;;  %v2453_v40 = vadd.f32 %v2302_v33, %v2301_v50  ;;  %v7342_v20 = vsel %vm8985_vm1, %v4727_v43, 0  ;;  %v2304_v56 = vunpack.c.l.bf16 %v7335_v26  ;;  %v8996_v52 = vld [vmem:[#allocation123_spill] sm:$0xff]  ;;  %v8997_v48 = vld [vmem:[#allocation124_spill] sm:$0xff]  ;;  %v8999_v19 = vld [vmem:[#allocation130_spill] sm:$0xff] }
 0x2fb   : > { %v4731_v12 = vpop.eup %4730  ;;  %4227 = vmatprep.mubr.msk.bf16.mxu0 %vm8988_vm15, %v4729_v49  ;;  %v7349_v1 = vsel %vm8989_vm6, %v4729_v49, 0  ;;  %v2309_v39 = vunpack.c.l.bf16 %v7342_v20  ;;  %vm9012_vm0 = vmmov %vm9011_vm2  ;;  %vm3392_vm15 = vcmask 261120  }
 0x2fc   : > { %2530 = vst.msk [vmem:[#allocation3 + $0x20] sm:$0xff] %vm2525_vm4, %v2497_v31  ;;  %v4733_v29 = vpop.eup %4732  ;;  %v2454_v54 = vadd.f32 %v2453_v40, %v2303_v10  ;;  %v7355_v34 = vsel %vm8991_vm14, %v4731_v12, 0  ;;  %v2310_v53 = vunpack.c.l.bf16 %v7349_v1  ;;  %v8998_v31 = vld [vmem:[#allocation129_spill] sm:$0xff] }
 0x2fd   : > { %2336 = vadd.xlane.f32.xlu1 %v8969_v61  ;;  %4259 = vmatprep.mubr.msk.bf16.mxu1 %vm8993_vm9, %v4733_v29  ;;  %v7362_v14 = vsel %vm8994_vm7, %v4733_v29, 0  ;;  %v2311_v47 = vunpack.c.l.bf16 %v7355_v34  ;;  %v9004_v29 = vld [vmem:[#allocation120_spill] sm:$0xff] }
 0x2fe   : > { %v2455_v30 = vadd.f32 %v2454_v54, %v2304_v56  ;;  %v2463_v13 = vadd.f32 %v2310_v53, %v2309_v39  ;;  %v2312_v38 = vunpack.c.l.bf16 %v7362_v14  ;;  %vm9005_vm10 = vcmp.ne.s16.totalorder %v9004_v29, 0 }
 0x2ff   : > { %vm9006_vm3 = vmmov %vm9005_vm10 }
 0x300   : > { %4228 = vmatmul.mubr.msk.bf16.gmra.mrb[52].mxu0 %vm9000_vm5, %v4727_v43  ;;  %2456 = vadd.xlane.f32.xlu0 %v2455_v30  ;;  %v2464_v50 = vadd.f32 %v2463_v13, %v2311_v47  ;;  %v2147_v43 = vld [vmem:[#allocation3 + $0x30] sm:$0xff] }
 0x301   : > { %2351 = vadd.xlane.f32.xlu1 %v8973_v2  ;;  %v2179_v10 = vmul.f32 %v6874_v28, %v2147_v43 }
 0x302   : > { %4260 = vmatmul.mubr.msk.bf16.gmra.mrb[52].mxu1 %vm9001_vm8, %v4731_v12  ;;  %v2465_v49 = vadd.f32 %v2464_v50, %v2312_v38 }
 0x304   : > { %2466 = vadd.xlane.f32.xlu0 %v2465_v49 }
 0x305   : > { %2361 = vadd.xlane.f32.xlu1 %v8986_v37  ;;  %v1814_v61 = vpop.permute.xlu1 %1813 }
 0x306   : > { %v1877_v16 = vsub.bf16 %v8996_v52, %v1814_v61  ;;  %v1878_v22 = vsub.bf16 %v8997_v48, %v1814_v61  ;;  %v1879_v60 = vsub.bf16 %v8998_v31, %v1814_v61  ;;  %v1880_v2 = vsub.bf16 %v8999_v19, %v1814_v61  ;;  %v2558_v31 = vld [vmem:[#allocation4] sm:$0xff] }
 0x307   : > { %v2306_v61 = vunpack.c.h.bf16 %v7320_v7  ;;  %v2314_v7 = vunpack.c.h.bf16 %v7349_v1 }
 0x308   : > { %v2054_v9 = vmul.bf16 1069105081, %v1877_v16  ;;  %v2057_v21 = vmul.bf16 1069105081, %v1878_v22  ;;  %v2060_v33 = vmul.bf16 1069105081, %v1879_v60 }
 0x309   : > { %2371 = vadd.xlane.f32.xlu1 %v8995_v35  ;;  %v2063_v55 = vmul.bf16 1069105081, %v1880_v2  ;;  %v2305_v35 = vunpack.c.h.bf16 %v7313_v59  ;;  %v2313_v59 = vunpack.c.h.bf16 %v7342_v20 }
 0x30a   : > { %4734 = vpow.bf16 %v2054_v9 }
 0x30b   : > { %4736 = vpow.bf16 %v2057_v21 }
 0x30c   : > { %4738 = vpow.bf16 %v2060_v33  ;;  %v2458_v33 = vadd.f32 %v2306_v61, %v2305_v35 }
 0x30d   : > { %2381 = vadd.xlane.f32.xlu1 %v7196_v23  ;;  %4740 = vpow.bf16 %v2063_v55  ;;  %v9002_v23 = vld [vmem:[#allocation119_spill] sm:$0xff]  ;;  %v2750_v55 = vmul.f32 %v7223_v36, %v2558_v31 }
 0x30e   : > { %vm9003_vm11 = vcmp.ne.s16.totalorder %v9002_v23, 0 }
 0x30f   : > { %vm9007_vm12 = vmmov %vm9003_vm11 }
 0x311   : > { %2391 = vadd.xlane.f32.xlu1 %v7218_v58 }
 0x313   : > { %v2367_v24 = vpop.xlane.xlu0 %2366 }
 0x314   : > { %v2499_v37 = vadd.f32 %v2367_v24, %v2179_v10  ;;  %v4285_v13 = vpop.f32.mrb[0].mxu0  ;;  %v2307_v10 = vunpack.c.h.bf16 %v7328_v18  ;;  %v2308_v18 = vunpack.c.h.bf16 %v7335_v26 }
 0x315   : > { %2401 = vadd.xlane.f32.xlu1 %v7220_v51  ;;  %v4735_v40 = vpop.eup %4734  ;;  %v4286_v47 = vpop.f32.mrb[1].mxu0 }
 0x316   : > { %v4737_v12 = vpop.eup %4736  ;;  %v7382_v42 = vsel %vm9003_vm11, %v4735_v40, 0  ;;  %2532 = vst.msk [vmem:[#allocation3 + $0x30] sm:$0xff] %vm2525_vm4, %v2499_v37  ;;  %v4397_v16 = vpop.f32.mrb[0].mxu1  ;;  %v4287_v48 = vadd.f32 %v4286_v47, %v4285_v13  ;;  %v2468_v37 = vadd.f32 %v2314_v7, %v2313_v59  ;;  %v2316_v47 = vunpack.c.h.bf16 %v7362_v14  ;;  %v9015_v59 = vld [vmem:[#allocation147_spill] sm:$0xff] }
 0x317   : > { %v4739_v39 = vpop.eup %4738  ;;  %4229 = vmatprep.mubr.msk.bf16.mxu0 %vm9005_vm10, %v4737_v12  ;;  %v7388_v58 = vsel %vm9006_vm3, %v4737_v12, 0  ;;  %v2317_v28 = vunpack.c.l.bf16 %v7382_v42  ;;  %v4288_v22 = vpop.f32.mrb[2].mxu0  ;;  %v2321_v20 = vunpack.c.h.bf16 %v7382_v42  ;;  %v2459_v12 = vadd.f32 %v2458_v33, %v2307_v10 }
 0x318   : > { %v4741_v51 = vpop.eup %4740  ;;  %4230 = vmatmul.mubr.msk.bf16.gmra.mrb[56].mxu0 %vm9007_vm12, %v4735_v40  ;;  %v2318_v54 = vunpack.c.l.bf16 %v7388_v58  ;;  %v4398_v60 = vpop.f32.mrb[1].mxu1  ;;  %v2322_v1 = vunpack.c.h.bf16 %v7388_v58  ;;  %v2561_v58 = vld [vmem:[#allocation4 + $0x18] sm:$0xff] }
 0x319   : > { %2411 = vadd.xlane.f32.xlu1 %v7256_v44  ;;  %v9008_v44 = vld [vmem:[#allocation122_spill] sm:$0xff]  ;;  %4261 = vmatprep.mubr.msk.bf16.mxu1 %vm9011_vm2, %v4741_v51  ;;  %v7404_v53 = vsel %vm9012_vm0, %v4741_v51, 0  ;;  %v4289_v19 = vpop.f32.mrb[3].mxu0  ;;  %v4399_v38 = vadd.f32 %v4398_v60, %v4397_v16  ;;  %v4400_v50 = vpop.f32.mrb[2].mxu1  ;;  %v2460_v6 = vadd.f32 %v2459_v12, %v2308_v18 }
 0x31a   : > { %vm9009_vm13 = vcmp.ne.s16.totalorder %v9008_v44, 0  ;;  %v2473_v30 = vadd.f32 %v2318_v54, %v2317_v28  ;;  %v4290_v9 = vadd.f32 %v4289_v19, %v4288_v22  ;;  %v4401_v21 = vpop.f32.mrb[3].mxu1  ;;  %v2478_v13 = vadd.f32 %v2322_v1, %v2321_v20  ;;  %v2149_v22 = vld [vmem:[#allocation3 + $0x40] sm:$0xff] }
 0x31b   : > { %v7396_v56 = vsel %vm9009_vm13, %v4739_v39, 0  ;;  %vm9013_vm1 = vmmov %vm9009_vm13  ;;  %v3234_v49 = vadd.f32 %v4399_v38, %v4287_v48  ;;  %v4402_v43 = vadd.f32 %v4401_v21, %v4400_v50  ;;  %v2324_v48 = vunpack.c.h.bf16 %v7404_v53  ;;  %v9016_v21 = vld [vmem:[#allocation153_spill] sm:$0xff] }
 0x31c   : > { %4262 = vmatmul.mubr.msk.bf16.gmra.mrb[56].mxu1 %vm9013_vm1, %v4739_v39  ;;  %v2319_v0 = vunpack.c.l.bf16 %v7396_v56  ;;  %v4291_v24 = vpop.f32.mrb[4].mxu0  ;;  %v2323_v26 = vunpack.c.h.bf16 %v7396_v56  ;;  %v2181_v14 = vmul.f32 %v7155_v8, %v2149_v22 }
 0x31d   : > { %2421 = vadd.xlane.f32.xlu1 %v7248_v11  ;;  %v2320_v11 = vunpack.c.l.bf16 %v7404_v53  ;;  %v7418_v40 = vadd.f32 %v4402_v43, %v4290_v9  ;;  %v4292_v23 = vpop.f32.mrb[5].mxu0  ;;  %v9017_v53 = vld [vmem:[#allocation154_spill] sm:$0xff] }
 0x31e   : > { %v2474_v52 = vadd.f32 %v2473_v30, %v2319_v0  ;;  %v4293_v39 = vadd.f32 %v4292_v23, %v4291_v24  ;;  %v4294_v29 = vpop.f32.mrb[6].mxu0 }
 0x31f   : > { %v4403_v36 = vpop.f32.mrb[4].mxu1  ;;  %v4295_v51 = vpop.f32.mrb[7].mxu0 }
 0x320   : > { %v2475_v2 = vadd.f32 %v2474_v52, %v2320_v11  ;;  %v4404_v28 = vpop.f32.mrb[5].mxu1  ;;  %v4296_v54 = vadd.f32 %v4295_v51, %v4294_v29  ;;  %v2479_v52 = vadd.f32 %v2478_v13, %v2323_v26 }
 0x321   : > { %2431 = vadd.xlane.f32.xlu1 %v7250_v25  ;;  %v3360_v25 = vadd.f32 %v3234_v49, %v2750_v55  ;;  %v4405_v44 = vadd.f32 %v4404_v28, %v4403_v36  ;;  %v4406_v42 = vpop.f32.mrb[6].mxu1  ;;  %v2151_v49 = vld [vmem:[#allocation3 + $0x50] sm:$0xff] }
 0x322   : > { %2476 = vadd.xlane.f32.xlu0 %v2475_v2  ;;  %v4407_v30 = vpop.f32.mrb[7].mxu1  ;;  %v2480_v60 = vadd.f32 %v2479_v52, %v2324_v48  ;;  %v2183_v36 = vmul.f32 %v7169_v62, %v2151_v49 }
 0x323   : > { %3393 = vst.msk [vmem:[#allocation4] sm:$0xff] %vm3392_vm15, %v3360_v25  ;;  %v7426_v35 = vadd.f32 %v4405_v44, %v4293_v39  ;;  %v4408_v61 = vadd.f32 %v4407_v30, %v4406_v42  ;;  %v2559_v25 = vld [vmem:[#allocation4 + $0x8] sm:$0xff]  ;;  %v2153_v44 = vld [vmem:[#allocation3 + $0x60] sm:$0xff] }
 0x324   : > { %v2185_v62 = vmul.f32 %v7176_v17, %v2153_v44 }
 0x325   : > { %2441 = vadd.xlane.f32.xlu1 %v7260_v5  ;;  %v2315_v5 = vunpack.c.h.bf16 %v7355_v34  ;;  %v3245_v34 = vadd.f32 %v4408_v61, %v4296_v54 }
 0x327   : > { %v2469_v0 = vadd.f32 %v2468_v37, %v2315_v5  ;;  %v2563_v5 = vld [vmem:[#allocation4 + $0x28] sm:$0xff] }
 0x328   : > { %v2755_v13 = vmul.f32 %v7275_v57, %v2563_v5  ;;  %v9033_v5 = vld [vmem:[#allocation135_spill] sm:$0xff] }
 0x329   : > { %2451 = vadd.xlane.f32.xlu1 %v7262_v32  ;;  %v2753_v32 = vmul.f32 %v7264_v3, %v2561_v58  ;;  %v2470_v11 = vadd.f32 %v2469_v0, %v2316_v47  ;;  %v9014_v3 = vld [vmem:[#allocation146_spill] sm:$0xff]  ;;  %v2560_v0 = vld [vmem:[#allocation4 + $0x10] sm:$0xff] }
 0x32b   : > { %v3363_v16 = vadd.f32 %v3245_v34, %v2753_v32  ;;  %v4297_v31 = vpop.f32.mrb[8].mxu0  ;;  %v2155_v34 = vld [vmem:[#allocation3 + $0x70] sm:$0xff] }
 0x32c   : > { %v4298_v19 = vpop.f32.mrb[9].mxu0  ;;  %v2187_v57 = vmul.f32 %v7127_v41, %v2155_v34 }
 0x32d   : > { %2461 = vadd.xlane.f32.xlu1 %v2460_v6  ;;  %3396 = vst.msk [vmem:[#allocation4 + $0x18] sm:$0xff] %vm3392_vm15, %v3363_v16  ;;  %v4409_v56 = vpop.f32.mrb[8].mxu1  ;;  %v4299_v38 = vadd.f32 %v4298_v19, %v4297_v31  ;;  %v4300_v20 = vpop.f32.mrb[10].mxu0  ;;  %v2562_v16 = vld [vmem:[#allocation4 + $0x20] sm:$0xff] }
 0x32e   : > { %v4410_v43 = vpop.f32.mrb[9].mxu1  ;;  %v4301_v18 = vpop.f32.mrb[11].mxu0  ;;  %v2157_v31 = vld [vmem:[#allocation3 + $0x80] sm:$0xff] }
 0x32f   : > { %v4411_v24 = vadd.f32 %v4410_v43, %v4409_v56  ;;  %v4412_v8 = vpop.f32.mrb[10].mxu1  ;;  %v4302_v42 = vadd.f32 %v4301_v18, %v4300_v20  ;;  %v9026_v43 = vld [vmem:[#allocation148_spill] sm:$0xff] }
 0x330   : > { %v4413_v54 = vpop.f32.mrb[11].mxu1  ;;  %vm9027_vm8 = vcmp.ne.s16.totalorder %v9026_v43, 0 }
 0x331   : > { %2471 = vadd.xlane.f32.xlu1 %v2470_v11  ;;  %v3250_v29 = vadd.f32 %v4411_v24, %v4299_v38  ;;  %v4414_v6 = vadd.f32 %v4413_v54, %v4412_v8  ;;  %v9018_v38 = vld [vmem:[#allocation139_spill] sm:$0xff]  ;;  %vm9028_vm11 = vmmov %vm9027_vm8  ;;  %v9030_v24 = vld [vmem:[#allocation133_spill] sm:$0xff] }
 0x332   : > { %v2377_v50 = vpop.xlane.xlu0 %2376  ;;  %vm9019_vm6 = vcmp.ne.s16.totalorder %v9018_v38, 0  ;;  %v2161_v38 = vld [vmem:[#allocation3 + $0xa0] sm:$0xff] }
 0x333   : > { %v2501_v10 = vadd.f32 %v2377_v50, %v2181_v14  ;;  %v3253_v61 = vadd.f32 %v4414_v6, %v4302_v42  ;;  %vm9023_vm7 = vmmov %vm9019_vm6  ;;  %v9037_v6 = vld [vmem:[#allocation143_spill] sm:$0xff] }
 0x334   : > { %v1819_v2 = vpop.permute.xlu1 %1818 }
 0x335   : > { %v1881_v9 = vsub.bf16 %v9014_v3, %v1819_v2  ;;  %v1882_v7 = vsub.bf16 %v9015_v59, %v1819_v2  ;;  %v1883_v33 = vsub.bf16 %v9016_v21, %v1819_v2  ;;  %v1884_v55 = vsub.bf16 %v9017_v53, %v1819_v2  ;;  %2481 = vadd.xlane.f32.xlu1 %v2480_v60 }
 0x336   : > { %2534 = vst.msk [vmem:[#allocation3 + $0x40] sm:$0xff] %vm2525_vm4, %v2501_v10  ;;  %v3365_v52 = vadd.f32 %v3253_v61, %v2755_v13  ;;  %v2189_v2 = vmul.f32 %v7281_v15, %v2157_v31  ;;  %v9024_v15 = vld [vmem:[#allocation145_spill] sm:$0xff]  ;;  %v9040_v61 = vld [vmem:[#allocation128_spill] sm:$0xff] }
 0x337   : > { %v2066_v1 = vmul.bf16 1069105081, %v1881_v9  ;;  %v2069_v12 = vmul.bf16 1069105081, %v1882_v7  ;;  %v2072_v37 = vmul.bf16 1069105081, %v1883_v33 }
 0x338   : > { %v2075_v23 = vmul.bf16 1069105081, %v1884_v55  ;;  %v2598_v39 = vpop.permute.xlu1 %2597  ;;  %v2387_v28 = vpop.xlane.xlu0 %2386  ;;  %3398 = vst.msk [vmem:[#allocation4 + $0x28] sm:$0xff] %vm3392_vm15, %v3365_v52  ;;  %v9020_v9 = vld [vmem:[#allocation140_spill] sm:$0xff]  ;;  %vm9025_vm5 = vcmp.ne.s16.totalorder %v9024_v15, 0 }
 0x339   : > { %4742 = vpow.bf16 %v2066_v1  ;;  %v2751_v51 = vmul.f32 %v2598_v39, %v2559_v25  ;;  %v2503_v58 = vadd.f32 %v2387_v28, %v2183_v36  ;;  %vm9021_vm14 = vcmp.ne.s16.totalorder %v9020_v9, 0  ;;  %v9029_v25 = vld [vmem:[#allocation131_spill] sm:$0xff]  ;;  %vm9032_vm10 = vmmov %vm9025_vm5  ;;  %v9034_v28 = vld [vmem:[#allocation137_spill] sm:$0xff] }
 0x33a   : > { %4744 = vpow.bf16 %v2069_v12  ;;  %vm9022_vm9 = vmmov %vm9021_vm14  ;;  %v9031_v20 = vsub.f32 %v9029_v25, %v9030_v24  ;;  %v2565_v9 = vld [vmem:[#allocation4 + $0x38] sm:$0xff] }
 0x33b   : > { %4746 = vpow.bf16 %v2072_v37  ;;  %v3361_v30 = vadd.f32 %v7418_v40, %v2751_v51  ;;  %2536 = vst.msk [vmem:[#allocation3 + $0x50] sm:$0xff] %vm2525_vm4, %v2503_v58  ;;  %v9035_v51 = vsub.f32 %v9033_v5, %v9034_v28  ;;  %v9036_v58 = vld [vmem:[#allocation141_spill] sm:$0xff]  ;;  %v9048_v24 = vld [vmem:[#allocation136_spill] sm:$0xff]  ;;  %v9052_v5 = vld [vmem:[#allocation151_spill] sm:$0xff] }
 0x33c   : > { %4748 = vpow.bf16 %v2075_v23  ;;  %v2603_v47 = vpop.permute.xlu1 %2602  ;;  %v2397_v26 = vpop.xlane.xlu0 %2396  ;;  %v1697_v8 = vmul.f32 1.442695, %v9031_v20  ;;  %v9049_v20 = vld [vmem:[#allocation138_spill] sm:$0xff] }
 0x33d   : > { %3394 = vst.msk [vmem:[#allocation4 + $0x8] sm:$0xff] %vm3392_vm15, %v3361_v30  ;;  %v2752_v32 = vmul.f32 %v2603_v47, %v2560_v0  ;;  %v2505_v11 = vadd.f32 %v2397_v26, %v2185_v62  ;;  %v1701_v44 = vmul.f32 1.442695, %v9035_v51  ;;  %v9038_v0 = vsub.f32 %v9036_v58, %v9037_v6  ;;  %v9039_v62 = vld [vmem:[#allocation127_spill] sm:$0xff] }
 0x33e   : > { %4750 = vpow2.f32 %v1697_v8  ;;  %v9041_v47 = vsub.f32 %v9039_v62, %v9040_v61  ;;  %v9050_v8 = vsub.f32 %v9048_v24, %v9049_v20  ;;  %v9057_v62 = vld [vmem:[#allocation14_spill] sm:$0xff]  ;;  %v9058_v61 = vld [vmem:[#allocation15_spill] sm:$0xff] }
 0x33f   : > { %v3362_v48 = vadd.f32 %v7426_v35, %v2752_v32  ;;  %2538 = vst.msk [vmem:[#allocation3 + $0x60] sm:$0xff] %vm2525_vm4, %v2505_v11  ;;  %4752 = vpow2.f32 %v1701_v44  ;;  %v1705_v30 = vmul.f32 1.442695, %v9038_v0  ;;  %v2159_v32 = vld [vmem:[#allocation3 + $0x90] sm:$0xff] }
 0x340   : > { %v2613_v40 = vpop.permute.xlu1 %2612  ;;  %v1695_v26 = vmul.f32 1.442695, %v9041_v47  ;;  %v9059_v47 = vsub.f32 %v9057_v62, %v9058_v61 }
 0x341   : > { %3395 = vst.msk [vmem:[#allocation4 + $0x10] sm:$0xff] %vm3392_vm15, %v3362_v48  ;;  %v2407_v17 = vpop.xlane.xlu0 %2406  ;;  %v2754_v22 = vmul.f32 %v2613_v40, %v2562_v16  ;;  %4754 = vpow2.f32 %v1705_v30  ;;  %v9042_v40 = vld [vmem:[#allocation132_spill] sm:$0xff] }
 0x342   : > { %v2507_v60 = vadd.f32 %v2407_v17, %v2187_v57  ;;  %v9043_v17 = vld [vmem:[#allocation134_spill] sm:$0xff]  ;;  %4756 = vpow2.f32 %v1695_v26  ;;  %v1717_v26 = vmul.f32 1.442695, %v9059_v47 }
 0x343   : > { %v3364_v19 = vadd.f32 %v3250_v29, %v2754_v22  ;;  %v9044_v22 = vsub.f32 %v9042_v40, %v9043_v17 }
 0x344   : > { %v4743_v14 = vpop.eup %4742  ;;  %2540 = vst.msk [vmem:[#allocation3 + $0x70] sm:$0xff] %vm2525_vm4, %v2507_v60  ;;  %v2623_v11 = vpop.permute.xlu1 %2622  ;;  %v2564_v60 = vld [vmem:[#allocation4 + $0x30] sm:$0xff] }
 0x345   : > { %v4745_v35 = vpop.eup %4744  ;;  %3397 = vst.msk [vmem:[#allocation4 + $0x20] sm:$0xff] %vm3392_vm15, %v3364_v19  ;;  %v2137_v41 = vsel %vm9019_vm6, %v4743_v14, 0  ;;  %v1699_v31 = vmul.f32 1.442695, %v9044_v22 }
 0x346   : > { %v2417_v56 = vpop.xlane.xlu0 %2416  ;;  %v4747_v50 = vpop.eup %4746  ;;  %4231 = vmatprep.mubr.msk.bf16.mxu0 %vm9021_vm14, %v4745_v35  ;;  %v2138_v59 = vsel %vm9022_vm9, %v4745_v35, 0  ;;  %v2329_v7 = vunpack.c.h.bf16 %v2137_v41  ;;  %v2325_v21 = vunpack.c.l.bf16 %v2137_v41 }
 0x347   : > { %v2509_v3 = vadd.f32 %v2417_v56, %v2189_v2  ;;  %v4749_v33 = vpop.eup %4748  ;;  %4232 = vmatmul.mubr.msk.bf16.gmra.mrb[60].mxu0 %vm9023_vm7, %v4743_v14  ;;  %v2139_v53 = vsel %vm9025_vm5, %v4747_v50, 0  ;;  %v2330_v55 = vunpack.c.h.bf16 %v2138_v59  ;;  %v2326_v49 = vunpack.c.l.bf16 %v2138_v59 }
 0x348   : > { %4263 = vmatprep.mubr.msk.bf16.mxu1 %vm9027_vm8, %v4749_v33  ;;  %v2140_v10 = vsel %vm9028_vm11, %v4749_v33, 0  ;;  %v2331_v1 = vunpack.c.h.bf16 %v2139_v53  ;;  %v2327_v37 = vunpack.c.l.bf16 %v2139_v53  ;;  %v4751_v13 = vpop.eup %4750  ;;  %v9046_v33 = vld [vmem:[#allocation12_spill] sm:$0xff]  ;;  %4758 = vpow2.f32 %v1699_v31  ;;  %v2633_v22 = vpop.permute.xlu1 %2632 }
 0x349   : > { %2542 = vst.msk [vmem:[#allocation3 + $0x80] sm:$0xff] %vm2525_vm4, %v2509_v3  ;;  %4264 = vmatmul.mubr.msk.bf16.gmra.mrb[60].mxu1 %vm9032_vm10, %v4747_v50  ;;  %v2488_v12 = vadd.f32 %v2330_v55, %v2329_v7  ;;  %v2483_v23 = vadd.f32 %v2326_v49, %v2325_v21  ;;  %v2332_v36 = vunpack.c.h.bf16 %v2140_v10  ;;  %v2328_v29 = vunpack.c.l.bf16 %v2140_v10  ;;  %v4753_v35 = vpop.eup %4752  ;;  %v9045_v21 = vld [vmem:[#allocation10_spill] sm:$0xff] }
 0x34a   : > { %v2191_v19 = vmul.f32 %v4751_v13, %v2159_v32  ;;  %v9047_v15 = vsub.f32 %v9045_v21, %v9046_v33  ;;  %v2756_v55 = vmul.f32 %v2623_v11, %v2564_v60  ;;  %v2193_v10 = vmul.f32 %v4753_v35, %v2161_v38  ;;  %v9060_v32 = vld [vmem:[#allocation11_spill] sm:$0xff]  ;;  %v9066_v60 = vld [vmem:[#allocation150_spill] sm:$0xff] }
 0x34b   : > { %v2489_v39 = vadd.f32 %v2488_v12, %v2331_v1  ;;  %v2484_v18 = vadd.f32 %v2483_v23, %v2327_v37  ;;  %v4755_v25 = vpop.eup %4754  ;;  %v1703_v1 = vmul.f32 1.442695, %v9050_v8  ;;  %v2757_v12 = vmul.f32 %v7287_v63, %v2565_v9  ;;  %v9055_v63 = vld [vmem:[#allocation144_spill] sm:$0xff] }
 0x34c   : > { %v1709_v53 = vmul.f32 1.442695, %v9047_v15  ;;  %v9072_v8 = vld [vmem:[#allocation104_spill] sm:$0xff] }
 0x34d   : > { %v2490_v42 = vadd.f32 %v2489_v39, %v2332_v36  ;;  %v2485_v54 = vadd.f32 %v2484_v18, %v2328_v29  ;;  %v2163_v39 = vld [vmem:[#allocation3 + $0xb0] sm:$0xff]  ;;  %v9051_v18 = vld [vmem:[#allocation149_spill] sm:$0xff] }
 0x34e   : > { %v9053_v28 = vsub.f32 %v9051_v18, %v9052_v5  ;;  %4760 = vpow2.f32 %v1709_v53 }
 0x34f   : > { %2491 = vadd.xlane.f32.xlu1 %v2490_v42  ;;  %2486 = vadd.xlane.f32.xlu0 %v2485_v54  ;;  %v2195_v42 = vmul.f32 %v4755_v25, %v2163_v39  ;;  %4762 = vpow2.f32 %v1703_v1  ;;  %v9054_v54 = vld [vmem:[#allocation142_spill] sm:$0xff]  ;;  %v9073_v1 = vld [vmem:[#allocation24_spill] sm:$0xff] }
 0x350   : > { %v1713_v51 = vmul.f32 1.442695, %v9053_v28  ;;  %v9056_v58 = vsub.f32 %v9054_v54, %v9055_v63 }
 0x351   : > { %v4303_v34 = vpop.f32.mrb[12].mxu0 }
 0x352   : > { %v4304_v52 = vpop.f32.mrb[13].mxu0  ;;  %v1707_v6 = vmul.f32 1.442695, %v9056_v58  ;;  %4764 = vpow2.f32 %v1713_v51 }
 0x353   : > { %v4415_v16 = vpop.f32.mrb[12].mxu1  ;;  %v4305_v48 = vadd.f32 %v4304_v52, %v4303_v34  ;;  %v4306_v57 = vpop.f32.mrb[14].mxu0  ;;  %v9061_v34 = vld [vmem:[#allocation13_spill] sm:$0xff] }
 0x354   : > { %v4416_v14 = vpop.f32.mrb[13].mxu1  ;;  %v4307_v2 = vpop.f32.mrb[15].mxu0  ;;  %4766 = vpow2.f32 %v1707_v6  ;;  %v9062_v11 = vsub.f32 %v9060_v32, %v9061_v34 }
 0x355   : > { %v4417_v41 = vadd.f32 %v4416_v14, %v4415_v16  ;;  %v4418_v50 = vpop.f32.mrb[14].mxu1  ;;  %v4308_v3 = vadd.f32 %v4307_v2, %v4306_v57  ;;  %4768 = vpow2.f32 %v1717_v26  ;;  %v9064_v57 = vld [vmem:[#allocation23_spill] sm:$0xff] }
 0x356   : > { %v4419_v7 = vpop.f32.mrb[15].mxu1  ;;  %v1711_v52 = vmul.f32 1.442695, %v9062_v11 }
 0x357   : > { %v3258_v49 = vadd.f32 %v4417_v41, %v4305_v48  ;;  %v4420_v43 = vadd.f32 %v4419_v7, %v4418_v50  ;;  %v9063_v48 = vld [vmem:[#allocation103_spill] sm:$0xff]  ;;  %v9069_v41 = vld [vmem:[#allocation16_spill] sm:$0xff] }
 0x358   : > { %v9065_v40 = vsub.f32 %v9063_v48, %v9064_v57  ;;  %4770 = vpow2.f32 %v1711_v52  ;;  %v9070_v50 = vld [vmem:[#allocation60_spill] sm:$0xff] }
 0x359   : > { %v3366_v23 = vadd.f32 %v3258_v49, %v2756_v55  ;;  %v3261_v36 = vadd.f32 %v4420_v43, %v4308_v3  ;;  %v9071_v3 = vsub.f32 %v9069_v41, %v9070_v50  ;;  %v2566_v55 = vld [vmem:[#allocation4 + $0x40] sm:$0xff]  ;;  %v2569_v52 = vld [vmem:[#allocation4 + $0x58] sm:$0xff] }
 0x35a   : > { %v1721_v17 = vmul.f32 1.442695, %v9065_v40  ;;  %v2758_v39 = vmul.f32 %v2633_v22, %v2566_v55 }
 0x35b   : > { %v2427_v56 = vpop.xlane.xlu0 %2426  ;;  %3399 = vst.msk [vmem:[#allocation4 + $0x30] sm:$0xff] %vm3392_vm15, %v3366_v23  ;;  %v3367_v44 = vadd.f32 %v3261_v36, %v2757_v12  ;;  %v1719_v9 = vmul.f32 1.442695, %v9071_v3  ;;  %v9074_v12 = vsub.f32 %v9072_v8, %v9073_v1  ;;  %v2567_v23 = vld [vmem:[#allocation4 + $0x48] sm:$0xff] }
 0x35c   : > { %v2511_v59 = vadd.f32 %v2427_v56, %v2191_v19  ;;  %v9067_v19 = vld [vmem:[#allocation152_spill] sm:$0xff]  ;;  %4772 = vpow2.f32 %v1721_v17  ;;  %v2759_v28 = vmul.f32 %v7289_v46, %v2567_v23  ;;  %v2568_v46 = vld [vmem:[#allocation4 + $0x50] sm:$0xff] }
 0x35d   : > { %3400 = vst.msk [vmem:[#allocation4 + $0x38] sm:$0xff] %vm3392_vm15, %v3367_v44  ;;  %v9068_v14 = vsub.f32 %v9066_v60, %v9067_v19  ;;  %v2761_v60 = vmul.f32 %v7291_v45, %v2569_v52 }
 0x35e   : > { %2544 = vst.msk [vmem:[#allocation3 + $0x90] sm:$0xff] %vm2525_vm4, %v2511_v59  ;;  %v2643_v59 = vpop.permute.xlu1 %2642 }
 0x35f   : > { %v2437_v37 = vpop.xlane.xlu0 %2436  ;;  %v1715_v2 = vmul.f32 1.442695, %v9068_v14  ;;  %v2760_v57 = vmul.f32 %v2643_v59, %v2568_v46 }
 0x360   : > { %2682 = vperm.xlu1 %4555, %v4751_v13   ;;  %v2513_v29 = vadd.f32 %v2437_v37, %v2193_v10  ;;  %v7502_v13 = vpop.eup %4756  ;;  %v1723_v37 = vmul.f32 1.442695, %v9074_v12 }
 0x361   : > { %v7512_v16 = vpop.eup %4758  ;;  %4774 = vpow2.f32 %v1715_v2 }
 0x362   : > { %2546 = vst.msk [vmem:[#allocation3 + $0xa0] sm:$0xff] %vm2525_vm4, %v2513_v29  ;;  %v7518_v31 = vpop.eup %4760  ;;  %4776 = vpow2.f32 %v1719_v9  ;;  %v2653_v63 = vpop.permute.xlu1 %2652 }
 0x363   : > { %v2447_v0 = vpop.xlane.xlu0 %2446  ;;  %4778 = vpow2.f32 %v1723_v37 }
 0x364   : > { %2692 = vperm.xlu1 %4555, %v4753_v35   ;;  %v2515_v30 = vadd.f32 %v2447_v0, %v2195_v42  ;;  %v7524_v35 = vpop.eup %4762 }
 0x365   : > { %2677 = vperm.xlu0 %4554, %v7502_v13   ;;  %v7527_v38 = vpop.eup %4764 }
 0x366   : > { %2548 = vst.msk [vmem:[#allocation3 + $0xb0] sm:$0xff] %vm2525_vm4, %v2515_v30  ;;  %v7533_v53 = vpop.eup %4766 }
 0x367   : > { %v7536_v20 = vpop.eup %4768 }
 0x368   : > { %2702 = vperm.xlu1 %4555, %v4755_v25   ;;  %v7542_v5 = vpop.eup %4770 }
 0x369   : > { %2687 = vperm.xlu0 %4554, %v7512_v16   ;;  %v4309_v56 = vpop.f32.mrb[16].mxu0  ;;  %v7546_v54 = vpop.eup %4772 }
 0x36a   : > { %v4310_v7 = vpop.f32.mrb[17].mxu0 }
 0x36b   : > { %v4311_v33 = vadd.f32 %v4310_v7, %v4309_v56  ;;  %v4312_v15 = vpop.f32.mrb[18].mxu0  ;;  %v7550_v61 = vpop.eup %4774 }
 0x36c   : > { %2712 = vperm.xlu1 %4555, %v7518_v31   ;;  %v4421_v21 = vpop.f32.mrb[16].mxu1  ;;  %v4313_v43 = vpop.f32.mrb[19].mxu0 }
 0x36d   : > { %2697 = vperm.xlu0 %4554, %v7524_v35   ;;  %v4422_v49 = vpop.f32.mrb[17].mxu1  ;;  %v4314_v24 = vadd.f32 %v4313_v43, %v4312_v15  ;;  %v7554_v22 = vpop.eup %4776  ;;  %v2571_v43 = vld [vmem:[#allocation4 + $0x68] sm:$0xff] }
 0x36e   : > { %v4423_v10 = vadd.f32 %v4422_v49, %v4421_v21  ;;  %v4424_v25 = vpop.f32.mrb[18].mxu1  ;;  %v2663_v56 = vpop.permute.xlu1 %2662  ;;  %v2570_v21 = vld [vmem:[#allocation4 + $0x60] sm:$0xff]  ;;  %v2763_v1 = vmul.f32 %v7293_v27, %v2571_v43 }
 0x36f   : > { %v4425_v36 = vpop.f32.mrb[19].mxu1  ;;  %v7559_v59 = vpop.eup %4778 }
 0x370   : > { %2722 = vperm.xlu1 %4555, %v7527_v38   ;;  %v3266_v29 = vadd.f32 %v4423_v10, %v4311_v33  ;;  %v4426_v18 = vadd.f32 %v4425_v36, %v4424_v25  ;;  %v2762_v25 = vmul.f32 %v2653_v63, %v2570_v21  ;;  %v9075_v63 = vld [vmem:[#allocation155_spill] sm:$0xff] }
 0x371   : > { %2707 = vperm.xlu0 %4554, %v7533_v53  }
 0x372   : > { %v3368_v51 = vadd.f32 %v3266_v29, %v2758_v39  ;;  %v3269_v44 = vadd.f32 %v4426_v18, %v4314_v24  ;;  %v2673_v12 = vpop.permute.xlu1 %2672  ;;  %v2141_v39 = vld [vmem:[#allocation3] sm:$0xff] }
 0x374   : > { %2732 = vperm.xlu1 %4555, %v7536_v20   ;;  %v4315_v42 = vpop.f32.mrb[20].mxu0  ;;  %3401 = vst.msk [vmem:[#allocation4 + $0x40] sm:$0xff] %vm3392_vm15, %v3368_v51  ;;  %v3369_v6 = vadd.f32 %v3269_v44, %v2759_v28 }
 0x375   : > { %2717 = vperm.xlu0 %4554, %v7542_v5   ;;  %v4316_v58 = vpop.f32.mrb[21].mxu0 }
 0x376   : > { %v4427_v0 = vpop.f32.mrb[20].mxu1  ;;  %v4317_v30 = vadd.f32 %v4316_v58, %v4315_v42  ;;  %v4318_v62 = vpop.f32.mrb[22].mxu0  ;;  %3402 = vst.msk [vmem:[#allocation4 + $0x48] sm:$0xff] %vm3392_vm15, %v3369_v6  ;;  %v2572_v42 = vld [vmem:[#allocation4 + $0x70] sm:$0xff] }
 0x377   : > { %v4428_v47 = vpop.f32.mrb[21].mxu1  ;;  %v4319_v26 = vpop.f32.mrb[23].mxu0 }
 0x378   : > { %2742 = vperm.xlu1 %4555, %v7546_v54   ;;  %v4429_v32 = vadd.f32 %v4428_v47, %v4427_v0  ;;  %v4430_v34 = vpop.f32.mrb[22].mxu1  ;;  %v4320_v11 = vadd.f32 %v4319_v26, %v4318_v62  ;;  %v2173_v0 = vmul.f32 %v9075_v63, %v2141_v39  ;;  %v2144_v47 = vld [vmem:[#allocation3 + $0x18] sm:$0xff]  ;;  %v2165_v39 = vld [vmem:[#allocation3 + $0xc0] sm:$0xff] }
 0x379   : > { %2727 = vperm.xlu0 %4554, %v7550_v61   ;;  %v4431_v48 = vpop.f32.mrb[23].mxu1  ;;  %v2573_v26 = vld [vmem:[#allocation4 + $0x78] sm:$0xff] }
 0x37a   : > { %v3274_v40 = vadd.f32 %v4429_v32, %v4317_v30  ;;  %v4432_v17 = vadd.f32 %v4431_v48, %v4430_v34 }
 0x37c   : > { %v3370_v19 = vadd.f32 %v3274_v40, %v2760_v57  ;;  %v3277_v14 = vadd.f32 %v4432_v17, %v4320_v11  ;;  %v4321_v2 = vpop.f32.mrb[24].mxu0  ;;  %v2764_v11 = vmul.f32 %v2663_v56, %v2572_v42  ;;  %v9076_v57 = vld [vmem:[#allocation156_spill] sm:$0xff]  ;;  %v2765_v17 = vmul.f32 %v7299_v4, %v2573_v26  ;;  %v2150_v42 = vld [vmem:[#allocation3 + $0x48] sm:$0xff] }
 0x37d   : > { %2737 = vperm.xlu0 %4554, %v7554_v22   ;;  %v4322_v41 = vpop.f32.mrb[25].mxu0  ;;  %v2176_v40 = vmul.f32 %v9076_v57, %v2144_v47 }
 0x37e   : > { %3403 = vst.msk [vmem:[#allocation4 + $0x50] sm:$0xff] %vm3392_vm15, %v3370_v19  ;;  %v3371_v50 = vadd.f32 %v3277_v14, %v2761_v60  ;;  %v4433_v3 = vpop.f32.mrb[24].mxu1  ;;  %v4323_v9 = vadd.f32 %v4322_v41, %v4321_v2  ;;  %v4324_v7 = vpop.f32.mrb[26].mxu0  ;;  %v2146_v41 = vld [vmem:[#allocation3 + $0x28] sm:$0xff] }
 0x37f   : > { %v4434_v33 = vpop.f32.mrb[25].mxu1  ;;  %v4325_v15 = vpop.f32.mrb[27].mxu0 }
 0x380   : > { %3404 = vst.msk [vmem:[#allocation4 + $0x58] sm:$0xff] %vm3392_vm15, %v3371_v50  ;;  %v4435_v45 = vadd.f32 %v4434_v33, %v4433_v3  ;;  %v4436_v55 = vpop.f32.mrb[26].mxu1  ;;  %v4326_v49 = vadd.f32 %v4325_v15, %v4324_v7  ;;  %v2574_v33 = vld [vmem:[#allocation4 + $0x80] sm:$0xff] }
 0x381   : > { %2747 = vperm.xlu0 %4554, %v7559_v59   ;;  %v4437_v10 = vpop.f32.mrb[27].mxu1 }
 0x382   : > { %v3282_v24 = vadd.f32 %v4435_v45, %v4323_v9  ;;  %v4438_v8 = vadd.f32 %v4437_v10, %v4436_v55  ;;  %v9077_v55 = vld [vmem:[#allocation157_spill] sm:$0xff] }
 0x383   : > { %v2178_v4 = vmul.f32 %v9077_v55, %v2146_v41 }
 0x384   : > { %v3372_v37 = vadd.f32 %v3282_v24, %v2762_v25  ;;  %v3285_v23 = vadd.f32 %v4438_v8, %v4326_v49  ;;  %v2148_v24 = vld [vmem:[#allocation3 + $0x38] sm:$0xff] }
 0x386   : > { %3405 = vst.msk [vmem:[#allocation4 + $0x60] sm:$0xff] %vm3392_vm15, %v3372_v37  ;;  %v3373_v18 = vadd.f32 %v3285_v23, %v2763_v1  ;;  %v2766_v37 = vmul.f32 %v2673_v12, %v2574_v33  ;;  %v9079_v12 = vld [vmem:[#allocation54_spill] sm:$0xff] }
 0x387   : > { %v4327_v36 = vpop.f32.mrb[28].mxu0 }
 0x388   : > { %v4328_v29 = vpop.f32.mrb[29].mxu0  ;;  %3406 = vst.msk [vmem:[#allocation4 + $0x68] sm:$0xff] %vm3392_vm15, %v3373_v18 }
 0x389   : > { %v4439_v28 = vpop.f32.mrb[28].mxu1  ;;  %v4329_v51 = vadd.f32 %v4328_v29, %v4327_v36  ;;  %v4330_v44 = vpop.f32.mrb[30].mxu0  ;;  %v9078_v29 = vld [vmem:[#allocation53_spill] sm:$0xff] }
 0x38a   : > { %v4440_v58 = vpop.f32.mrb[29].mxu1  ;;  %v4331_v6 = vpop.f32.mrb[31].mxu0  ;;  %v2180_v18 = vmul.f32 %v9078_v29, %v2148_v24 }
 0x38b   : > { %v4441_v27 = vadd.f32 %v4440_v58, %v4439_v28  ;;  %v4442_v30 = vpop.f32.mrb[30].mxu1  ;;  %v4332_v62 = vadd.f32 %v4331_v6, %v4330_v44  ;;  %v2337_v46 = vpop.xlane.xlu1 %2336  ;;  %v2197_v6 = vmul.f32 %v7518_v31, %v2165_v39 }
 0x38c   : > { %v4443_v32 = vpop.f32.mrb[31].mxu1  ;;  %v2493_v34 = vadd.f32 %v2337_v46, %v2173_v0  ;;  %v2167_v46 = vld [vmem:[#allocation3 + $0xd0] sm:$0xff] }
 0x38d   : > { %v3290_v52 = vadd.f32 %v4441_v27, %v4329_v51  ;;  %v4444_v48 = vadd.f32 %v4443_v32, %v4442_v30  ;;  %v2457_v0 = vpop.xlane.xlu0 %2456  ;;  %v2182_v27 = vmul.f32 %v9079_v12, %v2150_v42 }
 0x38e   : > { %2526 = vst.msk [vmem:[#allocation3] sm:$0xff] %vm2525_vm4, %v2493_v34  ;;  %v2152_v34 = vld [vmem:[#allocation3 + $0x58] sm:$0xff] }
 0x38f   : > { %v3374_v60 = vadd.f32 %v3290_v52, %v2764_v11  ;;  %v3293_v19 = vadd.f32 %v4444_v48, %v4332_v62  ;;  %v2352_v14 = vpop.xlane.xlu1 %2351  ;;  %v4333_v2 = vpop.f32.mrb[32].mxu0  ;;  %v2517_v62 = vadd.f32 %v2457_v0, %v2197_v6 }
 0x390   : > { %v2496_v50 = vadd.f32 %v2352_v14, %v2176_v40  ;;  %v4334_v3 = vpop.f32.mrb[33].mxu0 }
 0x391   : > { %3407 = vst.msk [vmem:[#allocation4 + $0x70] sm:$0xff] %vm3392_vm15, %v3374_v60  ;;  %v3375_v9 = vadd.f32 %v3293_v19, %v2765_v17  ;;  %v4445_v7 = vpop.f32.mrb[32].mxu1  ;;  %v4335_v56 = vadd.f32 %v4334_v3, %v4333_v2  ;;  %v4336_v21 = vpop.f32.mrb[34].mxu0  ;;  %v2199_v17 = vmul.f32 %v7527_v38, %v2167_v46  ;;  %v9080_v60 = vld [vmem:[#allocation55_spill] sm:$0xff]  ;;  %v9081_v38 = vld [vmem:[#allocation57_spill] sm:$0xff] }
 0x392   : > { %2529 = vst.msk [vmem:[#allocation3 + $0x18] sm:$0xff] %vm2525_vm4, %v2496_v50  ;;  %v4446_v15 = vpop.f32.mrb[33].mxu1  ;;  %v4337_v45 = vpop.f32.mrb[35].mxu0  ;;  %2550 = vst.msk [vmem:[#allocation3 + $0xc0] sm:$0xff] %vm2525_vm4, %v2517_v62  ;;  %v2184_v19 = vmul.f32 %v9080_v60, %v2152_v34 }
 0x393   : > { %3408 = vst.msk [vmem:[#allocation4 + $0x78] sm:$0xff] %vm3392_vm15, %v3375_v9  ;;  %v4447_v49 = vadd.f32 %v4446_v15, %v4445_v7  ;;  %v4448_v43 = vpop.f32.mrb[34].mxu1  ;;  %v4338_v10 = vadd.f32 %v4337_v45, %v4336_v21  ;;  %v2362_v25 = vpop.xlane.xlu1 %2361  ;;  %v2154_v7 = vld [vmem:[#allocation3 + $0x68] sm:$0xff] }
 0x394   : > { %v4449_v8 = vpop.f32.mrb[35].mxu1  ;;  %v2498_v1 = vadd.f32 %v2362_v25, %v2178_v4  ;;  %v2467_v41 = vpop.xlane.xlu0 %2466  ;;  %v2186_v45 = vmul.f32 %v9081_v38, %v2154_v7 }
 0x395   : > { %v3298_v23 = vadd.f32 %v4447_v49, %v4335_v56  ;;  %v4450_v36 = vadd.f32 %v4449_v8, %v4448_v43  ;;  %v2519_v56 = vadd.f32 %v2467_v41, %v2199_v17  ;;  %v2169_v17 = vld [vmem:[#allocation3 + $0xe0] sm:$0xff] }
 0x396   : > { %2531 = vst.msk [vmem:[#allocation3 + $0x28] sm:$0xff] %vm2525_vm4, %v2498_v1 }
 0x397   : > { %v3376_v28 = vadd.f32 %v3298_v23, %v2766_v37  ;;  %v7576_v51 = vadd.f32 %v4450_v36, %v4338_v10  ;;  %v2372_v44 = vpop.xlane.xlu1 %2371  ;;  %2552 = vst.msk [vmem:[#allocation3 + $0xd0] sm:$0xff] %vm2525_vm4, %v2519_v56  ;;  %v2156_v10 = vld [vmem:[#allocation3 + $0x78] sm:$0xff] }
 0x398   : > { %v2500_v58 = vadd.f32 %v2372_v44, %v2180_v18  ;;  %v9082_v36 = vld [vmem:[#allocation56_spill] sm:$0xff] }
 0x399   : > { %3409 = vst.msk [vmem:[#allocation4 + $0x80] sm:$0xff] %vm3392_vm15, %v3376_v28  ;;  %v4339_v63 = vpop.f32.mrb[36].mxu0  ;;  %v2188_v39 = vmul.f32 %v9082_v36, %v2156_v10 }
 0x39a   : > { %2533 = vst.msk [vmem:[#allocation3 + $0x38] sm:$0xff] %vm2525_vm4, %v2500_v58  ;;  %v4340_v30 = vpop.f32.mrb[37].mxu0  ;;  %v2158_v58 = vld [vmem:[#allocation3 + $0x88] sm:$0xff] }
 0x39b   : > { %v2382_v47 = vpop.xlane.xlu1 %2381  ;;  %v4451_v26 = vpop.f32.mrb[36].mxu1  ;;  %v4341_v32 = vadd.f32 %v4340_v30, %v4339_v63  ;;  %v2190_v12 = vmul.f32 %v7502_v13, %v2158_v58 }
 0x39c   : > { %v2502_v11 = vadd.f32 %v2382_v47, %v2182_v27  ;;  %v4452_v52 = vpop.f32.mrb[37].mxu1  ;;  %v4342_v48 = vpop.f32.mrb[38].mxu0  ;;  %v2160_v47 = vld [vmem:[#allocation3 + $0x98] sm:$0xff] }
 0x39d   : > { %v4453_v31 = vadd.f32 %v4452_v52, %v4451_v26  ;;  %v4454_v57 = vpop.f32.mrb[38].mxu1  ;;  %v4343_v40 = vpop.f32.mrb[39].mxu0 }
 0x39e   : > { %2535 = vst.msk [vmem:[#allocation3 + $0x48] sm:$0xff] %vm2525_vm4, %v2502_v11  ;;  %v4344_v14 = vadd.f32 %v4343_v40, %v4342_v48  ;;  %v4455_v2 = vpop.f32.mrb[39].mxu1  ;;  %v2192_v40 = vmul.f32 %v7512_v16, %v2160_v47 }
 0x39f   : > { %v7586_v50 = vadd.f32 %v4453_v31, %v4341_v32  ;;  %v2392_v3 = vpop.xlane.xlu1 %2391  ;;  %v4456_v9 = vadd.f32 %v4455_v2, %v4454_v57 }
 0x3a0   : > { %v2504_v21 = vadd.f32 %v2392_v3, %v2184_v19  ;;  %v2201_v3 = vmul.f32 %v7536_v20, %v2169_v17 }
 0x3a1   : > { %v7588_v33 = vadd.f32 %v4456_v9, %v4344_v14  ;;  %v4345_v15 = vpop.f32.mrb[40].mxu0  ;;  %v2162_v14 = vld [vmem:[#allocation3 + $0xa8] sm:$0xff] }
 0x3a2   : > { %2537 = vst.msk [vmem:[#allocation3 + $0x58] sm:$0xff] %vm2525_vm4, %v2504_v21  ;;  %v4346_v55 = vpop.f32.mrb[41].mxu0  ;;  %v2194_v9 = vmul.f32 %v7524_v35, %v2162_v14  ;;  %v2168_v35 = vld [vmem:[#allocation3 + $0xd8] sm:$0xff] }
 0x3a3   : > { %v2402_v4 = vpop.xlane.xlu1 %2401  ;;  %v4457_v49 = vpop.f32.mrb[40].mxu1  ;;  %v4347_v43 = vadd.f32 %v4346_v55, %v4345_v15  ;;  %v2164_v15 = vld [vmem:[#allocation3 + $0xb8] sm:$0xff]  ;;  %v2166_v55 = vld [vmem:[#allocation3 + $0xc8] sm:$0xff]  ;;  %v2200_v10 = vmul.f32 %v7550_v61, %v2168_v35  ;;  %v2171_v61 = vld [vmem:[#allocation3 + $0xf0] sm:$0xff] }
 0x3a4   : > { %v2506_v25 = vadd.f32 %v2402_v4, %v2186_v45  ;;  %v4458_v24 = vpop.f32.mrb[41].mxu1  ;;  %v4348_v8 = vpop.f32.mrb[42].mxu0  ;;  %v2196_v38 = vmul.f32 %v7533_v53, %v2164_v15  ;;  %v2198_v20 = vmul.f32 %v7542_v5, %v2166_v55  ;;  %v2577_v35 = vld [vmem:[#allocation4 + $0x98] sm:$0xff] }
 0x3a5   : > { %v4459_v1 = vadd.f32 %v4458_v24, %v4457_v49  ;;  %v4460_v37 = vpop.f32.mrb[42].mxu1  ;;  %v4349_v23 = vpop.f32.mrb[43].mxu0  ;;  %v2170_v24 = vld [vmem:[#allocation3 + $0xe8] sm:$0xff] }
 0x3a6   : > { %2539 = vst.msk [vmem:[#allocation3 + $0x68] sm:$0xff] %vm2525_vm4, %v2506_v25  ;;  %v4350_v29 = vadd.f32 %v4349_v23, %v4348_v8  ;;  %v4461_v18 = vpop.f32.mrb[43].mxu1  ;;  %v2202_v53 = vmul.f32 %v7554_v22, %v2170_v24 }
 0x3a7   : > { %v7595_v28 = vadd.f32 %v4459_v1, %v4347_v43  ;;  %v2412_v44 = vpop.xlane.xlu1 %2411  ;;  %v4462_v42 = vadd.f32 %v4461_v18, %v4460_v37  ;;  %v2172_v18 = vld [vmem:[#allocation3 + $0xf8] sm:$0xff] }
 0x3a8   : > { %v2508_v6 = vadd.f32 %v2412_v44, %v2188_v39 }
 0x3a9   : > { %v7597_v63 = vadd.f32 %v4462_v42, %v4350_v29  ;;  %v4351_v0 = vpop.f32.mrb[44].mxu0 }
 0x3aa   : > { %2541 = vst.msk [vmem:[#allocation3 + $0x78] sm:$0xff] %vm2525_vm4, %v2508_v6  ;;  %v4352_v27 = vpop.f32.mrb[45].mxu0 }
 0x3ab   : > { %v2422_v30 = vpop.xlane.xlu1 %2421  ;;  %v4463_v62 = vpop.f32.mrb[44].mxu1  ;;  %v4353_v46 = vadd.f32 %v4352_v27, %v4351_v0  ;;  %v2204_v27 = vmul.f32 %v7559_v59, %v2172_v18 }
 0x3ac   : > { %v2510_v26 = vadd.f32 %v2422_v30, %v2190_v12  ;;  %v4464_v32 = vpop.f32.mrb[45].mxu1  ;;  %v4354_v34 = vpop.f32.mrb[46].mxu0 }
 0x3ad   : > { %v4465_v11 = vadd.f32 %v4464_v32, %v4463_v62  ;;  %v4466_v52 = vpop.f32.mrb[46].mxu1  ;;  %v4355_v48 = vpop.f32.mrb[47].mxu0 }
 0x3ae   : > { %2543 = vst.msk [vmem:[#allocation3 + $0x88] sm:$0xff] %vm2525_vm4, %v2510_v26  ;;  %v4356_v31 = vadd.f32 %v4355_v48, %v4354_v34  ;;  %v4467_v57 = vpop.f32.mrb[47].mxu1 }
 0x3af   : > { %v7603_v60 = vadd.f32 %v4465_v11, %v4353_v46  ;;  %v4468_v13 = vadd.f32 %v4467_v57, %v4466_v52  ;;  %v2432_v19 = vpop.xlane.xlu1 %2431  ;;  %v2477_v7 = vpop.xlane.xlu0 %2476  ;;  %v2203_v46 = vmul.f32 %v7546_v54, %v2171_v61  ;;  %v2576_v52 = vld [vmem:[#allocation4 + $0x90] sm:$0xff] }
 0x3b0   : > { %v2512_v2 = vadd.f32 %v2432_v19, %v2192_v40  ;;  %v2521_v21 = vadd.f32 %v2477_v7, %v2201_v3 }
 0x3b1   : > { %v7605_v41 = vadd.f32 %v4468_v13, %v4356_v31 }
 0x3b2   : > { %2545 = vst.msk [vmem:[#allocation3 + $0x98] sm:$0xff] %vm2525_vm4, %v2512_v2  ;;  %2554 = vst.msk [vmem:[#allocation3 + $0xe0] sm:$0xff] %vm2525_vm4, %v2521_v21  ;;  %v2578_v2 = vld [vmem:[#allocation4 + $0xa0] sm:$0xff] }
 0x3b3   : > { %v2442_v56 = vpop.xlane.xlu1 %2441 }
 0x3b4   : > { %v2514_v16 = vadd.f32 %v2442_v56, %v2194_v9  ;;  %v2575_v56 = vld [vmem:[#allocation4 + $0x88] sm:$0xff] }
 0x3b6   : > { %2547 = vst.msk [vmem:[#allocation3 + $0xa8] sm:$0xff] %vm2525_vm4, %v2514_v16 }
 0x3b7   : > { %v2452_v45 = vpop.xlane.xlu1 %2451 }
 0x3b8   : > { %v2516_v4 = vadd.f32 %v2452_v45, %v2196_v38 }
 0x3ba   : > { %2549 = vst.msk [vmem:[#allocation3 + $0xb8] sm:$0xff] %vm2525_vm4, %v2516_v4 }
 0x3bb   : > { %v2462_v49 = vpop.xlane.xlu1 %2461 }
 0x3bc   : > { %v2518_v43 = vadd.f32 %v2462_v49, %v2198_v20  ;;  %v2580_v20 = vld [vmem:[#allocation4 + $0xb0] sm:$0xff] }
 0x3be   : > { %2551 = vst.msk [vmem:[#allocation3 + $0xc8] sm:$0xff] %vm2525_vm4, %v2518_v43 }
 0x3bf   : > { %v2472_v25 = vpop.xlane.xlu1 %2471 }
 0x3c0   : > { %v2520_v8 = vadd.f32 %v2472_v25, %v2200_v10 }
 0x3c2   : > { %2553 = vst.msk [vmem:[#allocation3 + $0xd8] sm:$0xff] %vm2525_vm4, %v2520_v8  ;;  %v2582_v8 = vld [vmem:[#allocation4 + $0xc0] sm:$0xff] }
 0x3c3   : > { %v2482_v1 = vpop.xlane.xlu1 %2481 }
 0x3c4   : > { %v2522_v37 = vadd.f32 %v2482_v1, %v2202_v53  ;;  %v2579_v1 = vld [vmem:[#allocation4 + $0xa8] sm:$0xff] }
 0x3c6   : > { %2555 = vst.msk [vmem:[#allocation3 + $0xe8] sm:$0xff] %vm2525_vm4, %v2522_v37 }
 0x3cb   : > { %v4357_v23 = vpop.f32.mrb[48].mxu0 }
 0x3cc   : > { %v4358_v5 = vpop.f32.mrb[49].mxu0 }
 0x3cd   : > { %v4469_v36 = vpop.f32.mrb[48].mxu1  ;;  %v4359_v39 = vadd.f32 %v4358_v5, %v4357_v23  ;;  %v4360_v29 = vpop.f32.mrb[50].mxu0 }
 0x3ce   : > { %v4470_v44 = vpop.f32.mrb[49].mxu1  ;;  %v4361_v42 = vpop.f32.mrb[51].mxu0 }
 0x3cf   : > { %v4471_v58 = vadd.f32 %v4470_v44, %v4469_v36  ;;  %v4472_v6 = vpop.f32.mrb[50].mxu1  ;;  %v4362_v0 = vadd.f32 %v4361_v42, %v4360_v29  ;;  %v2584_v36 = vld [vmem:[#allocation4 + $0xd0] sm:$0xff]  ;;  %v2581_v29 = vld [vmem:[#allocation4 + $0xb8] sm:$0xff] }
 0x3d0   : > { %v4473_v12 = vpop.f32.mrb[51].mxu1 }
 0x3d1   : > { %v3330_v22 = vadd.f32 %v4471_v58, %v4359_v39  ;;  %v4474_v30 = vadd.f32 %v4473_v12, %v4472_v6 }
 0x3d3   : > { %v7622_v32 = vadd.f32 %v4474_v30, %v4362_v0  ;;  %v4363_v34 = vpop.f32.mrb[52].mxu0  ;;  %v2586_v30 = vld [vmem:[#allocation4 + $0xe0] sm:$0xff] }
 0x3d4   : > { %v4364_v48 = vpop.f32.mrb[53].mxu0 }
 0x3d5   : > { %v4475_v31 = vpop.f32.mrb[52].mxu1  ;;  %v4365_v57 = vadd.f32 %v4364_v48, %v4363_v34  ;;  %v4366_v40 = vpop.f32.mrb[54].mxu0 }
 0x3d6   : > { %v4476_v17 = vpop.f32.mrb[53].mxu1  ;;  %v4367_v14 = vpop.f32.mrb[55].mxu0 }
 0x3d7   : > { %v4477_v19 = vadd.f32 %v4476_v17, %v4475_v31  ;;  %v4478_v54 = vpop.f32.mrb[54].mxu1  ;;  %v4368_v3 = vadd.f32 %v4367_v14, %v4366_v40 }
 0x3d8   : > { %v4479_v9 = vpop.f32.mrb[55].mxu1 }
 0x3d9   : > { %v3338_v21 = vadd.f32 %v4477_v19, %v4365_v57  ;;  %v4480_v15 = vadd.f32 %v4479_v9, %v4478_v54  ;;  %v2585_v19 = vld [vmem:[#allocation4 + $0xd8] sm:$0xff] }
 0x3db   : > { %v7628_v55 = vadd.f32 %v4480_v15, %v4368_v3 }
 0x3dc   : > { %v2492_v62 = vpop.xlane.xlu1 %2491  ;;  %v2487_v26 = vpop.xlane.xlu0 %2486 }
 0x3dd   : > { %v2524_v47 = vadd.f32 %v2492_v62, %v2204_v27  ;;  %v2523_v11 = vadd.f32 %v2487_v26, %v2203_v46 }
 0x3df   : > { %2557 = vst.msk [vmem:[#allocation3 + $0xf8] sm:$0xff] %vm2525_vm4, %v2524_v47  ;;  %2556 = vst.msk [vmem:[#allocation3 + $0xf0] sm:$0xff] %vm2525_vm4, %v2523_v11  ;;  %v2583_v47 = vld [vmem:[#allocation4 + $0xc8] sm:$0xff] }
 0x3e0   : > { %v2683_v59 = vpop.permute.xlu1 %2682 }
 0x3e1   : > { %v2768_v13 = vmul.f32 %v2683_v59, %v2576_v52 }
 0x3e3   : > { %v3378_v7 = vadd.f32 %v7586_v50, %v2768_v13 }
 0x3e4   : > { %v2693_v16 = vpop.permute.xlu1 %2692  ;;  %v2678_v45 = vpop.permute.xlu0 %2677 }
 0x3e5   : > { %3411 = vst.msk [vmem:[#allocation4 + $0x90] sm:$0xff] %vm3392_vm15, %v3378_v7  ;;  %v2770_v38 = vmul.f32 %v2693_v16, %v2578_v2  ;;  %v2767_v4 = vmul.f32 %v2678_v45, %v2575_v56  ;;  %v2587_v2 = vld [vmem:[#allocation4 + $0xe8] sm:$0xff] }
 0x3e7   : > { %v3380_v49 = vadd.f32 %v7595_v28, %v2770_v38  ;;  %v3377_v43 = vadd.f32 %v7576_v51, %v2767_v4  ;;  %v2588_v4 = vld [vmem:[#allocation4 + $0xf0] sm:$0xff] }
 0x3e8   : > { %v2703_v10 = vpop.permute.xlu1 %2702  ;;  %v2688_v25 = vpop.permute.xlu0 %2687 }
 0x3e9   : > { %3413 = vst.msk [vmem:[#allocation4 + $0xa0] sm:$0xff] %vm3392_vm15, %v3380_v49  ;;  %v2772_v50 = vmul.f32 %v2703_v10, %v2580_v20  ;;  %3410 = vst.msk [vmem:[#allocation4 + $0x88] sm:$0xff] %vm3392_vm15, %v3377_v43  ;;  %v2769_v24 = vmul.f32 %v2688_v25, %v2577_v35 }
 0x3eb   : > { %v3382_v53 = vadd.f32 %v7603_v60, %v2772_v50  ;;  %v3379_v37 = vadd.f32 %v7588_v33, %v2769_v24  ;;  %v4369_v18 = vpop.f32.mrb[56].mxu0 }
 0x3ec   : > { %v2713_v23 = vpop.permute.xlu1 %2712  ;;  %v2698_v5 = vpop.permute.xlu0 %2697 }
 0x3ed   : > { %3415 = vst.msk [vmem:[#allocation4 + $0xb0] sm:$0xff] %vm3392_vm15, %v3382_v53  ;;  %v2774_v28 = vmul.f32 %v2713_v23, %v2582_v8  ;;  %3412 = vst.msk [vmem:[#allocation4 + $0x98] sm:$0xff] %vm3392_vm15, %v3379_v37  ;;  %v2771_v51 = vmul.f32 %v2698_v5, %v2579_v1  ;;  %v4370_v61 = vpop.f32.mrb[57].mxu0 }
 0x3ee   : > { %v4371_v6 = vadd.f32 %v4370_v61, %v4369_v18  ;;  %v4372_v27 = vpop.f32.mrb[58].mxu0 }
 0x3ef   : > { %v3384_v39 = vadd.f32 %v3330_v22, %v2774_v28  ;;  %v3381_v44 = vadd.f32 %v7597_v63, %v2771_v51  ;;  %v4481_v58 = vpop.f32.mrb[56].mxu1  ;;  %v4373_v26 = vpop.f32.mrb[59].mxu0 }
 0x3f0   : > { %v2723_v42 = vpop.permute.xlu1 %2722  ;;  %v2708_v33 = vpop.permute.xlu0 %2707  ;;  %v4374_v11 = vadd.f32 %v4373_v26, %v4372_v27 }
 0x3f1   : > { %3417 = vst.msk [vmem:[#allocation4 + $0xc0] sm:$0xff] %vm3392_vm15, %v3384_v39  ;;  %v2776_v60 = vmul.f32 %v2723_v42, %v2584_v36  ;;  %3414 = vst.msk [vmem:[#allocation4 + $0xa8] sm:$0xff] %vm3392_vm15, %v3381_v44  ;;  %v2773_v0 = vmul.f32 %v2708_v33, %v2581_v29  ;;  %v4482_v12 = vpop.f32.mrb[57].mxu1 }
 0x3f2   : > { %v4483_v22 = vadd.f32 %v4482_v12, %v4481_v58  ;;  %v4484_v46 = vpop.f32.mrb[58].mxu1 }
 0x3f3   : > { %v3386_v62 = vadd.f32 %v3338_v21, %v2776_v60  ;;  %v3383_v63 = vadd.f32 %v7605_v41, %v2773_v0  ;;  %v4485_v52 = vpop.f32.mrb[59].mxu1 }
 0x3f4   : > { %v2733_v34 = vpop.permute.xlu1 %2732  ;;  %v3346_v48 = vadd.f32 %v4483_v22, %v4371_v6  ;;  %v2718_v57 = vpop.permute.xlu0 %2717  ;;  %v4486_v40 = vadd.f32 %v4485_v52, %v4484_v46 }
 0x3f5   : > { %3419 = vst.msk [vmem:[#allocation4 + $0xd0] sm:$0xff] %vm3392_vm15, %v3386_v62  ;;  %v2778_v31 = vmul.f32 %v2733_v34, %v2586_v30  ;;  %3416 = vst.msk [vmem:[#allocation4 + $0xb8] sm:$0xff] %vm3392_vm15, %v3383_v63  ;;  %v2775_v59 = vmul.f32 %v2718_v57, %v2583_v47 }
 0x3f6   : > { %v3349_v13 = vadd.f32 %v4486_v40, %v4374_v11 }
 0x3f7   : > { %v3388_v17 = vadd.f32 %v3346_v48, %v2778_v31  ;;  %v3385_v54 = vadd.f32 %v7622_v32, %v2775_v59 }
 0x3f8   : > { %v2728_v41 = vpop.permute.xlu0 %2727  ;;  %v2743_v15 = vpop.permute.xlu1 %2742 }
 0x3f9   : > { %3421 = vst.msk [vmem:[#allocation4 + $0xe0] sm:$0xff] %vm3392_vm15, %v3388_v17  ;;  %3418 = vst.msk [vmem:[#allocation4 + $0xc8] sm:$0xff] %vm3392_vm15, %v3385_v54  ;;  %v2777_v14 = vmul.f32 %v2728_v41, %v2585_v19  ;;  %v2780_v24 = vmul.f32 %v2743_v15, %v2588_v4 }
 0x3fb   : > { %v3387_v3 = vadd.f32 %v7628_v55, %v2777_v14  ;;  %v2589_v55 = vld [vmem:[#allocation4 + $0xf8] sm:$0xff] }
 0x3fc   : > { %v2738_v9 = vpop.permute.xlu0 %2737 }
 0x3fd   : > { %3420 = vst.msk [vmem:[#allocation4 + $0xd8] sm:$0xff] %vm3392_vm15, %v3387_v3  ;;  %v2779_v7 = vmul.f32 %v2738_v9, %v2587_v2 }
 0x3ff   : > { %v3389_v56 = vadd.f32 %v3349_v13, %v2779_v7 }
 0x400   : > { %v2748_v50 = vpop.permute.xlu0 %2747 }
 0x401   : > { %3422 = vst.msk [vmem:[#allocation4 + $0xe8] sm:$0xff] %vm3392_vm15, %v3389_v56  ;;  %v2781_v1 = vmul.f32 %v2748_v50, %v2589_v55 }
 0x41a   : > { %v4375_v21 = vpop.f32.mrb[60].mxu0 }
 0x41b   : > { %v4376_v16 = vpop.f32.mrb[61].mxu0 }
 0x41c   : > { %v4487_v32 = vpop.f32.mrb[60].mxu1  ;;  %v4377_v38 = vadd.f32 %v4376_v16, %v4375_v21  ;;  %v4378_v45 = vpop.f32.mrb[62].mxu0 }
 0x41d   : > { %v4488_v20 = vpop.f32.mrb[61].mxu1  ;;  %v4379_v49 = vpop.f32.mrb[63].mxu0 }
 0x41e   : > { %v4489_v35 = vadd.f32 %v4488_v20, %v4487_v32  ;;  %v4490_v43 = vpop.f32.mrb[62].mxu1  ;;  %v4380_v10 = vadd.f32 %v4379_v49, %v4378_v45 }
 0x41f   : > { %v4491_v25 = vpop.f32.mrb[63].mxu1 }
 0x420   : > { %v3354_v8 = vadd.f32 %v4489_v35, %v4377_v38  ;;  %v4492_v53 = vadd.f32 %v4491_v25, %v4490_v43 }
 0x422   : > { %v3390_v37 = vadd.f32 %v3354_v8, %v2780_v24  ;;  %v3357_v23 = vadd.f32 %v4492_v53, %v4380_v10 }
 0x424   : > { %3423 = vst.msk [vmem:[#allocation4 + $0xf0] sm:$0xff] %vm3392_vm15, %v3390_v37  ;;  %v3391_v28 = vadd.f32 %v3357_v23, %v2781_v1 }
 0x426   : > { %3424 = vst.msk [vmem:[#allocation4 + $0xf8] sm:$0xff] %vm3392_vm15, %v3391_v28 }
 0x427 PF: > { %p4265_p6 = scmp.ne.s32.totalorder %s4898_s25, 1 }
 0x428   : > { %v7653_v5 = vld [vmem:[#allocation3 + $0x10] sm:$0xff] (!%p4265_p6)  ;;  %v7655_v51 = vld [vmem:[#allocation3] sm:$0xff] (!%p4265_p6)  ;;  %v7657_v36 = vld [vmem:[#allocation3 + $0x18] sm:$0xff] (!%p4265_p6)  ;;  %v4920_v39 = vmov (!%p4265_p6), 0  }
 0x429   : > { %3460 = sbr.rel (%p4265_p6) target bundleno = 1334 (0x536), region = 71  ;;  %4781 = vset.pattern.permute.xlu1 (!%p4265_p6), %v4920_v39  ;;  %4780 = vset.pattern.permute.xlu0 (!%p4265_p6), %v4920_v39  ;;  %vm3495_vm4 = vcmp.gt.f32.partialorder (!%p4265_p6), %v7653_v5, 0.0  ;;  %vm3493_vm3 = vcmp.gt.f32.partialorder (!%p4265_p6), %v7655_v51, 0.0  ;;  %vm3496_vm12 = vcmp.gt.f32.partialorder (!%p4265_p6), %v7657_v36, 0.0  ;;  %v7664_v29 = vld [vmem:[#allocation3 + $0x8] sm:$0xff] (!%p4265_p6)  ;;  %v7668_v44 = vld [vmem:[#allocation3 + $0x20] sm:$0xff] (!%p4265_p6) }
 0x42a   : > { %v7666_v18 = vld [vmem:[#allocation3 + $0x28] sm:$0xff] (!%p4265_p6)  ;;  %v3527_v42 = vsel (!%p4265_p6), %vm3495_vm4, %v7653_v5, 1.0  ;;  %v3525_v61 = vsel (!%p4265_p6), %vm3493_vm3, %v7655_v51, 1.0  ;;  %v3528_v60 = vsel (!%p4265_p6), %vm3496_vm12, %v7657_v36, 1.0  ;;  %vm3494_vm13 = vcmp.gt.f32.partialorder (!%p4265_p6), %v7664_v29, 0.0  ;;  %v7685_v58 = vld [vmem:[#allocation3 + $0x38] sm:$0xff] (!%p4265_p6) }
 0x42b   : > { %4782 = vrcp.f32 (!%p4265_p6), %v3527_v42  ;;  %v3526_v33 = vsel (!%p4265_p6), %vm3494_vm13, %v7664_v29, 1.0  ;;  %vm3498_vm2 = vcmp.gt.f32.partialorder (!%p4265_p6), %v7666_v18, 0.0  ;;  %vm3497_vm0 = vcmp.gt.f32.partialorder (!%p4265_p6), %v7668_v44, 0.0  ;;  %v7687_v6 = vld [vmem:[#allocation3 + $0x30] sm:$0xff] (!%p4265_p6)  ;;  %v7697_v27 = vld [vmem:[#allocation3 + $0x48] sm:$0xff] (!%p4265_p6)  ;;  %v7699_v30 = vld [vmem:[#allocation3 + $0x40] sm:$0xff] (!%p4265_p6) }
 0x42c   : > { %4784 = vrcp.f32 (!%p4265_p6), %v3525_v61  ;;  %v3530_v0 = vsel (!%p4265_p6), %vm3498_vm2, %v7666_v18, 1.0  ;;  %v3529_v12 = vsel (!%p4265_p6), %vm3497_vm0, %v7668_v44, 1.0  ;;  %vm3500_vm1 = vcmp.gt.f32.partialorder (!%p4265_p6), %v7685_v58, 0.0  ;;  %v7704_v22 = vld [vmem:[#allocation3 + $0x58] sm:$0xff] (!%p4265_p6)  ;;  %v7710_v47 = vld [vmem:[#allocation3 + $0x50] sm:$0xff] (!%p4265_p6)  ;;  %v7712_v26 = vld [vmem:[#allocation3 + $0x68] sm:$0xff] (!%p4265_p6) }
 0x42d   : > { %4786 = vrcp.f32 (!%p4265_p6), %v3528_v60  ;;  %vm8514_vm15 = vcmp.gt.f32.partialorder (!%p4265_p6), %v7687_v6, 0.0  ;;  %v3532_v62 = vsel (!%p4265_p6), %vm3500_vm1, %v7685_v58, 1.0  ;;  %vm8513_vm6 = vcmp.gt.f32.partialorder (!%p4265_p6), %v7697_v27, 0.0  ;;  %v7715_v63 = vld [vmem:[#allocation3 + $0x60] sm:$0xff] (!%p4265_p6)  ;;  %v7717_v34 = vld [vmem:[#allocation3 + $0x78] sm:$0xff] (!%p4265_p6)  ;;  %v7719_v11 = vld [vmem:[#allocation3 + $0x70] sm:$0xff] (!%p4265_p6) }
 0x42e   : > { %4788 = vrcp.f32 (!%p4265_p6), %v3526_v33  ;;  %v3531_v46 = vsel (!%p4265_p6), %vm8514_vm15, %v7687_v6, 1.0  ;;  %vm3501_vm14 = vcmp.gt.f32.partialorder (!%p4265_p6), %v7699_v30, 0.0  ;;  %vm3504_vm9 = vcmp.gt.f32.partialorder (!%p4265_p6), %v7704_v22, 0.0  ;;  %v7722_v48 = vld [vmem:[#allocation3 + $0x88] sm:$0xff] (!%p4265_p6)  ;;  %v7724_v31 = vld [vmem:[#allocation3 + $0x80] sm:$0xff] (!%p4265_p6)  ;;  %v7742_v54 = vld [vmem:[#allocation3 + $0x98] sm:$0xff] (!%p4265_p6) }
 0x42f   : > { %4790 = vrcp.f32 (!%p4265_p6), %v3530_v0  ;;  %v3534_v40 = vsel (!%p4265_p6), %vm8513_vm6, %v7697_v27, 1.0  ;;  %vm8520_vm7 = vcmp.gt.f32.partialorder (!%p4265_p6), %v7710_v47, 0.0  ;;  %vm8518_vm5 = vcmp.gt.f32.partialorder (!%p4265_p6), %v7712_v26, 0.0  ;;  %v7750_v2 = vld [vmem:[#allocation3 + $0x90] sm:$0xff] (!%p4265_p6)  ;;  %v7752_v3 = vld [vmem:[#allocation3 + $0xa8] sm:$0xff] (!%p4265_p6)  ;;  %v7754_v9 = vld [vmem:[#allocation3 + $0xa0] sm:$0xff] (!%p4265_p6) }
 0x430   : > { %4792 = vrcp.f32 %v3529_v12  ;;  %v3533_v17 = vsel %vm3501_vm14, %v7699_v30, 1.0  ;;  %vm8517_vm8 = vcmp.gt.f32.partialorder %v7715_v63, 0.0  ;;  %vm8515_vm11 = vcmp.gt.f32.partialorder %v7717_v34, 0.0  ;;  %v7765_v15 = vld [vmem:[#allocation3 + $0xb8] sm:$0xff]  ;;  %v7767_v16 = vld [vmem:[#allocation3 + $0xb0] sm:$0xff]  ;;  %v7780_v4 = vld [vmem:[#allocation3 + $0xc8] sm:$0xff] }
 0x431   : > { %4794 = vrcp.f32 %v3532_v62  ;;  %vm8516_vm10 = vcmp.gt.f32.partialorder %v7719_v11, 0.0  ;;  %v3536_v19 = vsel %vm3504_vm9, %v7704_v22, 1.0  ;;  %vm8519_vm6 = vcmp.gt.f32.partialorder %v7722_v48, 0.0  ;;  %v7787_v49 = vld [vmem:[#allocation3 + $0xc0] sm:$0xff]  ;;  %v7795_v43 = vld [vmem:[#allocation3 + $0xd8] sm:$0xff]  ;;  %v7823_v1 = vld [vmem:[#allocation3 + $0xd0] sm:$0xff] }
 0x432   : > { %4796 = vrcp.f32 %v3531_v46  ;;  %vm3509_vm15 = vcmp.gt.f32.partialorder %v7724_v31, 0.0  ;;  %v3535_v41 = vsel %vm8520_vm7, %v7710_v47, 1.0  ;;  %v3538_v14 = vsel %vm8518_vm5, %v7712_v26, 1.0  ;;  %v7841_v5 = vld [vmem:[#allocation3 + $0xe8] sm:$0xff]  ;;  %v7858_v18 = vld [vmem:[#allocation3 + $0xe0] sm:$0xff]  ;;  %v7876_v33 = vld [vmem:[#allocation3 + $0xf8] sm:$0xff] }
 0x433   : > { %4798 = vrcp.f32 %v3534_v40  ;;  %v3537_v7 = vsel %vm8517_vm8, %v7715_v63, 1.0  ;;  %v3540_v56 = vsel %vm8515_vm11, %v7717_v34, 1.0  ;;  %v3539_v21 = vsel %vm8516_vm10, %v7719_v11, 1.0 }
 0x434   : > { %4800 = vrcp.f32 %v3533_v17  ;;  %v7772_v38 = vsel %vm8519_vm6, %v7722_v48, 1.0  ;;  %v7777_v45 = vsel %vm3509_vm15, %v7724_v31, 1.0  ;;  %vm3512_vm11 = vcmp.gt.f32.partialorder %v7742_v54, 0.0 }
 0x435   : > { %v4783_v52 = vpop.eup %4782  ;;  %4802 = vrcp.f32 %v3536_v19  ;;  %vm3514_vm8 = vcmp.gt.f32.partialorder %v7752_v3, 0.0  ;;  %vm3513_vm5 = vcmp.gt.f32.partialorder %v7754_v9, 0.0  ;;  %vm3516_vm6 = vcmp.gt.f32.partialorder %v7765_v15, 0.0 }
 0x436   : > { %v4785_v57 = vpop.eup %4784  ;;  %3633 = vperm.xlu1 %4781, %v4783_v52   ;;  %4804 = vrcp.f32 %v3535_v41  ;;  %vm3515_vm7 = vcmp.gt.f32.partialorder %v7767_v16, 0.0  ;;  %v7792_v35 = vsel %vm3494_vm13, 1, %v4920_v39  ;;  %vm3518_vm10 = vcmp.gt.f32.partialorder %v7780_v4, 0.0 }
 0x437   : > { %v4787_v59 = vpop.eup %4786  ;;  %3623 = vperm.xlu0 %4780, %v4785_v57   ;;  %4806 = vrcp.f32 %v3538_v14  ;;  %v7800_v10 = vsel %vm3493_vm3, 1, %v4920_v39  ;;  %v7805_v55 = vsel %vm3496_vm12, 1, %v4920_v39  ;;  %v7810_v25 = vsel %vm3495_vm4, 1, %v4920_v39 }
 0x438   : > { %v4789_v13 = vpop.eup %4788  ;;  %4808 = vrcp.f32 %v3537_v7  ;;  %v7815_v24 = vsel %vm3498_vm2, 1, %v4920_v39  ;;  %v7820_v8 = vsel %vm3497_vm0, 1, %v4920_v39  ;;  %vm3517_vm3 = vcmp.gt.f32.partialorder %v7787_v49, 0.0 }
 0x439   : > { %v4791_v32 = vpop.eup %4790  ;;  %4810 = vrcp.f32 %v3540_v56  ;;  %v7828_v37 = vsel %vm3500_vm1, 1, %v4920_v39  ;;  %vm9083_vm4 = vcmp.gt.f32.partialorder %v7687_v6, 0.0  ;;  %vm9084_vm12 = vcmp.gt.f32.partialorder %v7697_v27, 0.0  ;;  %v7894_v27 = vld [vmem:[#allocation3 + $0xf0] sm:$0xff] }
 0x43a   : > { %3638 = vperm.xlu1 %4781, %v4787_v59   ;;  %v4793_v20 = vpop.eup %4792  ;;  %v7833_v23 = vsel %vm9083_vm4, 1, %v4920_v39  ;;  %v7838_v28 = vsel %vm9084_vm12, 1, %v4920_v39  ;;  %vm3520_vm13 = vcmp.gt.f32.partialorder %v7795_v43, 0.0  ;;  %v7846_v51 = vsel %vm3501_vm14, 1, %v4920_v39 }
 0x43b   : > { %3628 = vperm.xlu0 %4780, %v4789_v13   ;;  %v4795_v50 = vpop.eup %4794  ;;  %v7851_v36 = vsel %vm3504_vm9, 1, %v4920_v39  ;;  %vm9085_vm2 = vcmp.gt.f32.partialorder %v7710_v47, 0.0  ;;  %4812 = vrcp.f32 %v3539_v21  ;;  %vm9086_vm0 = vcmp.gt.f32.partialorder %v7712_v26, 0.0 }
 0x43c   : > { %v4797_v53 = vpop.eup %4796  ;;  %v7856_v29 = vsel %vm9085_vm2, 1, %v4920_v39  ;;  %v7863_v44 = vsel %vm9086_vm0, 1, %v4920_v39  ;;  %vm9087_vm1 = vcmp.gt.f32.partialorder %v7715_v63, 0.0  ;;  %vm9088_vm14 = vcmp.gt.f32.partialorder %v7717_v34, 0.0 }
 0x43d   : > { %v7868_v42 = vsel %vm9087_vm1, 1, %v4920_v39  ;;  %v7873_v61 = vsel %vm9088_vm14, 1, %v4920_v39  ;;  %v4799_v60 = vpop.eup %4798  ;;  %vm3519_vm9 = vcmp.gt.f32.partialorder %v7823_v1, 0.0  ;;  %vm9089_vm4 = vcmp.gt.f32.partialorder %v7719_v11, 0.0 }
 0x43e   : > { %3648 = vperm.xlu1 %4781, %v4791_v32   ;;  %v7881_v58 = vsel %vm9089_vm4, 1, %v4920_v39  ;;  %vm9090_vm12 = vcmp.gt.f32.partialorder %v7722_v48, 0.0  ;;  %v7891_v0 = vsel %vm3509_vm15, 1, %v4920_v39  ;;  %v4801_v12 = vpop.eup %4800  ;;  %vm3522_vm2 = vcmp.gt.f32.partialorder %v7841_v5, 0.0 }
 0x43f   : > { %3643 = vperm.xlu0 %4780, %v4793_v20   ;;  %v7886_v6 = vsel %vm9090_vm12, 1, %v4920_v39  ;;  %v7899_v30 = vsel %vm3512_vm11, 1, %v4920_v39  ;;  %vm9091_vm0 = vcmp.gt.f32.partialorder %v7750_v2, 0.0  ;;  %v7909_v22 = vsel %vm3514_vm8, 1, %v4920_v39  ;;  %v4803_v46 = vpop.eup %4802 }
 0x440   : > { %v7904_v62 = vsel %vm9091_vm0, 1, %v4920_v39  ;;  %vm3521_vm15 = vcmp.gt.f32.partialorder %v7858_v18, 0.0  ;;  %v7915_v47 = vsel %vm3513_vm5, 1, %v4920_v39  ;;  %v7920_v26 = vsel %vm3516_vm6, 1, %v4920_v39  ;;  %v4805_v34 = vpop.eup %4804  ;;  %vm9092_vm4 = vmmov %vm9091_vm0 }
 0x441   : > { %v7925_v63 = vsel %vm3515_vm7, 1, %v4920_v39  ;;  %vm3524_vm1 = vcmp.gt.f32.partialorder %v7876_v33, 0.0  ;;  %v7931_v11 = vsel %vm3518_vm10, 1, %v4920_v39  ;;  %v7936_v52 = vsel %vm3517_vm3, 1, %v4920_v39  ;;  %v4807_v31 = vpop.eup %4806 }
 0x442   : > { %3658 = vperm.xlu1 %4781, %v4795_v50   ;;  %v7941_v48 = vsel %vm3520_vm13, 1, %v4920_v39  ;;  %vm3523_vm14 = vcmp.gt.f32.partialorder %v7894_v27, 0.0  ;;  %v7947_v57 = vsel %vm3519_vm9, 1, %v4920_v39  ;;  %v7952_v40 = vsel %vm3522_vm2, 1, %v4920_v39  ;;  %v4809_v17 = vpop.eup %4808 }
 0x443   : > { %3653 = vperm.xlu0 %4780, %v4797_v53   ;;  %v7957_v59 = vsel %vm3521_vm15, 1, %v4920_v39  ;;  %v7962_v13 = vsel %vm3524_vm1, 1, %v4920_v39  ;;  %v7967_v19 = vsel %vm3523_vm14, 1, %v4920_v39  ;;  %v4811_v41 = vpop.eup %4810  ;;  %4814 = vrcp.f32 %v7772_v38 }
 0x444   : > { %4816 = vrcp.f32 %v7777_v45  ;;  %v3544_v14 = vsel %vm3512_vm11, %v7742_v54, 1.0  ;;  %v3543_v7 = vsel %vm9092_vm4, %v7750_v2, 1.0  ;;  %v3546_v39 = vsel %vm3514_vm8, %v7752_v3, 1.0 }
 0x445   : > { %v4813_v56 = vpop.eup %4812  ;;  %4818 = vrcp.f32 %v3544_v14  ;;  %v3545_v21 = vsel %vm3513_vm5, %v7754_v9, 1.0  ;;  %v3548_v54 = vsel %vm3516_vm6, %v7765_v15, 1.0  ;;  %v3547_v32 = vsel %vm3515_vm7, %v7767_v16, 1.0  ;;  %v3589_v14 = vld [vmem:[#allocation4] sm:$0xff] }
 0x446   : > { %3668 = vperm.xlu1 %4781, %v4799_v60   ;;  %4820 = vrcp.f32 %v3543_v7  ;;  %v3550_v3 = vsel %vm3518_vm10, %v7780_v4, 1.0  ;;  %v3549_v15 = vsel %vm3517_vm3, %v7787_v49, 1.0  ;;  %v3552_v16 = vsel %vm3520_vm13, %v7795_v43, 1.0 }
 0x447   : > { %3663 = vperm.xlu0 %4780, %v4801_v12   ;;  %4822 = vrcp.f32 %v3546_v39  ;;  %v3551_v4 = vsel %vm3519_vm9, %v7823_v1, 1.0  ;;  %v3554_v49 = vsel %vm3522_vm2, %v7841_v5, 1.0  ;;  %v3553_v43 = vsel %vm3521_vm15, %v7858_v18, 1.0 }
 0x448   : > { %4824 = vrcp.f32 %v3545_v21  ;;  %v3556_v1 = vsel %vm3524_vm1, %v7876_v33, 1.0  ;;  %v3555_v5 = vsel %vm3523_vm14, %v7894_v27, 1.0  ;;  %vm4005_vm6 = vcmask 261120   ;;  %v3592_v21 = vld [vmem:[#allocation4 + $0x18] sm:$0xff] }
 0x449   : > { %4826 = vrcp.f32 %v3548_v54 }
 0x44a   : > { %3678 = vperm.xlu1 %4781, %v4803_v46   ;;  %4828 = vrcp.f32 %v3547_v32 }
 0x44b   : > { %3673 = vperm.xlu0 %4780, %v4805_v34   ;;  %4830 = vrcp.f32 %v3550_v3 }
 0x44c   : > { %4832 = vrcp.f32 %v3549_v15 }
 0x44d   : > { %v4815_v2 = vpop.eup %4814  ;;  %4834 = vrcp.f32 %v3552_v16 }
 0x44e   : > { %3688 = vperm.xlu1 %4781, %v4807_v31   ;;  %v4817_v38 = vpop.eup %4816  ;;  %4836 = vrcp.f32 %v3551_v4 }
 0x44f   : > { %3683 = vperm.xlu0 %4780, %v4809_v17   ;;  %v4819_v9 = vpop.eup %4818  ;;  %4838 = vrcp.f32 %v3554_v49 }
 0x450   : > { %v4821_v45 = vpop.eup %4820  ;;  %4840 = vrcp.f32 %v3553_v43 }
 0x451   : > { %v4823_v20 = vpop.eup %4822  ;;  %4842 = vrcp.f32 %v3556_v1 }
 0x452   : > { %3698 = vperm.xlu1 %4781, %v4811_v41   ;;  %v4825_v50 = vpop.eup %4824  ;;  %4844 = vrcp.f32 %v3555_v5 }
 0x453   : > { %3693 = vperm.xlu0 %4780, %v4813_v56   ;;  %v4827_v53 = vpop.eup %4826 }
 0x454   : > { %v4829_v60 = vpop.eup %4828 }
 0x455   : > { %v4831_v12 = vpop.eup %4830 }
 0x456   : > { %3708 = vperm.xlu1 %4781, %v4815_v2   ;;  %v4833_v46 = vpop.eup %4832  ;;  %v3591_v2 = vld [vmem:[#allocation4 + $0x10] sm:$0xff] }
 0x457   : > { %3703 = vperm.xlu0 %4780, %v4817_v38   ;;  %v4835_v34 = vpop.eup %4834 }
 0x458   : > { %v4837_v18 = vpop.eup %4836 }
 0x459   : > { %v4839_v31 = vpop.eup %4838 }
 0x45a   : > { %3718 = vperm.xlu1 %4781, %v4819_v9   ;;  %v4841_v17 = vpop.eup %4840 }
 0x45b   : > { %3713 = vperm.xlu0 %4780, %v4821_v45   ;;  %v4843_v41 = vpop.eup %4842  ;;  %v3594_v45 = vld [vmem:[#allocation4 + $0x28] sm:$0xff] }
 0x45c   : > { %v4845_v33 = vpop.eup %4844 }
 0x45e   : > { %3728 = vperm.xlu1 %4781, %v4823_v20   ;;  %v3593_v20 = vld [vmem:[#allocation4 + $0x20] sm:$0xff] }
 0x45f   : > { %3723 = vperm.xlu0 %4780, %v4825_v50  }
 0x462   : > { %3738 = vperm.xlu1 %4781, %v4827_v53  }
 0x463   : > { %3733 = vperm.xlu0 %4780, %v4829_v60   ;;  %v3596_v60 = vld [vmem:[#allocation4 + $0x38] sm:$0xff] }
 0x466   : > { %3748 = vperm.xlu1 %4781, %v4831_v12   ;;  %v3595_v12 = vld [vmem:[#allocation4 + $0x30] sm:$0xff] }
 0x467   : > { %3743 = vperm.xlu0 %4780, %v4833_v46  }
 0x46a   : > { %3758 = vperm.xlu1 %4781, %v4835_v34  }
 0x46b   : > { %3753 = vperm.xlu0 %4780, %v4837_v18  }
 0x46e   : > { %3768 = vperm.xlu1 %4781, %v4839_v31  }
 0x46f   : > { %3763 = vperm.xlu0 %4780, %v4841_v17   ;;  %v3598_v17 = vld [vmem:[#allocation4 + $0x48] sm:$0xff] }
 0x472   : > { %3778 = vperm.xlu1 %4781, %v4843_v41  }
 0x473   : > { %3773 = vperm.xlu0 %4780, %v4845_v33   ;;  %v3597_v33 = vld [vmem:[#allocation4 + $0x40] sm:$0xff] }
 0x476   : > { %3849 = vperm.xlu1 %4781, %v7792_v35  }
 0x477   : > { %3846 = vperm.xlu0 %4780, %v7800_v10  }
 0x47a   : > { %3855 = vperm.xlu1 %4781, %v7805_v55  }
 0x47b   : > { %3852 = vperm.xlu0 %4780, %v7810_v25  }
 0x47e   : > { %3861 = vperm.xlu1 %4781, %v7815_v24  }
 0x47f   : > { %3858 = vperm.xlu0 %4780, %v7820_v8  }
 0x482   : > { %3867 = vperm.xlu1 %4781, %v7828_v37  }
 0x483   : > { %3864 = vperm.xlu0 %4780, %v7833_v23  }
 0x486   : > { %3873 = vperm.xlu1 %4781, %v7838_v28  }
 0x487   : > { %3870 = vperm.xlu0 %4780, %v7846_v51  }
 0x48a   : > { %3879 = vperm.xlu1 %4781, %v7851_v36  }
 0x48b   : > { %3876 = vperm.xlu0 %4780, %v7856_v29  }
 0x48e   : > { %3885 = vperm.xlu1 %4781, %v7863_v44  }
 0x48f   : > { %3882 = vperm.xlu0 %4780, %v7868_v42  }
 0x492   : > { %3891 = vperm.xlu1 %4781, %v7873_v61  }
 0x493   : > { %3888 = vperm.xlu0 %4780, %v7881_v58  }
 0x496   : > { %3897 = vperm.xlu1 %4781, %v7886_v6  }
 0x497   : > { %3894 = vperm.xlu0 %4780, %v7891_v0  }
 0x49a   : > { %3903 = vperm.xlu1 %4781, %v7899_v30  }
 0x49b   : > { %3900 = vperm.xlu0 %4780, %v7904_v62  }
 0x49e   : > { %3909 = vperm.xlu1 %4781, %v7909_v22  }
 0x49f   : > { %3906 = vperm.xlu0 %4780, %v7915_v47  }
 0x4a2   : > { %3915 = vperm.xlu1 %4781, %v7920_v26  }
 0x4a3   : > { %3912 = vperm.xlu0 %4780, %v7925_v63  }
 0x4a6   : > { %3921 = vperm.xlu1 %4781, %v7931_v11  }
 0x4a7   : > { %3918 = vperm.xlu0 %4780, %v7936_v52  }
 0x4aa   : > { %3927 = vperm.xlu1 %4781, %v7941_v48  }
 0x4ab   : > { %3924 = vperm.xlu0 %4780, %v7947_v57  }
 0x4ae   : > { %3933 = vperm.xlu1 %4781, %v7952_v40  }
 0x4af   : > { %3930 = vperm.xlu0 %4780, %v7957_v59  }
 0x4b2   : > { %3939 = vperm.xlu1 %4781, %v7962_v13   ;;  %v3590_v13 = vld [vmem:[#allocation4 + $0x8] sm:$0xff] }
 0x4b3   : > { %3936 = vperm.xlu0 %4780, %v7967_v19  }
 0x4b5   : > { %v3634_v35 = vpop.permute.xlu1 %3633 }
 0x4b6   : > { %v3624_v10 = vpop.permute.xlu0 %3623  ;;  %v3783_v15 = vmul.f32 %v3634_v35, %v3591_v2 }
 0x4b7   : > { %v3781_v39 = vmul.f32 %v3624_v10, %v3589_v14 }
 0x4b9   : > { %v3639_v55 = vpop.permute.xlu1 %3638 }
 0x4ba   : > { %v3629_v25 = vpop.permute.xlu0 %3628  ;;  %v3784_v3 = vmul.f32 %v3639_v55, %v3592_v21  ;;  %v3601_v21 = vld [vmem:[#allocation4 + $0x60] sm:$0xff] }
 0x4bb   : > { %v3782_v7 = vmul.f32 %v3629_v25, %v3590_v13 }
 0x4bd   : > { %v3649_v24 = vpop.permute.xlu1 %3648 }
 0x4be   : > { %v3644_v8 = vpop.permute.xlu0 %3643  ;;  %v3786_v49 = vmul.f32 %v3649_v24, %v3594_v45 }
 0x4bf   : > { %v3785_v43 = vmul.f32 %v3644_v8, %v3593_v20  ;;  %v3600_v8 = vld [vmem:[#allocation4 + $0x58] sm:$0xff] }
 0x4c1   : > { %v8045_v37 = vpop.permute.xlu1 %3658 }
 0x4c2   : > { %v8047_v23 = vpop.permute.xlu0 %3653  ;;  %v3788_v34 = vmul.f32 %v8045_v37, %v3596_v60 }
 0x4c3   : > { %v3787_v31 = vmul.f32 %v8047_v23, %v3595_v12  ;;  %v3599_v23 = vld [vmem:[#allocation4 + $0x50] sm:$0xff] }
 0x4c4   : > { %v3607_v12 = vld [vmem:[#allocation4 + $0x90] sm:$0xff] }
 0x4c5   : > { %v8049_v28 = vpop.permute.xlu1 %3668 }
 0x4c6   : > { %v8051_v51 = vpop.permute.xlu0 %3663  ;;  %v3790_v55 = vmul.f32 %v8049_v28, %v3598_v17  ;;  %v3609_v17 = vld [vmem:[#allocation4 + $0xa0] sm:$0xff] }
 0x4c7   : > { %v3789_v24 = vmul.f32 %v8051_v51, %v3597_v33 }
 0x4c9   : > { %v8053_v36 = vpop.permute.xlu1 %3678 }
 0x4ca   : > { %v8055_v29 = vpop.permute.xlu0 %3673 }
 0x4cd   : > { %v8057_v44 = vpop.permute.xlu1 %3688 }
 0x4ce   : > { %v8059_v42 = vpop.permute.xlu0 %3683 }
 0x4d1   : > { %v8061_v61 = vpop.permute.xlu1 %3698 }
 0x4d2   : > { %v8063_v58 = vpop.permute.xlu0 %3693 }
 0x4d5   : > { %v8065_v6 = vpop.permute.xlu1 %3708 }
 0x4d6   : > { %v8067_v0 = vpop.permute.xlu0 %3703 }
 0x4d9   : > { %v8069_v27 = vpop.permute.xlu1 %3718 }
 0x4da   : > { %v8071_v30 = vpop.permute.xlu0 %3713 }
 0x4dd   : > { %v8073_v62 = vpop.permute.xlu1 %3728 }
 0x4de   : > { %v8075_v22 = vpop.permute.xlu0 %3723 }
 0x4e1   : > { %v8077_v47 = vpop.permute.xlu1 %3738 }
 0x4e2   : > { %v8079_v26 = vpop.permute.xlu0 %3733 }
 0x4e5   : > { %v8081_v63 = vpop.permute.xlu1 %3748 }
 0x4e6   : > { %v8083_v11 = vpop.permute.xlu0 %3743 }
 0x4e9   : > { %v8085_v52 = vpop.permute.xlu1 %3758 }
 0x4ea   : > { %v8087_v48 = vpop.permute.xlu0 %3753 }
 0x4ed   : > { %v8089_v57 = vpop.permute.xlu1 %3768 }
 0x4ee   : > { %v8091_v40 = vpop.permute.xlu0 %3763 }
 0x4f1   : > { %v8093_v59 = vpop.permute.xlu1 %3778 }
 0x4f2   : > { %v8095_v19 = vpop.permute.xlu0 %3773 }
 0x4f5   : > { %v3850_v56 = vpop.permute.xlu1 %3849 }
 0x4f6   : > { %vm3942_vm7 = vcmp.eq.s32.totalorder %v3850_v56, 1  ;;  %v3847_v54 = vpop.permute.xlu0 %3846  ;;  %v3791_v56 = vmul.f32 %v8055_v29, %v3599_v23 }
 0x4f7   : > { %v3974_v32 = vsel %vm3942_vm7, %v3782_v7, 0.0  ;;  %vm3941_vm5 = vcmp.eq.s32.totalorder %v3847_v54, 1  ;;  %v3792_v7 = vmul.f32 %v8053_v36, %v3600_v8 }
 0x4f8   : > { %4007 = vst.msk [vmem:[%s5107_s9 + $0x8] sm:$0xff] %vm4005_vm6, %v3974_v32  ;;  %v3973_v38 = vsel %vm3941_vm5, %v3781_v39, 0.0  ;;  %v3602_v39 = vld [vmem:[#allocation4 + $0x68] sm:$0xff] }
 0x4f9   : > { %4006 = vst.msk [vmem:[%s5107_s9] sm:$0xff] %vm4005_vm6, %v3973_v38  ;;  %v3856_v9 = vpop.permute.xlu1 %3855  ;;  %v3794_v32 = vmul.f32 %v8057_v44, %v3602_v39  ;;  %v3793_v38 = vmul.f32 %v8059_v42, %v3601_v21  ;;  %v3615_v21 = vld [vmem:[#allocation4 + $0xd0] sm:$0xff] }
 0x4fa   : > { %vm3944_vm8 = vcmp.eq.s32.totalorder %v3856_v9, 1  ;;  %v3853_v16 = vpop.permute.xlu0 %3852  ;;  %v3603_v9 = vld [vmem:[#allocation4 + $0x70] sm:$0xff] }
 0x4fb   : > { %v3976_v4 = vsel %vm3944_vm8, %v3784_v3, 0.0  ;;  %vm3943_vm11 = vcmp.eq.s32.totalorder %v3853_v16, 1  ;;  %v3604_v3 = vld [vmem:[#allocation4 + $0x78] sm:$0xff]  ;;  %v3795_v20 = vmul.f32 %v8063_v58, %v3603_v9 }
 0x4fc   : > { %4009 = vst.msk [vmem:[%s5107_s9 + $0x18] sm:$0xff] %vm4005_vm6, %v3976_v4  ;;  %v3975_v50 = vsel %vm3943_vm11, %v3783_v15, 0.0  ;;  %v3796_v16 = vmul.f32 %v8061_v61, %v3604_v3  ;;  %v3606_v4 = vld [vmem:[#allocation4 + $0x88] sm:$0xff]  ;;  %v3617_v3 = vld [vmem:[#allocation4 + $0xe0] sm:$0xff] }
 0x4fd   : > { %4008 = vst.msk [vmem:[%s5107_s9 + $0x10] sm:$0xff] %vm4005_vm6, %v3975_v50  ;;  %v3862_v53 = vpop.permute.xlu1 %3861  ;;  %v3605_v50 = vld [vmem:[#allocation4 + $0x80] sm:$0xff] }
 0x4fe   : > { %vm3946_vm10 = vcmp.eq.s32.totalorder %v3862_v53, 1  ;;  %v3859_v1 = vpop.permute.xlu0 %3858  ;;  %v3797_v60 = vmul.f32 %v8067_v0, %v3605_v50 }
 0x4ff   : > { %v3978_v5 = vsel %vm3946_vm10, %v3786_v49, 0.0  ;;  %vm3945_vm3 = vcmp.eq.s32.totalorder %v3859_v1, 1  ;;  %v3608_v1 = vld [vmem:[#allocation4 + $0x98] sm:$0xff] }
 0x500   : > { %4011 = vst.msk [vmem:[%s5107_s9 + $0x28] sm:$0xff] %vm4005_vm6, %v3978_v5  ;;  %v3977_v46 = vsel %vm3945_vm3, %v3785_v43, 0.0  ;;  %v3798_v43 = vmul.f32 %v8065_v6, %v3606_v4 }
 0x501   : > { %4010 = vst.msk [vmem:[%s5107_s9 + $0x20] sm:$0xff] %vm4005_vm6, %v3977_v46  ;;  %v3868_v18 = vpop.permute.xlu1 %3867 }
 0x502   : > { %vm3948_vm13 = vcmp.eq.s32.totalorder %v3868_v18, 1  ;;  %v3865_v41 = vpop.permute.xlu0 %3864  ;;  %v3799_v18 = vmul.f32 %v8071_v30, %v3607_v12 }
 0x503   : > { %v3980_v35 = vsel %vm3948_vm13, %v3788_v34, 0.0  ;;  %vm3947_vm9 = vcmp.eq.s32.totalorder %v3865_v41, 1  ;;  %v3800_v34 = vmul.f32 %v8069_v27, %v3608_v1 }
 0x504   : > { %4013 = vst.msk [vmem:[%s5107_s9 + $0x38] sm:$0xff] %vm4005_vm6, %v3980_v35  ;;  %v3979_v10 = vsel %vm3947_vm9, %v3787_v31, 0.0  ;;  %v3610_v31 = vld [vmem:[#allocation4 + $0xa8] sm:$0xff] }
 0x505   : > { %4012 = vst.msk [vmem:[%s5107_s9 + $0x30] sm:$0xff] %vm4005_vm6, %v3979_v10  ;;  %v3874_v25 = vpop.permute.xlu1 %3873  ;;  %v3802_v35 = vmul.f32 %v8073_v62, %v3610_v31  ;;  %v3801_v10 = vmul.f32 %v8075_v22, %v3609_v17 }
 0x506   : > { %vm3950_vm12 = vcmp.eq.s32.totalorder %v3874_v25, 1  ;;  %v3871_v37 = vpop.permute.xlu0 %3870  ;;  %v3611_v25 = vld [vmem:[#allocation4 + $0xb0] sm:$0xff] }
 0x507   : > { %v3982_v13 = vsel %vm3950_vm12, %v3790_v55, 0.0  ;;  %vm3949_vm2 = vcmp.eq.s32.totalorder %v3871_v37, 1  ;;  %v3612_v55 = vld [vmem:[#allocation4 + $0xb8] sm:$0xff]  ;;  %v3803_v23 = vmul.f32 %v8079_v26, %v3611_v25 }
 0x508   : > { %4015 = vst.msk [vmem:[%s5107_s9 + $0x48] sm:$0xff] %vm4005_vm6, %v3982_v13  ;;  %v3981_v14 = vsel %vm3949_vm2, %v3789_v24, 0.0  ;;  %v3804_v37 = vmul.f32 %v8077_v47, %v3612_v55  ;;  %v3614_v13 = vld [vmem:[#allocation4 + $0xc8] sm:$0xff] }
 0x509   : > { %4014 = vst.msk [vmem:[%s5107_s9 + $0x40] sm:$0xff] %vm4005_vm6, %v3981_v14  ;;  %v3880_v28 = vpop.permute.xlu1 %3879  ;;  %v3613_v14 = vld [vmem:[#allocation4 + $0xc0] sm:$0xff] }
 0x50a   : > { %vm3952_vm0 = vcmp.eq.s32.totalorder %v3880_v28, 1  ;;  %v3877_v51 = vpop.permute.xlu0 %3876  ;;  %v3805_v39 = vmul.f32 %v8083_v11, %v3613_v14 }
 0x50b   : > { %v3984_v54 = vsel %vm3952_vm0, %v3792_v7, 0.0  ;;  %vm3951_vm15 = vcmp.eq.s32.totalorder %v3877_v51, 1  ;;  %v3616_v51 = vld [vmem:[#allocation4 + $0xd8] sm:$0xff] }
 0x50c   : > { %4017 = vst.msk [vmem:[%s5107_s9 + $0x58] sm:$0xff] %vm4005_vm6, %v3984_v54  ;;  %v3983_v2 = vsel %vm3951_vm15, %v3791_v56, 0.0  ;;  %v3806_v56 = vmul.f32 %v8081_v63, %v3614_v13 }
 0x50d   : > { %4016 = vst.msk [vmem:[%s5107_s9 + $0x50] sm:$0xff] %vm4005_vm6, %v3983_v2  ;;  %v3886_v36 = vpop.permute.xlu1 %3885 }
 0x50e   : > { %vm3954_vm1 = vcmp.eq.s32.totalorder %v3886_v36, 1  ;;  %v3883_v29 = vpop.permute.xlu0 %3882  ;;  %v3807_v36 = vmul.f32 %v8087_v48, %v3615_v21 }
 0x50f   : > { %v3986_v15 = vsel %vm3954_vm1, %v3794_v32, 0.0  ;;  %vm3953_vm14 = vcmp.eq.s32.totalorder %v3883_v29, 1  ;;  %v3808_v32 = vmul.f32 %v8085_v52, %v3616_v51 }
 0x510   : > { %4019 = vst.msk [vmem:[%s5107_s9 + $0x68] sm:$0xff] %vm4005_vm6, %v3986_v15  ;;  %v3985_v45 = vsel %vm3953_vm14, %v3793_v38, 0.0  ;;  %v3618_v38 = vld [vmem:[#allocation4 + $0xe8] sm:$0xff] }
 0x511   : > { %4018 = vst.msk [vmem:[%s5107_s9 + $0x60] sm:$0xff] %vm4005_vm6, %v3985_v45  ;;  %v3892_v44 = vpop.permute.xlu1 %3891  ;;  %v3810_v15 = vmul.f32 %v8089_v57, %v3618_v38  ;;  %v3809_v45 = vmul.f32 %v8091_v40, %v3617_v3 }
 0x512   : > { %vm3956_vm4 = vcmp.eq.s32.totalorder %v3892_v44, 1  ;;  %v3889_v42 = vpop.permute.xlu0 %3888  ;;  %v3619_v44 = vld [vmem:[#allocation4 + $0xf0] sm:$0xff] }
 0x513   : > { %v3988_v49 = vsel %vm3956_vm4, %v3796_v16, 0.0  ;;  %vm3955_vm7 = vcmp.eq.s32.totalorder %v3889_v42, 1  ;;  %v3620_v16 = vld [vmem:[#allocation4 + $0xf8] sm:$0xff]  ;;  %v3811_v50 = vmul.f32 %v8095_v19, %v3619_v44 }
 0x514   : > { %4021 = vst.msk [vmem:[%s5107_s9 + $0x78] sm:$0xff] %vm4005_vm6, %v3988_v49  ;;  %v3987_v53 = vsel %vm3955_vm7, %v3795_v20, 0.0  ;;  %v3812_v42 = vmul.f32 %v8093_v59, %v3620_v16 }
 0x515   : > { %4020 = vst.msk [vmem:[%s5107_s9 + $0x70] sm:$0xff] %vm4005_vm6, %v3987_v53  ;;  %v3898_v61 = vpop.permute.xlu1 %3897 }
 0x516   : > { %vm3958_vm5 = vcmp.eq.s32.totalorder %v3898_v61, 1  ;;  %v3895_v58 = vpop.permute.xlu0 %3894 }
 0x517   : > { %v3990_v5 = vsel %vm3958_vm5, %v3798_v43, 0.0  ;;  %vm3957_vm8 = vcmp.eq.s32.totalorder %v3895_v58, 1 }
 0x518   : > { %4023 = vst.msk [vmem:[%s5107_s9 + $0x88] sm:$0xff] %vm4005_vm6, %v3990_v5  ;;  %v3989_v46 = vsel %vm3957_vm8, %v3797_v60, 0.0 }
 0x519   : > { %4022 = vst.msk [vmem:[%s5107_s9 + $0x80] sm:$0xff] %vm4005_vm6, %v3989_v46  ;;  %v3904_v6 = vpop.permute.xlu1 %3903 }
 0x51a   : > { %vm3960_vm11 = vcmp.eq.s32.totalorder %v3904_v6, 1  ;;  %v3901_v0 = vpop.permute.xlu0 %3900 }
 0x51b   : > { %v3992_v41 = vsel %vm3960_vm11, %v3800_v34, 0.0  ;;  %vm3959_vm10 = vcmp.eq.s32.totalorder %v3901_v0, 1 }
 0x51c   : > { %4025 = vst.msk [vmem:[%s5107_s9 + $0x98] sm:$0xff] %vm4005_vm6, %v3992_v41  ;;  %v3991_v33 = vsel %vm3959_vm10, %v3799_v18, 0.0 }
 0x51d   : > { %4024 = vst.msk [vmem:[%s5107_s9 + $0x90] sm:$0xff] %vm4005_vm6, %v3991_v33  ;;  %v3910_v27 = vpop.permute.xlu1 %3909 }
 0x51e   : > { %vm3962_vm3 = vcmp.eq.s32.totalorder %v3910_v27, 1  ;;  %v3907_v30 = vpop.permute.xlu0 %3906 }
 0x51f   : > { %v3994_v24 = vsel %vm3962_vm3, %v3802_v35, 0.0  ;;  %vm3961_vm13 = vcmp.eq.s32.totalorder %v3907_v30, 1 }
 0x520   : > { %4027 = vst.msk [vmem:[%s5107_s9 + $0xa8] sm:$0xff] %vm4005_vm6, %v3994_v24  ;;  %v3993_v8 = vsel %vm3961_vm13, %v3801_v10, 0.0 }
 0x521   : > { %4026 = vst.msk [vmem:[%s5107_s9 + $0xa0] sm:$0xff] %vm4005_vm6, %v3993_v8  ;;  %v3916_v62 = vpop.permute.xlu1 %3915 }
 0x522   : > { %vm3964_vm9 = vcmp.eq.s32.totalorder %v3916_v62, 1  ;;  %v3913_v22 = vpop.permute.xlu0 %3912 }
 0x523   : > { %v3996_v7 = vsel %vm3964_vm9, %v3804_v37, 0.0  ;;  %vm3963_vm12 = vcmp.eq.s32.totalorder %v3913_v22, 1 }
 0x524   : > { %4029 = vst.msk [vmem:[%s5107_s9 + $0xb8] sm:$0xff] %vm4005_vm6, %v3996_v7  ;;  %v3995_v28 = vsel %vm3963_vm12, %v3803_v23, 0.0 }
 0x525   : > { %4028 = vst.msk [vmem:[%s5107_s9 + $0xb0] sm:$0xff] %vm4005_vm6, %v3995_v28  ;;  %v3922_v47 = vpop.permute.xlu1 %3921 }
 0x526   : > { %vm3966_vm2 = vcmp.eq.s32.totalorder %v3922_v47, 1  ;;  %v3919_v26 = vpop.permute.xlu0 %3918 }
 0x527   : > { %v3998_v54 = vsel %vm3966_vm2, %v3806_v56, 0.0  ;;  %vm3965_vm0 = vcmp.eq.s32.totalorder %v3919_v26, 1 }
 0x528   : > { %4031 = vst.msk [vmem:[%s5107_s9 + $0xc8] sm:$0xff] %vm4005_vm6, %v3998_v54  ;;  %v3997_v2 = vsel %vm3965_vm0, %v3805_v39, 0.0 }
 0x529   : > { %4030 = vst.msk [vmem:[%s5107_s9 + $0xc0] sm:$0xff] %vm4005_vm6, %v3997_v2  ;;  %v3928_v63 = vpop.permute.xlu1 %3927 }
 0x52a   : > { %vm3968_vm15 = vcmp.eq.s32.totalorder %v3928_v63, 1  ;;  %v3925_v11 = vpop.permute.xlu0 %3924 }
 0x52b   : > { %v4000_v29 = vsel %vm3968_vm15, %v3808_v32, 0.0  ;;  %vm3967_vm1 = vcmp.eq.s32.totalorder %v3925_v11, 1 }
 0x52c   : > { %4033 = vst.msk [vmem:[%s5107_s9 + $0xd8] sm:$0xff] %vm4005_vm6, %v4000_v29  ;;  %v3999_v9 = vsel %vm3967_vm1, %v3807_v36, 0.0 }
 0x52d   : > { %4032 = vst.msk [vmem:[%s5107_s9 + $0xd0] sm:$0xff] %vm4005_vm6, %v3999_v9  ;;  %v3934_v52 = vpop.permute.xlu1 %3933 }
 0x52e   : > { %vm3970_vm14 = vcmp.eq.s32.totalorder %v3934_v52, 1  ;;  %v3931_v48 = vpop.permute.xlu0 %3930 }
 0x52f   : > { %v4002_v20 = vsel %vm3970_vm14, %v3810_v15, 0.0  ;;  %vm3969_vm4 = vcmp.eq.s32.totalorder %v3931_v48, 1 }
 0x530   : > { %4035 = vst.msk [vmem:[%s5107_s9 + $0xe8] sm:$0xff] %vm4005_vm6, %v4002_v20  ;;  %v4001_v4 = vsel %vm3969_vm4, %v3809_v45, 0.0 }
 0x531   : > { %4034 = vst.msk [vmem:[%s5107_s9 + $0xe0] sm:$0xff] %vm4005_vm6, %v4001_v4  ;;  %v3940_v57 = vpop.permute.xlu1 %3939 }
 0x532   : > { %vm3972_vm7 = vcmp.eq.s32.totalorder %v3940_v57, 1  ;;  %v3937_v40 = vpop.permute.xlu0 %3936 }
 0x533   : > { %v4004_v49 = vsel %vm3972_vm7, %v3812_v42, 0.0  ;;  %vm3971_vm5 = vcmp.eq.s32.totalorder %v3937_v40, 1 }
 0x534   : > { %4037 = vst.msk [vmem:[%s5107_s9 + $0xf8] sm:$0xff] %vm4005_vm6, %v4004_v49  ;;  %v4003_v53 = vsel %vm3971_vm5, %v3811_v50, 0.0 }
 0x535   : > { %4036 = vst.msk [vmem:[%s5107_s9 + $0xf0] sm:$0xff] %vm4005_vm6, %v4003_v53 }
 0x536 PF: > { %s21_s28 = sadd.s32 1, %s4914_s28   ;;  %s9093_s23 = smov %s4894_s24 }
 0x537   : > { %p18_p7 = scmp.ge.s32.totalorder %s21_s28, 6   ;;  %s9094_s24 = smov %s5005_s10 }
 0x538   : > { %s9095_s25 = smov %s4906_s26  ;;  %s9096_s0 = smov %s4910_s27 }
 0x539   : > { %s9097_s26 = smov %s9100_s29  ;;  %s9098_s27 = smov %s9104_s30 }
 0x53a   :  { %20 = sbr.rel (!%p18_p7) target bundleno = 19 (0x13), region = 115 }

</bundles_post_ra>
